<compile_context>
chip_gen: v5e
topology: v5e:2x2
jax: 0.10.0
libtpu: 0.0.40
codegen_flags: <defaults>
</compile_context>

<pallas_src>
import functools
import math

import jax
import jax.numpy as jnp
from jax import lax
from jax.experimental import pallas as pl
from jax.experimental.pallas import tpu as pltpu


# ---------------------------------------------------------------------------
# Fused kernel: conv1+ReLU -> conv2+ReLU -> (conv3 . flatten . linear)+ReLU
# One grid step == B_TILE images; activations stay in VMEM as bf16 slabs.
# ---------------------------------------------------------------------------
def _fused_map_cnn_kernel(
    xph_ref,               # (B, P, Hp, Hp*C0)   bf16   phase-split images
    g1_ref, b1_ref,        # (P*kr, Hp*C0, W1*C1) bf16 , (1, W1*C1) f32
    g2_ref, b2_ref,        # (k2,   W1*C1, W2*C2) bf16 , (1, W2*C2) f32
    wc_ref, bc_ref,        # (H2,   W2*C2, O)     bf16 , (1, O)     f32
    o_ref,                 # (B, Hp, O) f32   (row 0 of each Hp block is valid)
    *, n_phases, kr, k2, n_fin_taps,
):
    b_tile, _, hp, hpc0 = xph_ref.shape
    rows = b_tile * hp
    f32 = jnp.float32

    def shift_up(v, i):
        # result[r, :] = v[(r + i) % rows, :].  Only rows whose shifted source
        # stays inside the same image's Hp-row block are ever consumed, so the
        # circular wrap only feeds the (unused, finite) padding rows.
        return v if i == 0 else pltpu.roll(v, shift=rows - i, axis=0)

    # conv1 + ReLU  (stride via phase split; column taps folded into g1;
    #                row taps applied by rolling the f32 partial products)
    acc = None
    for p in range(n_phases):
        xp = xph_ref[:, p, :, :].reshape(rows, hpc0)          # (rows, Hp*C0) bf16
        for di in range(kr):
            d = jnp.dot(xp, g1_ref[p * kr + di], preferred_element_type=f32)
            d = shift_up(d, di)
            acc = d if acc is None else acc + d
    a1 = jnp.maximum(acc + b1_ref[...], 0.0).astype(jnp.bfloat16)   # (rows, W1*C1)

    # conv2 + ReLU
    acc = None
    for i in range(k2):
        d = shift_up(jnp.dot(a1, g2_ref[i], preferred_element_type=f32), i)
        acc = d if acc is None else acc + d
    a2 = jnp.maximum(acc + b2_ref[...], 0.0).astype(jnp.bfloat16)   # (rows, W2*C2)

    # conv3 + NCHW flatten + linear (composed at build time) + ReLU
    acc = None
    for i in range(n_fin_taps):
        d = shift_up(jnp.dot(a2, wc_ref[i], preferred_element_type=f32), i)
        acc = d if acc is None else acc + d
    out = jnp.maximum(acc + bc_ref[...], 0.0)                       # (rows, O)
    o_ref[...] = out.reshape(o_ref.shape)


# ---------------------------------------------------------------------------
# Build-time weight preparation (done once, outside the forward pass)
# ---------------------------------------------------------------------------
def _conv_out(d, k, s):
    return (d - k) // s + 1


def _tap_matrix(w_oihw, i, j):
    """Conv tap (i, j) as a (cin, cout) matmul operand."""
    return jnp.transpose(w_oihw[:, :, i, j], (1, 0))


def _shifted_blockdiag(wmat, win, wout, shift):
    """(win*cin, wout*cout) matrix whose block [w+shift, w] = wmat."""
    sel = jnp.eye(win, wout, k=-shift, dtype=wmat.dtype)
    return jnp.kron(sel, wmat)


def _default_batch_tile():
    # M ~= 128 rows fills the v5e MXU; ~256 the v6e/v7x MXU (Hp = 8 rows/image).
    try:
        kind = jax.devices()[0].device_kind.lower()
    except Exception:
        kind = ""
    return 16 if ("v5 lite" in kind or "v5e" in kind) else 32


def build_fused_forward(params, map_size, output_size, batch_tile=None):
    (k1, k1w), (k2, k2w), (k3, k3w) = params["ksizes"]
    (s1, s1w), (s2, s2w), (s3, s3w) = params["strides"]
    assert k1 == k1w and k2 == k2w and k3 == k3w
    assert s1 == s1w and s2 == s2w and s3 == s3w
    # Fused path covers the 'oracle' MapCNN geometry (stride > 1 only in conv1).
    # TODO(synk): phase-split the in-VMEM activations to support the
    #             (6,6)/(3,3), (4,4)/(2,2), (2,2)/(1,1) geometry of other agents.
    assert s2 == 1 and s3 == 1 and k1 % s1 == 0 and map_size % s1 == 0

    C0 = params["conv1_w"].shape[1]
    C1 = params["conv1_w"].shape[0]
    C2 = params["conv2_w"].shape[0]
    C3 = params["conv3_w"].shape[0]
    O = output_size
    H1 = _conv_out(map_size, k1, s1)
    H2 = _conv_out(H1, k2, s2)
    H3 = _conv_out(H2, k3, s3)
    Hp = map_size // s1                 # phase-grid height == per-image row block
    kr = k1 // s1                       # conv1 row taps per phase
    n_phases = s1 * s1
    assert params["lin_w"].shape == (O, C3 * H3 * H3)
    assert H1 <= Hp

    # conv1: per-(phase, row-offset) column-banded bf16 operands
    g1 = jnp.stack([
        sum(_shifted_blockdiag(
                _tap_matrix(params["conv1_w"], s1 * di + pi, s1 * dj + pj),
                Hp, H1, dj)
            for dj in range(kr))
        for pi in range(s1) for pj in range(s1) for di in range(kr)
    ]).astype(jnp.bfloat16)                               # (P*kr, Hp*C0, H1*C1)

    # conv2: per-row-offset column-banded operands
    g2 = jnp.stack([
        sum(_shifted_blockdiag(_tap_matrix(params["conv2_w"], i, j), H1, H2, j)
            for j in range(k2))
        for i in range(k2)]).astype(jnp.bfloat16)         # (k2, H1*C1, H2*C2)

    b1t = jnp.tile(params["conv1_b"], H1).reshape(1, H1 * C1).astype(jnp.float32)
    b2t = jnp.tile(params["conv2_b"], H2).reshape(1, H2 * C2).astype(jnp.float32)

    # conv3 (no ReLU) and the NCHW-flatten + Linear are back-to-back linear maps:
    # compose them into a single per-row-offset banded operand at build time.
    Wl4 = params["lin_w"].reshape(O, C3, H3, H3).astype(jnp.float32)
    W3 = params["conv3_w"].astype(jnp.float32)            # (C3, C2, k3, k3)
    Wc = jnp.zeros((O, C2, H2, H2), jnp.float32)
    for dh in range(k3):
        for dw in range(k3):
            contrib = jnp.einsum("ochw,cd->odhw", Wl4, W3[:, :, dh, dw])
            Wc = Wc.at[:, :, dh:dh + H3, dw:dw + H3].add(contrib)
    wc = jnp.transpose(Wc, (2, 3, 1, 0)).reshape(H2, H2 * C2, O).astype(jnp.bfloat16)
    bc = (params["lin_b"]
          + jnp.einsum("ochw,c->o", Wl4, params["conv3_b"])
          ).reshape(1, O).astype(jnp.float32)

    kernel = functools.partial(
        _fused_map_cnn_kernel,
        n_phases=n_phases, kr=kr, k2=k2, n_fin_taps=H2)

    if batch_tile is None:
        batch_tile = _default_batch_tile()

    macs_per_row = (n_phases * kr * (Hp * C0) * (H1 * C1)
                    + k2 * (H1 * C1) * (H2 * C2)
                    + H2 * (H2 * C2) * O)
    weight_bytes = 2 * (g1.size + g2.size + wc.size) \
        + 4 * (b1t.size + b2t.size + bc.size)

    @jax.jit
    def forward(observations):
        n = observations.shape[0]
        b_tile = min(batch_tile, n)
        n_pad = pl.cdiv(n, b_tile) * b_tile
        n_steps = n_pad // b_tile
        rows = b_tile * Hp

        # Non-duplicating phase split of the stride-s1 conv1 input, in bf16:
        # (N, H, W, C) -> (N, s1*s1, Hp, Hp*C0)
        x = observations.astype(jnp.bfloat16)
        x = x.reshape(n, Hp, s1, Hp, s1, C0)
        x = jnp.transpose(x, (0, 2, 4, 1, 3, 5))
        xph = x.reshape(n, n_phases, Hp, Hp * C0)
        if n_pad != n:
            xph = jnp.pad(xph, ((0, n_pad - n), (0, 0), (0, 0), (0, 0)))

        cost = pl.CostEstimate(
            flops=2 * n_steps * rows * macs_per_row,
            transcendentals=0,
            bytes_accessed=2 * xph.size + n_steps * weight_bytes
                           + 4 * n_pad * Hp * O)

        out = pl.pallas_call(
            kernel,
            out_shape=jax.ShapeDtypeStruct((n_pad, Hp, O), jnp.float32),
            grid=(n_steps,),
            in_specs=[
                pl.BlockSpec((b_tile, n_phases, Hp, Hp * C0),
                             lambda i: (i, 0, 0, 0)),
                pl.BlockSpec(g1.shape, lambda i: (0, 0, 0)),
                pl.BlockSpec(b1t.shape, lambda i: (0, 0)),
                pl.BlockSpec(g2.shape, lambda i: (0, 0, 0)),
                pl.BlockSpec(b2t.shape, lambda i: (0, 0)),
                pl.BlockSpec(wc.shape, lambda i: (0, 0, 0)),
                pl.BlockSpec(bc.shape, lambda i: (0, 0)),
            ],
            out_specs=pl.BlockSpec((b_tile, Hp, O), lambda i: (i, 0, 0)),
            compiler_params=pltpu.CompilerParams(
                dimension_semantics=("parallel",)),
            cost_estimate=cost,
        )(xph, g1, b1t, g2, b2t, wc, bc)

        # Row 0 of each per-image Hp-row block holds that image's embedding.
        return out[:n, 0, :]

    return forward


# ---------------------------------------------------------------------------
# Synthetic parameters (same layout/semantics as the PyTorch module)
# ---------------------------------------------------------------------------
def _kaiming_normal(key, shape, fan_in):
    std = math.sqrt(2.0) / math.sqrt(fan_in)
    return std * jax.random.normal(key, shape, dtype=jnp.float32)


def init_map_cnn_params(key, map_size, output_size, n_input_map=32,
                        agent_type="oracle"):
    if agent_type in ["oracle", "oracle-ego", "no-map", "obj-recog"]:
        ksizes = [(4, 4), (3, 3), (2, 2)]
        strides = [(2, 2), (1, 1), (1, 1)]
    else:
        ksizes = [(6, 6), (4, 4), (2, 2)]
        strides = [(3, 3), (2, 2), (1, 1)]
    dims = [map_size, map_size]
    for (kh, kw), (sh, sw) in zip(ksizes, strides):
        dims = [(dims[0] - kh) // sh + 1, (dims[1] - kw) // sw + 1]
    chans = [n_input_map, 32, 64, 32]
    keys = jax.random.split(key, 8)
    params = {"ksizes": ksizes, "strides": strides, "out_dims": tuple(dims)}
    for li in range(3):
        cin, cout = chans[li], chans[li + 1]
        kh, kw = ksizes[li]
        params[f"conv{li+1}_w"] = _kaiming_normal(
            keys[li], (cout, cin, kh, kw), fan_in=cin * kh * kw)
        # NOTE: the PyTorch module zero-inits biases; small nonzero synthetic
        # values are used here so the check also exercises the bias path.
        params[f"conv{li+1}_b"] = 0.05 * jax.random.normal(
            keys[4 + li], (cout,), dtype=jnp.float32)
    lin_in = chans[3] * dims[0] * dims[1]
    params["lin_w"] = _kaiming_normal(keys[3], (output_size, lin_in), fan_in=lin_in)
    params["lin_b"] = 0.05 * jax.random.normal(
        keys[7], (output_size,), dtype=jnp.float32)
    return params


# Pure-JAX reference of the module's forward (f32, for correctness checking).
def _reference_forward(observations, params):
    dn = ("NHWC", "OIHW", "NHWC")
    hi = lax.Precision.HIGHEST
    s = params["strides"]
    x = observations.astype(jnp.float32)
    x = lax.conv_general_dilated(x, params["conv1_w"], s[0], "VALID",
                                 dimension_numbers=dn, precision=hi)
    x = jnp.maximum(x + params["conv1_b"], 0.0)
    x = lax.conv_general_dilated(x, params["conv2_w"], s[1], "VALID",
                                 dimension_numbers=dn, precision=hi)
    x = jnp.maximum(x + params["conv2_b"], 0.0)
    x = lax.conv_general_dilated(x, params["conv3_w"], s[2], "VALID",
                                 dimension_numbers=dn, precision=hi)
    x = x + params["conv3_b"]
    n = x.shape[0]
    x = jnp.transpose(x, (0, 3, 1, 2)).reshape(n, -1)     # NCHW flatten
    out = jnp.dot(x, params["lin_w"].T, precision=hi) + params["lin_b"]
    return jnp.maximum(out, 0.0)


if __name__ == "__main__":
    map_size = 16
    output_size = 64
    n_input_map = 32

    key = jax.random.PRNGKey(0)
    k_params, k_obs1, k_obs2 = jax.random.split(key, 3)

    params = init_map_cnn_params(
        k_params, map_size, output_size, n_input_map=n_input_map,
        agent_type="oracle")
    forward = build_fused_forward(params, map_size, output_size)

    def check(obs, name):
        out = jax.block_until_ready(forward(obs))
        assert out.shape == (obs.shape[0], output_size), (name, out.shape)
        assert bool(jnp.all(out >= 0.0))                  # final ReLU
        ref = _reference_forward(obs, params)
        err = float(jnp.max(jnp.abs(out - ref)))
        scale = float(jnp.max(jnp.abs(ref))) + 1e-6
        assert err <= 5e-2 * scale, f"{name}: max_abs_err={err}, scale={scale}"

    # small, deterministic check (matches the module's expected input layout)
    obs_small = jax.random.uniform(
        k_obs1, (2, map_size, map_size, n_input_map), dtype=jnp.float32)
    check(obs_small, "batch=2")

    # exercise the batch-tiled / padded / multi-step-grid path
    obs_big = jax.random.uniform(
        k_obs2, (37, map_size, map_size, n_input_map), dtype=jnp.float32)
    check(obs_big, "batch=37")

    print("KERNEL_OK")
</pallas_src>

<mosaic_0001>
module attributes {stable_mosaic.version = 11 : i64} {
  func.func @_fused_map_cnn_kernel(%arg0: i32, %arg1: memref<2x4x8x256xbf16, #tpu.memory_space<vmem>>, %arg2: memref<8x256x224xbf16, #tpu.memory_space<vmem>>, %arg3: memref<1x224xf32, #tpu.memory_space<vmem>>, %arg4: memref<3x224x320xbf16, #tpu.memory_space<vmem>>, %arg5: memref<1x320xf32, #tpu.memory_space<vmem>>, %arg6: memref<5x320x64xbf16, #tpu.memory_space<vmem>>, %arg7: memref<1x64xf32, #tpu.memory_space<vmem>>, %arg8: memref<2x8x64xf32, #tpu.memory_space<vmem>>) attributes {dimension_semantics = [#tpu.dimension_semantics<parallel>], iteration_bounds = array<i64: 1>, scalar_prefetch = 0 : i64, scratch_operands = 0 : i64, tpu.core_type = #tpu.core_type<tc>, window_params = [{transform_indices = @transform_0, window_bounds = array<i64: 2, 4, 8, 256>}, {pipeline_mode = #tpu.pipeline_mode<synchronous>, transform_indices = @transform_1, window_bounds = array<i64: 8, 256, 224>}, {pipeline_mode = #tpu.pipeline_mode<synchronous>, transform_indices = @transform_2, window_bounds = array<i64: 1, 224>}, {pipeline_mode = #tpu.pipeline_mode<synchronous>, transform_indices = @transform_3, window_bounds = array<i64: 3, 224, 320>}, {pipeline_mode = #tpu.pipeline_mode<synchronous>, transform_indices = @transform_4, window_bounds = array<i64: 1, 320>}, {pipeline_mode = #tpu.pipeline_mode<synchronous>, transform_indices = @transform_5, window_bounds = array<i64: 5, 320, 64>}, {pipeline_mode = #tpu.pipeline_mode<synchronous>, transform_indices = @transform_6, window_bounds = array<i64: 1, 64>}, {transform_indices = @transform_7, window_bounds = array<i64: 2, 8, 64>}]} {
    %c0 = arith.constant 0 : index
    %c0_0 = arith.constant 0 : index
    %c0_1 = arith.constant 0 : index
    %c0_2 = arith.constant 0 : index
    %0 = vector.load %arg1[%c0, %c0_0, %c0_1, %c0_2] : memref<2x4x8x256xbf16, #tpu.memory_space<vmem>>, vector<2x1x8x256xbf16>
    %1 = vector.shape_cast %0 : vector<2x1x8x256xbf16> to vector<2x8x256xbf16>
    %2 = vector.shape_cast %1 : vector<2x8x256xbf16> to vector<16x256xbf16>
    %c0_3 = arith.constant 0 : index
    %c0_4 = arith.constant 0 : index
    %c0_5 = arith.constant 0 : index
    %3 = vector.load %arg2[%c0_3, %c0_4, %c0_5] : memref<8x256x224xbf16, #tpu.memory_space<vmem>>, vector<1x256x224xbf16>
    %4 = vector.shape_cast %3 : vector<1x256x224xbf16> to vector<256x224xbf16>
    %cst = arith.constant dense<0.000000e+00> : vector<16x224xf32>
    %5 = tpu.matmul %2, %4, %cst {dimension_numbers = #tpu.dot_dimension_numbers<[1], [0], [0], [1], [0, 0, 1, 1], [], []>} : vector<16x256xbf16>, vector<256x224xbf16>, vector<16x224xf32> -> vector<16x224xf32>
    %c1 = arith.constant 1 : index
    %c0_6 = arith.constant 0 : index
    %c0_7 = arith.constant 0 : index
    %6 = vector.load %arg2[%c1, %c0_6, %c0_7] : memref<8x256x224xbf16, #tpu.memory_space<vmem>>, vector<1x256x224xbf16>
    %7 = vector.shape_cast %6 : vector<1x256x224xbf16> to vector<256x224xbf16>
    %cst_8 = arith.constant dense<0.000000e+00> : vector<16x224xf32>
    %8 = tpu.matmul %2, %7, %cst_8 {dimension_numbers = #tpu.dot_dimension_numbers<[1], [0], [0], [1], [0, 0, 1, 1], [], []>} : vector<16x256xbf16>, vector<256x224xbf16>, vector<16x224xf32> -> vector<16x224xf32>
    %c15_i32 = arith.constant 15 : i32
    %9 = tpu.dynamic_rotate %8 by %c15_i32 dim 0 : vector<16x224xf32>, i32 -> vector<16x224xf32>
    %10 = arith.addf %5, %9 : vector<16x224xf32>
    %c0_9 = arith.constant 0 : index
    %c1_10 = arith.constant 1 : index
    %c0_11 = arith.constant 0 : index
    %c0_12 = arith.constant 0 : index
    %11 = vector.load %arg1[%c0_9, %c1_10, %c0_11, %c0_12] : memref<2x4x8x256xbf16, #tpu.memory_space<vmem>>, vector<2x1x8x256xbf16>
    %12 = vector.shape_cast %11 : vector<2x1x8x256xbf16> to vector<2x8x256xbf16>
    %13 = vector.shape_cast %12 : vector<2x8x256xbf16> to vector<16x256xbf16>
    %c2 = arith.constant 2 : index
    %c0_13 = arith.constant 0 : index
    %c0_14 = arith.constant 0 : index
    %14 = vector.load %arg2[%c2, %c0_13, %c0_14] : memref<8x256x224xbf16, #tpu.memory_space<vmem>>, vector<1x256x224xbf16>
    %15 = vector.shape_cast %14 : vector<1x256x224xbf16> to vector<256x224xbf16>
    %cst_15 = arith.constant dense<0.000000e+00> : vector<16x224xf32>
    %16 = tpu.matmul %13, %15, %cst_15 {dimension_numbers = #tpu.dot_dimension_numbers<[1], [0], [0], [1], [0, 0, 1, 1], [], []>} : vector<16x256xbf16>, vector<256x224xbf16>, vector<16x224xf32> -> vector<16x224xf32>
    %17 = arith.addf %10, %16 : vector<16x224xf32>
    %c3 = arith.constant 3 : index
    %c0_16 = arith.constant 0 : index
    %c0_17 = arith.constant 0 : index
    %18 = vector.load %arg2[%c3, %c0_16, %c0_17] : memref<8x256x224xbf16, #tpu.memory_space<vmem>>, vector<1x256x224xbf16>
    %19 = vector.shape_cast %18 : vector<1x256x224xbf16> to vector<256x224xbf16>
    %cst_18 = arith.constant dense<0.000000e+00> : vector<16x224xf32>
    %20 = tpu.matmul %13, %19, %cst_18 {dimension_numbers = #tpu.dot_dimension_numbers<[1], [0], [0], [1], [0, 0, 1, 1], [], []>} : vector<16x256xbf16>, vector<256x224xbf16>, vector<16x224xf32> -> vector<16x224xf32>
    %c15_i32_19 = arith.constant 15 : i32
    %21 = tpu.dynamic_rotate %20 by %c15_i32_19 dim 0 : vector<16x224xf32>, i32 -> vector<16x224xf32>
    %22 = arith.addf %17, %21 : vector<16x224xf32>
    %c0_20 = arith.constant 0 : index
    %c2_21 = arith.constant 2 : index
    %c0_22 = arith.constant 0 : index
    %c0_23 = arith.constant 0 : index
    %23 = vector.load %arg1[%c0_20, %c2_21, %c0_22, %c0_23] : memref<2x4x8x256xbf16, #tpu.memory_space<vmem>>, vector<2x1x8x256xbf16>
    %24 = vector.shape_cast %23 : vector<2x1x8x256xbf16> to vector<2x8x256xbf16>
    %25 = vector.shape_cast %24 : vector<2x8x256xbf16> to vector<16x256xbf16>
    %c4 = arith.constant 4 : index
    %c0_24 = arith.constant 0 : index
    %c0_25 = arith.constant 0 : index
    %26 = vector.load %arg2[%c4, %c0_24, %c0_25] : memref<8x256x224xbf16, #tpu.memory_space<vmem>>, vector<1x256x224xbf16>
    %27 = vector.shape_cast %26 : vector<1x256x224xbf16> to vector<256x224xbf16>
    %cst_26 = arith.constant dense<0.000000e+00> : vector<16x224xf32>
    %28 = tpu.matmul %25, %27, %cst_26 {dimension_numbers = #tpu.dot_dimension_numbers<[1], [0], [0], [1], [0, 0, 1, 1], [], []>} : vector<16x256xbf16>, vector<256x224xbf16>, vector<16x224xf32> -> vector<16x224xf32>
    %29 = arith.addf %22, %28 : vector<16x224xf32>
    %c5 = arith.constant 5 : index
    %c0_27 = arith.constant 0 : index
    %c0_28 = arith.constant 0 : index
    %30 = vector.load %arg2[%c5, %c0_27, %c0_28] : memref<8x256x224xbf16, #tpu.memory_space<vmem>>, vector<1x256x224xbf16>
    %31 = vector.shape_cast %30 : vector<1x256x224xbf16> to vector<256x224xbf16>
    %cst_29 = arith.constant dense<0.000000e+00> : vector<16x224xf32>
    %32 = tpu.matmul %25, %31, %cst_29 {dimension_numbers = #tpu.dot_dimension_numbers<[1], [0], [0], [1], [0, 0, 1, 1], [], []>} : vector<16x256xbf16>, vector<256x224xbf16>, vector<16x224xf32> -> vector<16x224xf32>
    %c15_i32_30 = arith.constant 15 : i32
    %33 = tpu.dynamic_rotate %32 by %c15_i32_30 dim 0 : vector<16x224xf32>, i32 -> vector<16x224xf32>
    %34 = arith.addf %29, %33 : vector<16x224xf32>
    %c0_31 = arith.constant 0 : index
    %c3_32 = arith.constant 3 : index
    %c0_33 = arith.constant 0 : index
    %c0_34 = arith.constant 0 : index
    %35 = vector.load %arg1[%c0_31, %c3_32, %c0_33, %c0_34] : memref<2x4x8x256xbf16, #tpu.memory_space<vmem>>, vector<2x1x8x256xbf16>
    %36 = vector.shape_cast %35 : vector<2x1x8x256xbf16> to vector<2x8x256xbf16>
    %37 = vector.shape_cast %36 : vector<2x8x256xbf16> to vector<16x256xbf16>
    %c6 = arith.constant 6 : index
    %c0_35 = arith.constant 0 : index
    %c0_36 = arith.constant 0 : index
    %38 = vector.load %arg2[%c6, %c0_35, %c0_36] : memref<8x256x224xbf16, #tpu.memory_space<vmem>>, vector<1x256x224xbf16>
    %39 = vector.shape_cast %38 : vector<1x256x224xbf16> to vector<256x224xbf16>
    %cst_37 = arith.constant dense<0.000000e+00> : vector<16x224xf32>
    %40 = tpu.matmul %37, %39, %cst_37 {dimension_numbers = #tpu.dot_dimension_numbers<[1], [0], [0], [1], [0, 0, 1, 1], [], []>} : vector<16x256xbf16>, vector<256x224xbf16>, vector<16x224xf32> -> vector<16x224xf32>
    %41 = arith.addf %34, %40 : vector<16x224xf32>
    %c7 = arith.constant 7 : index
    %c0_38 = arith.constant 0 : index
    %c0_39 = arith.constant 0 : index
    %42 = vector.load %arg2[%c7, %c0_38, %c0_39] : memref<8x256x224xbf16, #tpu.memory_space<vmem>>, vector<1x256x224xbf16>
    %43 = vector.shape_cast %42 : vector<1x256x224xbf16> to vector<256x224xbf16>
    %cst_40 = arith.constant dense<0.000000e+00> : vector<16x224xf32>
    %44 = tpu.matmul %37, %43, %cst_40 {dimension_numbers = #tpu.dot_dimension_numbers<[1], [0], [0], [1], [0, 0, 1, 1], [], []>} : vector<16x256xbf16>, vector<256x224xbf16>, vector<16x224xf32> -> vector<16x224xf32>
    %c15_i32_41 = arith.constant 15 : i32
    %45 = tpu.dynamic_rotate %44 by %c15_i32_41 dim 0 : vector<16x224xf32>, i32 -> vector<16x224xf32>
    %46 = arith.addf %41, %45 : vector<16x224xf32>
    %c0_42 = arith.constant 0 : index
    %c0_43 = arith.constant 0 : index
    %47 = vector.load %arg3[%c0_42, %c0_43] : memref<1x224xf32, #tpu.memory_space<vmem>>, vector<1x224xf32>
    %48 = vector.broadcast %47 : vector<1x224xf32> to vector<16x224xf32>
    %49 = arith.addf %46, %48 : vector<16x224xf32>
    %cst_44 = arith.constant 0.000000e+00 : f32
    %50 = vector.broadcast %cst_44 : f32 to vector<16x224xf32>
    %51 = arith.maximumf %49, %50 : vector<16x224xf32>
    %52 = arith.truncf %51 : vector<16x224xf32> to vector<16x224xbf16>
    %c0_45 = arith.constant 0 : index
    %c0_46 = arith.constant 0 : index
    %c0_47 = arith.constant 0 : index
    %53 = vector.load %arg4[%c0_45, %c0_46, %c0_47] : memref<3x224x320xbf16, #tpu.memory_space<vmem>>, vector<1x224x320xbf16>
    %54 = vector.shape_cast %53 : vector<1x224x320xbf16> to vector<224x320xbf16>
    %cst_48 = arith.constant dense<0.000000e+00> : vector<16x320xf32>
    %55 = tpu.matmul %52, %54, %cst_48 {dimension_numbers = #tpu.dot_dimension_numbers<[1], [0], [0], [1], [0, 0, 1, 1], [], []>} : vector<16x224xbf16>, vector<224x320xbf16>, vector<16x320xf32> -> vector<16x320xf32>
    %c1_49 = arith.constant 1 : index
    %c0_50 = arith.constant 0 : index
    %c0_51 = arith.constant 0 : index
    %56 = vector.load %arg4[%c1_49, %c0_50, %c0_51] : memref<3x224x320xbf16, #tpu.memory_space<vmem>>, vector<1x224x320xbf16>
    %57 = vector.shape_cast %56 : vector<1x224x320xbf16> to vector<224x320xbf16>
    %cst_52 = arith.constant dense<0.000000e+00> : vector<16x320xf32>
    %58 = tpu.matmul %52, %57, %cst_52 {dimension_numbers = #tpu.dot_dimension_numbers<[1], [0], [0], [1], [0, 0, 1, 1], [], []>} : vector<16x224xbf16>, vector<224x320xbf16>, vector<16x320xf32> -> vector<16x320xf32>
    %c15_i32_53 = arith.constant 15 : i32
    %59 = tpu.dynamic_rotate %58 by %c15_i32_53 dim 0 : vector<16x320xf32>, i32 -> vector<16x320xf32>
    %60 = arith.addf %55, %59 : vector<16x320xf32>
    %c2_54 = arith.constant 2 : index
    %c0_55 = arith.constant 0 : index
    %c0_56 = arith.constant 0 : index
    %61 = vector.load %arg4[%c2_54, %c0_55, %c0_56] : memref<3x224x320xbf16, #tpu.memory_space<vmem>>, vector<1x224x320xbf16>
    %62 = vector.shape_cast %61 : vector<1x224x320xbf16> to vector<224x320xbf16>
    %cst_57 = arith.constant dense<0.000000e+00> : vector<16x320xf32>
    %63 = tpu.matmul %52, %62, %cst_57 {dimension_numbers = #tpu.dot_dimension_numbers<[1], [0], [0], [1], [0, 0, 1, 1], [], []>} : vector<16x224xbf16>, vector<224x320xbf16>, vector<16x320xf32> -> vector<16x320xf32>
    %c14_i32 = arith.constant 14 : i32
    %64 = tpu.dynamic_rotate %63 by %c14_i32 dim 0 : vector<16x320xf32>, i32 -> vector<16x320xf32>
    %65 = arith.addf %60, %64 : vector<16x320xf32>
    %c0_58 = arith.constant 0 : index
    %c0_59 = arith.constant 0 : index
    %66 = vector.load %arg5[%c0_58, %c0_59] : memref<1x320xf32, #tpu.memory_space<vmem>>, vector<1x320xf32>
    %67 = vector.broadcast %66 : vector<1x320xf32> to vector<16x320xf32>
    %68 = arith.addf %65, %67 : vector<16x320xf32>
    %cst_60 = arith.constant 0.000000e+00 : f32
    %69 = vector.broadcast %cst_60 : f32 to vector<16x320xf32>
    %70 = arith.maximumf %68, %69 : vector<16x320xf32>
    %71 = arith.truncf %70 : vector<16x320xf32> to vector<16x320xbf16>
    %c0_61 = arith.constant 0 : index
    %c0_62 = arith.constant 0 : index
    %c0_63 = arith.constant 0 : index
    %72 = vector.load %arg6[%c0_61, %c0_62, %c0_63] : memref<5x320x64xbf16, #tpu.memory_space<vmem>>, vector<1x320x64xbf16>
    %73 = vector.shape_cast %72 : vector<1x320x64xbf16> to vector<320x64xbf16>
    %cst_64 = arith.constant dense<0.000000e+00> : vector<16x64xf32>
    %74 = tpu.matmul %71, %73, %cst_64 {dimension_numbers = #tpu.dot_dimension_numbers<[1], [0], [0], [1], [0, 0, 1, 1], [], []>} : vector<16x320xbf16>, vector<320x64xbf16>, vector<16x64xf32> -> vector<16x64xf32>
    %c1_65 = arith.constant 1 : index
    %c0_66 = arith.constant 0 : index
    %c0_67 = arith.constant 0 : index
    %75 = vector.load %arg6[%c1_65, %c0_66, %c0_67] : memref<5x320x64xbf16, #tpu.memory_space<vmem>>, vector<1x320x64xbf16>
    %76 = vector.shape_cast %75 : vector<1x320x64xbf16> to vector<320x64xbf16>
    %cst_68 = arith.constant dense<0.000000e+00> : vector<16x64xf32>
    %77 = tpu.matmul %71, %76, %cst_68 {dimension_numbers = #tpu.dot_dimension_numbers<[1], [0], [0], [1], [0, 0, 1, 1], [], []>} : vector<16x320xbf16>, vector<320x64xbf16>, vector<16x64xf32> -> vector<16x64xf32>
    %c15_i32_69 = arith.constant 15 : i32
    %78 = tpu.dynamic_rotate %77 by %c15_i32_69 dim 0 : vector<16x64xf32>, i32 -> vector<16x64xf32>
    %79 = arith.addf %74, %78 : vector<16x64xf32>
    %c2_70 = arith.constant 2 : index
    %c0_71 = arith.constant 0 : index
    %c0_72 = arith.constant 0 : index
    %80 = vector.load %arg6[%c2_70, %c0_71, %c0_72] : memref<5x320x64xbf16, #tpu.memory_space<vmem>>, vector<1x320x64xbf16>
    %81 = vector.shape_cast %80 : vector<1x320x64xbf16> to vector<320x64xbf16>
    %cst_73 = arith.constant dense<0.000000e+00> : vector<16x64xf32>
    %82 = tpu.matmul %71, %81, %cst_73 {dimension_numbers = #tpu.dot_dimension_numbers<[1], [0], [0], [1], [0, 0, 1, 1], [], []>} : vector<16x320xbf16>, vector<320x64xbf16>, vector<16x64xf32> -> vector<16x64xf32>
    %c14_i32_74 = arith.constant 14 : i32
    %83 = tpu.dynamic_rotate %82 by %c14_i32_74 dim 0 : vector<16x64xf32>, i32 -> vector<16x64xf32>
    %84 = arith.addf %79, %83 : vector<16x64xf32>
    %c3_75 = arith.constant 3 : index
    %c0_76 = arith.constant 0 : index
    %c0_77 = arith.constant 0 : index
    %85 = vector.load %arg6[%c3_75, %c0_76, %c0_77] : memref<5x320x64xbf16, #tpu.memory_space<vmem>>, vector<1x320x64xbf16>
    %86 = vector.shape_cast %85 : vector<1x320x64xbf16> to vector<320x64xbf16>
    %cst_78 = arith.constant dense<0.000000e+00> : vector<16x64xf32>
    %87 = tpu.matmul %71, %86, %cst_78 {dimension_numbers = #tpu.dot_dimension_numbers<[1], [0], [0], [1], [0, 0, 1, 1], [], []>} : vector<16x320xbf16>, vector<320x64xbf16>, vector<16x64xf32> -> vector<16x64xf32>
    %c13_i32 = arith.constant 13 : i32
    %88 = tpu.dynamic_rotate %87 by %c13_i32 dim 0 : vector<16x64xf32>, i32 -> vector<16x64xf32>
    %89 = arith.addf %84, %88 : vector<16x64xf32>
    %c4_79 = arith.constant 4 : index
    %c0_80 = arith.constant 0 : index
    %c0_81 = arith.constant 0 : index
    %90 = vector.load %arg6[%c4_79, %c0_80, %c0_81] : memref<5x320x64xbf16, #tpu.memory_space<vmem>>, vector<1x320x64xbf16>
    %91 = vector.shape_cast %90 : vector<1x320x64xbf16> to vector<320x64xbf16>
    %cst_82 = arith.constant dense<0.000000e+00> : vector<16x64xf32>
    %92 = tpu.matmul %71, %91, %cst_82 {dimension_numbers = #tpu.dot_dimension_numbers<[1], [0], [0], [1], [0, 0, 1, 1], [], []>} : vector<16x320xbf16>, vector<320x64xbf16>, vector<16x64xf32> -> vector<16x64xf32>
    %c12_i32 = arith.constant 12 : i32
    %93 = tpu.dynamic_rotate %92 by %c12_i32 dim 0 : vector<16x64xf32>, i32 -> vector<16x64xf32>
    %94 = arith.addf %89, %93 : vector<16x64xf32>
    %c0_83 = arith.constant 0 : index
    %c0_84 = arith.constant 0 : index
    %95 = vector.load %arg7[%c0_83, %c0_84] : memref<1x64xf32, #tpu.memory_space<vmem>>, vector<1x64xf32>
    %96 = vector.broadcast %95 : vector<1x64xf32> to vector<16x64xf32>
    %97 = arith.addf %94, %96 : vector<16x64xf32>
    %cst_85 = arith.constant 0.000000e+00 : f32
    %98 = vector.broadcast %cst_85 : f32 to vector<16x64xf32>
    %99 = arith.maximumf %97, %98 : vector<16x64xf32>
    %100 = vector.shape_cast %99 : vector<16x64xf32> to vector<2x8x64xf32>
    %c0_86 = arith.constant 0 : index
    %c0_87 = arith.constant 0 : index
    %c0_88 = arith.constant 0 : index
    %101 = vector.load %arg8[%c0_86, %c0_87, %c0_88] : memref<2x8x64xf32, #tpu.memory_space<vmem>>, vector<2x8x64xf32>
    tpu.vector_store %arg8[%c0_86, %c0_87, %c0_88], %100 {strides = array<i32>} : memref<2x8x64xf32, #tpu.memory_space<vmem>>, vector<2x8x64xf32>,
    return
  }
  func.func @transform_0(%arg0: i32) -> (i32, i32, i32, i32) {
    %c0_i32 = arith.constant 0 : i32
    %c0_i32_0 = arith.constant 0 : i32
    %c0_i32_1 = arith.constant 0 : i32
    %c0_i32_2 = arith.constant 0 : i32
    return %arg0, %c0_i32, %c0_i32_0, %c0_i32_1 : i32, i32, i32, i32
  }
  func.func @transform_1(%arg0: i32) -> (i32, i32, i32) {
    %c0_i32 = arith.constant 0 : i32
    %c0_i32_0 = arith.constant 0 : i32
    %c0_i32_1 = arith.constant 0 : i32
    %c0_i32_2 = arith.constant 0 : i32
    return %c0_i32, %c0_i32_0, %c0_i32_1 : i32, i32, i32
  }
  func.func @transform_2(%arg0: i32) -> (i32, i32) {
    %c0_i32 = arith.constant 0 : i32
    %c0_i32_0 = arith.constant 0 : i32
    %c0_i32_1 = arith.constant 0 : i32
    return %c0_i32, %c0_i32_0 : i32, i32
  }
  func.func @transform_3(%arg0: i32) -> (i32, i32, i32) {
    %c0_i32 = arith.constant 0 : i32
    %c0_i32_0 = arith.constant 0 : i32
    %c0_i32_1 = arith.constant 0 : i32
    %c0_i32_2 = arith.constant 0 : i32
    return %c0_i32, %c0_i32_0, %c0_i32_1 : i32, i32, i32
  }
  func.func @transform_4(%arg0: i32) -> (i32, i32) {
    %c0_i32 = arith.constant 0 : i32
    %c0_i32_0 = arith.constant 0 : i32
    %c0_i32_1 = arith.constant 0 : i32
    return %c0_i32, %c0_i32_0 : i32, i32
  }
  func.func @transform_5(%arg0: i32) -> (i32, i32, i32) {
    %c0_i32 = arith.constant 0 : i32
    %c0_i32_0 = arith.constant 0 : i32
    %c0_i32_1 = arith.constant 0 : i32
    %c0_i32_2 = arith.constant 0 : i32
    return %c0_i32, %c0_i32_0, %c0_i32_1 : i32, i32, i32
  }
  func.func @transform_6(%arg0: i32) -> (i32, i32) {
    %c0_i32 = arith.constant 0 : i32
    %c0_i32_0 = arith.constant 0 : i32
    %c0_i32_1 = arith.constant 0 : i32
    return %c0_i32, %c0_i32_0 : i32, i32
  }
  func.func @transform_7(%arg0: i32) -> (i32, i32, i32) {
    %c0_i32 = arith.constant 0 : i32
    %c0_i32_0 = arith.constant 0 : i32
    %c0_i32_1 = arith.constant 0 : i32
    return %arg0, %c0_i32, %c0_i32_0 : i32, i32, i32
  }
}

</mosaic_0001>

<bundles_post_ra>
// kernel: forward.1
= control target key start
LH: loop header
LB: loop body
LE: loop exit
PB: predicated region body
PF: predicated region fallthrough
CT: control target
= control target key end

     0   :  { %12 = vsyncpa [#allocation3], 0  ;;  %s8254_s0 = inlined_call_operand.vmem [shape: bf16[2,4,8,256], index: 0, kind: input, shape index: {}]   ;;  %s8255_s1 = inlined_call_operand.hbm [shape: bf16[8,256,224], index: 1, kind: input, shape index: {}]   ;;  %s8256_s2 = inlined_call_operand.vmem [shape: f32[1,224], index: 2, kind: input, shape index: {}]   ;;  %s8257_s3 = inlined_call_operand.vmem [shape: bf16[3,224,320], index: 3, kind: input, shape index: {}]   ;;  %s8258_s4 = inlined_call_operand.vmem [shape: f32[1,320], index: 4, kind: input, shape index: {}]   ;;  %s8259_s5 = inlined_call_operand.hbm [shape: bf16[5,320,64], index: 5, kind: input, shape index: {}]   ;;  %s8260_s6 = inlined_call_operand.vmem [shape: f32[1,64], index: 6, kind: input, shape index: {}]   ;;  %s8261_s7 = inlined_call_operand.vmem [shape: f32[2,8,64], index: 7, kind: output, shape index: {}]  }
   0x1   :  { %s20_s26 = sshll.u32 %s8255_s1, 4  ;;  %s21_s26 = int_to_ptr.hbm [resolvable:$true] %s20_s26 }
   0x2   :  { %13 = vsyncpa [#allocation5], 0  ;;  %s7027_s27 = smov [#allocation2]   ;;  %s39_s8 = sshll.u32 %s8259_s5, 4  ;;  %s40_s8 = int_to_ptr.hbm [resolvable:$true] %s39_s8 }
   0x3   :  { %s22_s28 = sshll.u32 %s7027_s27, 4  ;;  %s7028_s9 = smov 128   ;;  %s23_s28 = int_to_ptr.vmem [resolvable:$true] %s22_s28 }
   0x4   :  { %s7029_s10 = smov 8   ;;  %s7030_s11 = smov [#allocation4]  }
   0x5   :  { %28 = dma.hbm_to_vmem [thread:$0]  %s21_s26, 32768, %s23_s28, [#allocation3], %s7028_s9, %s7028_s9, %s7029_s10  }
   0x6   :  { %s41_s12 = sshll.u32 %s7030_s11, 4  ;;  %s7031_s13 = smov 64   ;;  %s42_s12 = int_to_ptr.vmem [resolvable:$true] %s41_s12 }
   0x7   :  { %s7032_s14 = smov 4  }
   0x8   :  { %47 = dma.hbm_to_vmem [thread:$0]  %s40_s8, 12800, %s42_s12, [#allocation5], %s7031_s13, %s7031_s13, %s7032_s14  }
   0x9   :  { %7023 = dma.done.wait [#allocation3], 32768  }
   0xa   :  { %7024 = vsyncadd [#allocation3], 4294934528 }
   0xb   :  { %7025 = dma.done.wait [#allocation5], 12800  }
   0xc   :  { %7026 = vsyncadd [#allocation5], 4294954496  ;;  %v4452_v0 = vld [vmem:[#allocation2 + $0x170] sm:$0xf]  ;;  %v6527_v1 = vld [vmem:[#allocation2 + $0x174] sm:$0xf0] }
   0xd   :  { %v4516_v2 = vld [vmem:[#allocation2 + $0x1f0] sm:$0xf]  ;;  %v4453_v3 = vor.u32 %v6527_v1, %v4452_v0  ;;  %v6543_v4 = vld [vmem:[#allocation2 + $0x1f4] sm:$0xf0]  ;;  %v6526_v5 = vld [vmem:[#allocation2 + $0x174] sm:$0xf] }
   0xe   :  { %v4454_v6 = vld [vmem:[#allocation2 + $0x178] sm:$0xf0]  ;;  %v4517_v7 = vor.u32 %v6543_v4, %v4516_v2  ;;  %v6542_v9 = vld [vmem:[#allocation2 + $0x1f4] sm:$0xf]  ;;  %v4444_v11 = vld [vmem:[#allocation2 + $0x160] sm:$0xf] }
   0xf   :  { %v4457_v8 = vor.u32 %v6526_v5, %v4454_v6  ;;  %v4518_v10 = vld [vmem:[#allocation2 + $0x1f8] sm:$0xf0]  ;;  %296 = vmatpush.bf16.msra.mxu0 %v4453_v3  ;;  %v6525_v13 = vld [vmem:[#allocation2 + $0x164] sm:$0xf0]  ;;  %v4508_v14 = vld [vmem:[#allocation2 + $0x1e0] sm:$0xf] }
  0x10   :  { %v4521_v12 = vor.u32 %v6542_v9, %v4518_v10  ;;  %v6541_v15 = vld [vmem:[#allocation2 + $0x1e4] sm:$0xf0]  ;;  %310 = vmatpush.bf16.msra.mxu1 %v4517_v7  ;;  %v4445_v16 = vor.u32 %v6525_v13, %v4444_v11  ;;  %v6524_v18 = vld [vmem:[#allocation2 + $0x164] sm:$0xf]  ;;  %v4446_v19 = vld [vmem:[#allocation2 + $0x168] sm:$0xf0] }
  0x11   :  { %324 = vmatpush.bf16.msra.mxu2 %v4457_v8  ;;  %v4509_v17 = vor.u32 %v6541_v15, %v4508_v14  ;;  %v6540_v20 = vld [vmem:[#allocation2 + $0x1e4] sm:$0xf]  ;;  %v4449_v21 = vor.u32 %v6524_v18, %v4446_v19  ;;  %v4510_v22 = vld [vmem:[#allocation2 + $0x1e8] sm:$0xf0]  ;;  %v4436_v23 = vld [vmem:[#allocation2 + $0x150] sm:$0xf] }
  0x12   :  { %338 = vmatpush.bf16.msra.mxu3 %v4521_v12  ;;  %v6523_v24 = vld [vmem:[#allocation2 + $0x154] sm:$0xf0]  ;;  %v4513_v25 = vor.u32 %v6540_v20, %v4510_v22  ;;  %v4500_v26 = vld [vmem:[#allocation2 + $0x1d0] sm:$0xf]  ;;  %v6522_v28 = vld [vmem:[#allocation2 + $0x154] sm:$0xf] }
  0x13   :  { %v6539_v27 = vld [vmem:[#allocation2 + $0x1d4] sm:$0xf0]  ;;  %297 = vmatpush.bf16.msra.mxu0 %v4445_v16  ;;  %v4437_v29 = vor.u32 %v6523_v24, %v4436_v23  ;;  %v4438_v30 = vld [vmem:[#allocation2 + $0x158] sm:$0xf0]  ;;  %v6538_v31 = vld [vmem:[#allocation2 + $0x1d4] sm:$0xf] }
  0x14   :  { %v4502_v32 = vld [vmem:[#allocation2 + $0x1d8] sm:$0xf0]  ;;  %311 = vmatpush.bf16.msra.mxu1 %v4509_v17  ;;  %v4501_v33 = vor.u32 %v6539_v27, %v4500_v26  ;;  %v4441_v34 = vor.u32 %v6522_v28, %v4438_v30  ;;  %v4428_v35 = vld [vmem:[#allocation2 + $0x140] sm:$0xf]  ;;  %v6521_v36 = vld [vmem:[#allocation2 + $0x144] sm:$0xf0] }
  0x15   :  { %325 = vmatpush.bf16.msra.mxu2 %v4449_v21  ;;  %v4492_v37 = vld [vmem:[#allocation2 + $0x1c0] sm:$0xf]  ;;  %v4505_v38 = vor.u32 %v6538_v31, %v4502_v32  ;;  %v6537_v39 = vld [vmem:[#allocation2 + $0x1c4] sm:$0xf0]  ;;  %v6520_v40 = vld [vmem:[#allocation2 + $0x144] sm:$0xf]  ;;  %v4429_v44 = vor.u32 %v6521_v36, %v4428_v35 }
  0x16   :  { %339 = vmatpush.bf16.msra.mxu3 %v4513_v25  ;;  %v4430_v41 = vld [vmem:[#allocation2 + $0x148] sm:$0xf0]  ;;  %v6536_v42 = vld [vmem:[#allocation2 + $0x1c4] sm:$0xf]  ;;  %v4493_v45 = vor.u32 %v6537_v39, %v4492_v37  ;;  %v4420_v47 = vld [vmem:[#allocation2 + $0x130] sm:$0xf] }
  0x17   :  { %v4494_v43 = vld [vmem:[#allocation2 + $0x1c8] sm:$0xf0]  ;;  %298 = vmatpush.bf16.msra.mxu0 %v4437_v29  ;;  %v4433_v46 = vor.u32 %v6520_v40, %v4430_v41  ;;  %v6519_v48 = vld [vmem:[#allocation2 + $0x134] sm:$0xf0]  ;;  %v4484_v49 = vld [vmem:[#allocation2 + $0x1b0] sm:$0xf] }
  0x18   :  { %312 = vmatpush.bf16.msra.mxu1 %v4501_v33  ;;  %v4497_v50 = vor.u32 %v6536_v42, %v4494_v43  ;;  %v6535_v51 = vld [vmem:[#allocation2 + $0x1b4] sm:$0xf0]  ;;  %v6518_v52 = vld [vmem:[#allocation2 + $0x134] sm:$0xf]  ;;  %v4422_v53 = vld [vmem:[#allocation2 + $0x138] sm:$0xf0]  ;;  %v4421_v56 = vor.u32 %v6519_v48, %v4420_v47 }
  0x19   :  { %326 = vmatpush.bf16.msra.mxu2 %v4441_v34  ;;  %v6534_v54 = vld [vmem:[#allocation2 + $0x1b4] sm:$0xf]  ;;  %v4486_v55 = vld [vmem:[#allocation2 + $0x1b8] sm:$0xf0]  ;;  %v4485_v57 = vor.u32 %v6535_v51, %v4484_v49  ;;  %v4425_v58 = vor.u32 %v6518_v52, %v4422_v53  ;;  %v4412_v59 = vld [vmem:[#allocation2 + $0x120] sm:$0xf] }
  0x1a   :  { %340 = vmatpush.bf16.msra.mxu3 %v4505_v38  ;;  %v6517_v60 = vld [vmem:[#allocation2 + $0x124] sm:$0xf0]  ;;  %v4476_v61 = vld [vmem:[#allocation2 + $0x1a0] sm:$0xf]  ;;  %v4489_v62 = vor.u32 %v6534_v54, %v4486_v55  ;;  %v6516_v0 = vld [vmem:[#allocation2 + $0x124] sm:$0xf] }
  0x1b   :  { %299 = vmatpush.bf16.msra.mxu0 %v4429_v44  ;;  %v6533_v63 = vld [vmem:[#allocation2 + $0x1a4] sm:$0xf0]  ;;  %v4414_v1 = vld [vmem:[#allocation2 + $0x128] sm:$0xf0]  ;;  %v6532_v2 = vld [vmem:[#allocation2 + $0x1a4] sm:$0xf]  ;;  %v4413_v4 = vor.u32 %v6517_v60, %v4412_v59 }
  0x1c   :  { %313 = vmatpush.bf16.msra.mxu1 %v4493_v45  ;;  %v4478_v3 = vld [vmem:[#allocation2 + $0x1a8] sm:$0xf0]  ;;  %v4477_v5 = vor.u32 %v6533_v63, %v4476_v61  ;;  %v4417_v6 = vor.u32 %v6516_v0, %v4414_v1  ;;  %v4404_v7 = vld [vmem:[#allocation2 + $0x110] sm:$0xf]  ;;  %v6515_v8 = vld [vmem:[#allocation2 + $0x114] sm:$0xf0] }
  0x1d   :  { %327 = vmatpush.bf16.msra.mxu2 %v4433_v46  ;;  %v4468_v9 = vld [vmem:[#allocation2 + $0x190] sm:$0xf]  ;;  %v4481_v10 = vor.u32 %v6532_v2, %v4478_v3  ;;  %v6531_v11 = vld [vmem:[#allocation2 + $0x194] sm:$0xf0]  ;;  %v6514_v12 = vld [vmem:[#allocation2 + $0x114] sm:$0xf]  ;;  %v4405_v16 = vor.u32 %v6515_v8, %v4404_v7 }
  0x1e   :  { %341 = vmatpush.bf16.msra.mxu3 %v4497_v50  ;;  %v4406_v13 = vld [vmem:[#allocation2 + $0x118] sm:$0xf0]  ;;  %v6530_v14 = vld [vmem:[#allocation2 + $0x194] sm:$0xf]  ;;  %v4396_v17 = vld [vmem:[#allocation2 + $0x100] sm:$0xf]  ;;  %v4469_v19 = vor.u32 %v6531_v11, %v4468_v9 }
  0x1f   :  { %300 = vmatpush.bf16.msra.mxu0 %v4421_v56  ;;  %v4470_v15 = vld [vmem:[#allocation2 + $0x198] sm:$0xf0]  ;;  %v6513_v18 = vld [vmem:[#allocation2 + $0x104] sm:$0xf0]  ;;  %v4409_v20 = vor.u32 %v6514_v12, %v4406_v13  ;;  %v4460_v21 = vld [vmem:[#allocation2 + $0x180] sm:$0xf] }
  0x20   :  { %314 = vmatpush.bf16.msra.mxu1 %v4485_v57  ;;  %v6529_v22 = vld [vmem:[#allocation2 + $0x184] sm:$0xf0]  ;;  %v6512_v23 = vld [vmem:[#allocation2 + $0x104] sm:$0xf]  ;;  %v4473_v24 = vor.u32 %v6530_v14, %v4470_v15  ;;  %v4398_v25 = vld [vmem:[#allocation2 + $0x108] sm:$0xf0]  ;;  %v4397_v31 = vor.u32 %v6513_v18, %v4396_v17 }
  0x21   :  { %328 = vmatpush.bf16.msra.mxu2 %v4425_v58  ;;  %v6528_v26 = vld [vmem:[#allocation2 + $0x184] sm:$0xf]  ;;  %v4462_v27 = vld [vmem:[#allocation2 + $0x188] sm:$0xf0]  ;;  %v4580_v28 = vld [vmem:[#allocation2 + $0x70] sm:$0xf]  ;;  %v4461_v35 = vor.u32 %v6529_v22, %v4460_v21  ;;  %v4401_v36 = vor.u32 %v6512_v23, %v4398_v25 }
  0x22   :  { %342 = vmatpush.bf16.msra.mxu3 %v4489_v62  ;;  %v6495_v29 = vld [vmem:[#allocation2 + $0x74] sm:$0xf0]  ;;  %v4644_v30 = vld [vmem:[#allocation2 + $0xf0] sm:$0xf]  ;;  %v6494_v33 = vld [vmem:[#allocation2 + $0x74] sm:$0xf]  ;;  %v4465_v39 = vor.u32 %v6528_v26, %v4462_v27 }
  0x23   :  { %301 = vmatpush.bf16.msra.mxu0 %v4413_v4  ;;  %v6511_v32 = vld [vmem:[#allocation2 + $0xf4] sm:$0xf0]  ;;  %v4582_v34 = vld [vmem:[#allocation2 + $0x78] sm:$0xf0]  ;;  %v6510_v37 = vld [vmem:[#allocation2 + $0xf4] sm:$0xf]  ;;  %v4581_v40 = vor.u32 %v6495_v29, %v4580_v28 }
  0x24   :  { %315 = vmatpush.bf16.msra.mxu1 %v4477_v5  ;;  %v4646_v38 = vld [vmem:[#allocation2 + $0xf8] sm:$0xf0]  ;;  %v4572_v41 = vld [vmem:[#allocation2 + $0x60] sm:$0xf]  ;;  %v4645_v42 = vor.u32 %v6511_v32, %v4644_v30  ;;  %v4585_v43 = vor.u32 %v6494_v33, %v4582_v34  ;;  %v6493_v44 = vld [vmem:[#allocation2 + $0x64] sm:$0xf0] }
  0x25   :  { %329 = vmatpush.bf16.msra.mxu2 %v4417_v6  ;;  %v4636_v45 = vld [vmem:[#allocation2 + $0xe0] sm:$0xf]  ;;  %v6509_v46 = vld [vmem:[#allocation2 + $0xe4] sm:$0xf0]  ;;  %v4649_v47 = vor.u32 %v6510_v37, %v4646_v38  ;;  %v6492_v48 = vld [vmem:[#allocation2 + $0x64] sm:$0xf]  ;;  %v4573_v54 = vor.u32 %v6493_v44, %v4572_v41 }
  0x26   :  { %343 = vmatpush.bf16.msra.mxu3 %v4481_v10  ;;  %v4574_v49 = vld [vmem:[#allocation2 + $0x68] sm:$0xf0]  ;;  %v6508_v50 = vld [vmem:[#allocation2 + $0xe4] sm:$0xf]  ;;  %v4388_v52 = vld [vmem:[%s8254_s0] sm:$0xf]  ;;  %v4637_v58 = vor.u32 %v6509_v46, %v4636_v45 }
  0x27   :  { %302 = vmatpush.bf16.msra.mxu0 %v4405_v16  ;;  %v4638_v51 = vld [vmem:[#allocation2 + $0xe8] sm:$0xf0]  ;;  %v6479_v53 = vld [vmem:[%s8254_s0 + $0x1c] sm:$0xf0]  ;;  %v4564_v55 = vld [vmem:[#allocation2 + $0x50] sm:$0xf]  ;;  %v4577_v59 = vor.u32 %v6492_v48, %v4574_v49 }
  0x28   :  { %316 = vmatpush.bf16.msra.mxu1 %v4469_v19  ;;  %v6491_v56 = vld [vmem:[#allocation2 + $0x54] sm:$0xf0]  ;;  %v7085_v57 = vor.u32 %v6479_v53, %v4388_v52  ;;  %v4628_v60 = vld [vmem:[#allocation2 + $0xd0] sm:$0xf]  ;;  %v6490_v62 = vld [vmem:[#allocation2 + $0x54] sm:$0xf]  ;;  %v4641_v63 = vor.u32 %v6508_v50, %v4638_v51 }
  0x29   :  { %330 = vmatpush.bf16.msra.mxu2 %v4409_v20  ;;  %v6507_v61 = vld [vmem:[#allocation2 + $0xd4] sm:$0xf0]  ;;  %v4566_v0 = vld [vmem:[#allocation2 + $0x58] sm:$0xf0]  ;;  %v6478_v1 = vld [vmem:[%s8254_s0 + $0x4] sm:$0xf]  ;;  %v4565_v6 = vor.u32 %v6491_v56, %v4564_v55 }
  0x2a   :  { %344 = vmatpush.bf16.msra.mxu3 %v4473_v24  ;;  %v4390_v2 = vld [vmem:[%s8254_s0 + $0x20] sm:$0xf0]  ;;  %v6506_v3 = vld [vmem:[#allocation2 + $0xd4] sm:$0xf]  ;;  %v4630_v4 = vld [vmem:[#allocation2 + $0xd8] sm:$0xf0]  ;;  %v4629_v7 = vor.u32 %v6507_v61, %v4628_v60  ;;  %v4569_v8 = vor.u32 %v6490_v62, %v4566_v0 }
  0x2b   :  { %303 = vmatpush.bf16.msra.mxu0 %v4397_v31  ;;  %v7094_v5 = vor.u32 %v6478_v1, %v4390_v2  ;;  %v4556_v9 = vld [vmem:[#allocation2 + $0x40] sm:$0xf]  ;;  %v6489_v10 = vld [vmem:[#allocation2 + $0x44] sm:$0xf0]  ;;  %v4633_v12 = vor.u32 %v6506_v3, %v4630_v4  ;;  %v6488_v14 = vld [vmem:[#allocation2 + $0x44] sm:$0xf] }
  0x2c   :  { %317 = vmatpush.bf16.msra.mxu1 %v4461_v35  ;;  %v4620_v11 = vld [vmem:[#allocation2 + $0xc0] sm:$0xf]  ;;  %v6505_v13 = vld [vmem:[#allocation2 + $0xc4] sm:$0xf0]  ;;  %v4558_v15 = vld [vmem:[#allocation2 + $0x48] sm:$0xf0]  ;;  %v4557_v18 = vor.u32 %v6489_v10, %v4556_v9 }
  0x2d   :  { %331 = vmatpush.bf16.msra.mxu2 %v4401_v36  ;;  %v6504_v16 = vld [vmem:[#allocation2 + $0xc4] sm:$0xf]  ;;  %v4622_v17 = vld [vmem:[#allocation2 + $0xc8] sm:$0xf0]  ;;  %v4621_v19 = vor.u32 %v6505_v13, %v4620_v11  ;;  %v4561_v20 = vor.u32 %v6488_v14, %v4558_v15  ;;  %v4548_v21 = vld [vmem:[#allocation2 + $0x30] sm:$0xf] }
  0x2e   :  { %345 = vmatpush.bf16.msra.mxu3 %v4465_v39  ;;  %304 = vmatmul.bf16.vlgmr.msra.gmra.mxu0 %v7085_v57  ;;  %v6487_v22 = vld [vmem:[#allocation2 + $0x34] sm:$0xf0]  ;;  %v4612_v23 = vld [vmem:[#allocation2 + $0xb0] sm:$0xf]  ;;  %v4625_v24 = vor.u32 %v6504_v16, %v4622_v17  ;;  %v6486_v26 = vld [vmem:[#allocation2 + $0x34] sm:$0xf] }
  0x2f   :  { %523 = vmatpush.bf16.msrb.mxu0 %v4581_v40  ;;  %318 = vmatmul.bf16.vlgmr.msra.gmra.mxu1 %v7094_v5  ;;  %v6503_v25 = vld [vmem:[#allocation2 + $0xb4] sm:$0xf0]  ;;  %v4550_v27 = vld [vmem:[#allocation2 + $0x38] sm:$0xf0]  ;;  %v6502_v28 = vld [vmem:[#allocation2 + $0xb4] sm:$0xf]  ;;  %v4549_v30 = vor.u32 %v6487_v22, %v4548_v21 }
  0x30   :  { %537 = vmatpush.bf16.msrb.mxu1 %v4645_v42  ;;  %332 = vmatmul.bf16.vlgmr.msra.gmra.mxu2 %v7085_v57  ;;  %v4614_v29 = vld [vmem:[#allocation2 + $0xb8] sm:$0xf0]  ;;  %v4613_v31 = vor.u32 %v6503_v25, %v4612_v23  ;;  %v4553_v32 = vor.u32 %v6486_v26, %v4550_v27  ;;  %v4540_v33 = vld [vmem:[#allocation2 + $0x20] sm:$0xf]  ;;  %v6485_v34 = vld [vmem:[#allocation2 + $0x24] sm:$0xf0] }
  0x31   :  { %551 = vmatpush.bf16.msrb.mxu2 %v4585_v43  ;;  %346 = vmatmul.bf16.vlgmr.msra.gmra.mxu3 %v7094_v5  ;;  %v4604_v35 = vld [vmem:[#allocation2 + $0xa0] sm:$0xf]  ;;  %v4617_v36 = vor.u32 %v6502_v28, %v4614_v29  ;;  %v6501_v37 = vld [vmem:[#allocation2 + $0xa4] sm:$0xf0]  ;;  %v6484_v38 = vld [vmem:[#allocation2 + $0x24] sm:$0xf]  ;;  %v4541_v42 = vor.u32 %v6485_v34, %v4540_v33 }
  0x32   :  { %565 = vmatpush.bf16.msrb.mxu3 %v4649_v47  ;;  %v4542_v39 = vld [vmem:[#allocation2 + $0x28] sm:$0xf0]  ;;  %v6500_v40 = vld [vmem:[#allocation2 + $0xa4] sm:$0xf]  ;;  %v4605_v43 = vor.u32 %v6501_v37, %v4604_v35  ;;  %v4532_v45 = vld [vmem:[#allocation2 + $0x10] sm:$0xf] }
  0x33   :  { %524 = vmatpush.bf16.msrb.mxu0 %v4573_v54  ;;  %v4606_v41 = vld [vmem:[#allocation2 + $0xa8] sm:$0xf0]  ;;  %v4545_v44 = vor.u32 %v6484_v38, %v4542_v39  ;;  %v6483_v46 = vld [vmem:[#allocation2 + $0x14] sm:$0xf0]  ;;  %v4596_v47 = vld [vmem:[#allocation2 + $0x90] sm:$0xf] }
  0x34   :  { %538 = vmatpush.bf16.msrb.mxu1 %v4637_v58  ;;  %v4609_v48 = vor.u32 %v6500_v40, %v4606_v41  ;;  %v6499_v49 = vld [vmem:[#allocation2 + $0x94] sm:$0xf0]  ;;  %v6482_v50 = vld [vmem:[#allocation2 + $0x14] sm:$0xf]  ;;  %v4534_v51 = vld [vmem:[#allocation2 + $0x18] sm:$0xf0]  ;;  %v4533_v54 = vor.u32 %v6483_v46, %v4532_v45 }
  0x35   :  { %552 = vmatpush.bf16.msrb.mxu2 %v4577_v59  ;;  %v6498_v52 = vld [vmem:[#allocation2 + $0x94] sm:$0xf]  ;;  %v4598_v53 = vld [vmem:[#allocation2 + $0x98] sm:$0xf0]  ;;  %v4524_v55 = vld [vmem:[#allocation2] sm:$0xf]  ;;  %v4597_v58 = vor.u32 %v6499_v49, %v4596_v47  ;;  %v4537_v59 = vor.u32 %v6482_v50, %v4534_v51 }
  0x36   :  { %566 = vmatpush.bf16.msrb.mxu3 %v4641_v63  ;;  %v6481_v56 = vld [vmem:[#allocation2 + $0x4] sm:$0xf0]  ;;  %v4588_v60 = vld [vmem:[#allocation2 + $0x80] sm:$0xf]  ;;  %v6480_v62 = vld [vmem:[#allocation2 + $0x4] sm:$0xf]  ;;  %v4601_v63 = vor.u32 %v6498_v52, %v4598_v53 }
  0x37   :  { %525 = vmatpush.bf16.msrb.mxu0 %v4565_v6  ;;  %v6497_v61 = vld [vmem:[#allocation2 + $0x84] sm:$0xf0]  ;;  %v4526_v0 = vld [vmem:[#allocation2 + $0x8] sm:$0xf0]  ;;  %v6496_v1 = vld [vmem:[#allocation2 + $0x84] sm:$0xf] }
  0x38   :  { %539 = vmatpush.bf16.msrb.mxu1 %v4629_v7  ;;  %v4590_v2 = vld [vmem:[#allocation2 + $0x88] sm:$0xf0]  ;;  %v4718_v3 = vld [vmem:[#allocation2 + $0x270] sm:$0xf]  ;;  %v6561_v4 = vld [vmem:[#allocation2 + $0x274] sm:$0xf0]  ;;  %v4525_v7 = vor.u32 %v6481_v56, %v4524_v55  ;;  %v4589_v11 = vor.u32 %v6497_v61, %v4588_v60 }
  0x39   :  { %553 = vmatpush.bf16.msrb.mxu2 %v4569_v8  ;;  %v4782_v6 = vld [vmem:[#allocation2 + $0x2f0] sm:$0xf]  ;;  %v6577_v8 = vld [vmem:[#allocation2 + $0x2f4] sm:$0xf0]  ;;  %v6560_v9 = vld [vmem:[#allocation2 + $0x274] sm:$0xf]  ;;  %v4593_v15 = vor.u32 %v6496_v1, %v4590_v2  ;;  %v4719_v16 = vor.u32 %v6561_v4, %v4718_v3 }
  0x3a   :  { %567 = vmatpush.bf16.msrb.mxu3 %v4633_v12  ;;  %v4720_v10 = vld [vmem:[#allocation2 + $0x278] sm:$0xf0]  ;;  %v4529_v12 = vor.u32 %v6480_v62, %v4526_v0  ;;  %v6576_v13 = vld [vmem:[#allocation2 + $0x2f4] sm:$0xf]  ;;  %v4783_v17 = vor.u32 %v6577_v8, %v4782_v6  ;;  %v4774_v21 = vld [vmem:[#allocation2 + $0x2e0] sm:$0xf] }
  0x3b   :  { %526 = vmatpush.bf16.msrb.mxu0 %v4557_v18  ;;  %v4784_v14 = vld [vmem:[#allocation2 + $0x2f8] sm:$0xf0]  ;;  %v4723_v18 = vor.u32 %v6560_v9, %v4720_v10  ;;  %v6575_v23 = vld [vmem:[#allocation2 + $0x2e4] sm:$0xf0]  ;;  %v4712_v25 = vld [vmem:[#allocation2 + $0x268] sm:$0xf0] }
  0x3c   :  { %540 = vmatpush.bf16.msrb.mxu1 %v4621_v19  ;;  %v4710_v19 = vld [vmem:[#allocation2 + $0x260] sm:$0xf]  ;;  %v4787_v22 = vor.u32 %v6576_v13, %v4784_v14  ;;  %v6574_v26 = vld [vmem:[#allocation2 + $0x2e4] sm:$0xf]  ;;  %v4776_v27 = vld [vmem:[#allocation2 + $0x2e8] sm:$0xf0]  ;;  %v4775_v29 = vor.u32 %v6575_v23, %v4774_v21 }
  0x3d   :  { %554 = vmatpush.bf16.msrb.mxu2 %v4561_v20  ;;  %v6559_v20 = vld [vmem:[#allocation2 + $0x264] sm:$0xf0]  ;;  %v4766_v33 = vld [vmem:[#allocation2 + $0x2d0] sm:$0xf]  ;;  %v4779_v34 = vor.u32 %v6574_v26, %v4776_v27  ;;  %v6573_v35 = vld [vmem:[#allocation2 + $0x2d4] sm:$0xf0] }
  0x3e   :  { %568 = vmatpush.bf16.msrb.mxu3 %v4625_v24  ;;  %v6558_v24 = vld [vmem:[#allocation2 + $0x264] sm:$0xf]  ;;  %v4711_v28 = vor.u32 %v6559_v20, %v4710_v19  ;;  %v4704_v37 = vld [vmem:[#allocation2 + $0x258] sm:$0xf0]  ;;  %v6572_v38 = vld [vmem:[#allocation2 + $0x2d4] sm:$0xf]  ;;  %v4767_v41 = vor.u32 %v6573_v35, %v4766_v33 }
  0x3f   :  { %527 = vmatpush.bf16.msrb.mxu0 %v4549_v30  ;;  %v4715_v30 = vor.u32 %v6558_v24, %v4712_v25  ;;  %v4768_v39 = vld [vmem:[#allocation2 + $0x2d8] sm:$0xf0]  ;;  %v4758_v45 = vld [vmem:[#allocation2 + $0x2c0] sm:$0xf]  ;;  %v6571_v47 = vld [vmem:[#allocation2 + $0x2c4] sm:$0xf0] }
  0x40   :  { %541 = vmatpush.bf16.msrb.mxu1 %v4613_v31  ;;  %v4702_v31 = vld [vmem:[#allocation2 + $0x250] sm:$0xf]  ;;  %v4771_v46 = vor.u32 %v6572_v38, %v4768_v39  ;;  %v4696_v49 = vld [vmem:[#allocation2 + $0x248] sm:$0xf0]  ;;  %v6570_v50 = vld [vmem:[#allocation2 + $0x2c4] sm:$0xf]  ;;  %v4759_v52 = vor.u32 %v6571_v47, %v4758_v45 }
  0x41   :  { %555 = vmatpush.bf16.msrb.mxu2 %v4553_v32  ;;  %v6557_v32 = vld [vmem:[#allocation2 + $0x254] sm:$0xf0]  ;;  %v4760_v51 = vld [vmem:[#allocation2 + $0x2c8] sm:$0xf0]  ;;  %v4686_v53 = vld [vmem:[#allocation2 + $0x230] sm:$0xf] }
  0x42   :  { %569 = vmatpush.bf16.msrb.mxu3 %v4617_v36  ;;  %v6556_v36 = vld [vmem:[#allocation2 + $0x254] sm:$0xf]  ;;  %v4703_v40 = vor.u32 %v6557_v32, %v4702_v31  ;;  %v4750_v55 = vld [vmem:[#allocation2 + $0x2b0] sm:$0xf]  ;;  %v4763_v56 = vor.u32 %v6570_v50, %v4760_v51  ;;  %v4688_v60 = vld [vmem:[#allocation2 + $0x238] sm:$0xf0] }
  0x43   :  { %528 = vmatpush.bf16.msrb.mxu0 %v4541_v42  ;;  %v4707_v42 = vor.u32 %v6556_v36, %v4704_v37  ;;  %v6568_v61 = vld [vmem:[#allocation2 + $0x2b4] sm:$0xf]  ;;  %v4752_v62 = vld [vmem:[#allocation2 + $0x2b8] sm:$0xf0]  ;;  %v4678_v2 = vld [vmem:[#allocation2 + $0x220] sm:$0xf] }
  0x44   :  { %542 = vmatpush.bf16.msrb.mxu1 %v4605_v43  ;;  %v4694_v43 = vld [vmem:[#allocation2 + $0x240] sm:$0xf]  ;;  %v6551_v3 = vld [vmem:[#allocation2 + $0x224] sm:$0xf0]  ;;  %v4755_v6 = vor.u32 %v6568_v61, %v4752_v62  ;;  %v6550_v8 = vld [vmem:[#allocation2 + $0x224] sm:$0xf] }
  0x45   :  { %556 = vmatpush.bf16.msrb.mxu2 %v4545_v44  ;;  %v6555_v44 = vld [vmem:[#allocation2 + $0x244] sm:$0xf0]  ;;  %v4742_v4 = vld [vmem:[#allocation2 + $0x2a0] sm:$0xf]  ;;  %v4680_v9 = vld [vmem:[#allocation2 + $0x228] sm:$0xf0] }
  0x46   :  { %570 = vmatpush.bf16.msrb.mxu3 %v4609_v48  ;;  %v6554_v48 = vld [vmem:[#allocation2 + $0x244] sm:$0xf]  ;;  %v4683_v14 = vor.u32 %v6550_v8, %v4680_v9  ;;  %v6565_v19 = vld [vmem:[#allocation2 + $0x294] sm:$0xf0]  ;;  %v6548_v20 = vld [vmem:[#allocation2 + $0x214] sm:$0xf] }
  0x47   :  { %529 = vmatpush.bf16.msrb.mxu0 %v4533_v54  ;;  %v6553_v54 = vld [vmem:[#allocation2 + $0x234] sm:$0xf0]  ;;  %v6566_v10 = vld [vmem:[#allocation2 + $0x2a4] sm:$0xf]  ;;  %v4672_v21 = vld [vmem:[#allocation2 + $0x218] sm:$0xf0] }
  0x48   :  { %543 = vmatpush.bf16.msrb.mxu1 %v4597_v58  ;;  %v6569_v58 = vld [vmem:[#allocation2 + $0x2b4] sm:$0xf0]  ;;  %v4736_v23 = vld [vmem:[#allocation2 + $0x298] sm:$0xf0]  ;;  %v4662_v25 = vld [vmem:[#allocation2 + $0x200] sm:$0xf] }
  0x49   :  { %557 = vmatpush.bf16.msrb.mxu2 %v4537_v59  ;;  %v6552_v59 = vld [vmem:[#allocation2 + $0x234] sm:$0xf]  ;;  %v4751_v0 = vor.u32 %v6569_v58, %v4750_v55  ;;  %v6547_v26 = vld [vmem:[#allocation2 + $0x204] sm:$0xf0]  ;;  %v4726_v27 = vld [vmem:[#allocation2 + $0x280] sm:$0xf] }
  0x4a   :  { %571 = vmatpush.bf16.msrb.mxu3 %v4601_v63  ;;  %v4687_v63 = vor.u32 %v6553_v54, %v4686_v53  ;;  %v4691_v1 = vor.u32 %v6552_v59, %v4688_v60  ;;  %v6546_v31 = vld [vmem:[#allocation2 + $0x204] sm:$0xf]  ;;  %v4664_v32 = vld [vmem:[#allocation2 + $0x208] sm:$0xf0]  ;;  %v4846_v36 = vld [vmem:[#allocation2 + $0x370] sm:$0xf] }
  0x4b   :  { %530 = vmatpush.bf16.msrb.mxu0 %v4525_v7  ;;  %v6567_v7 = vld [vmem:[#allocation2 + $0x2a4] sm:$0xf0]  ;;  %v4728_v35 = vld [vmem:[#allocation2 + $0x288] sm:$0xf0]  ;;  %v6593_v37 = vld [vmem:[#allocation2 + $0x374] sm:$0xf0]  ;;  %v4667_v45 = vor.u32 %v6546_v31, %v4664_v32 }
  0x4c   :  { %544 = vmatpush.bf16.msrb.mxu1 %v4589_v11  ;;  %v4744_v11 = vld [vmem:[#allocation2 + $0x2a8] sm:$0xf0]  ;;  %v4743_v13 = vor.u32 %v6567_v7, %v4742_v4  ;;  %v4910_v38 = vld [vmem:[#allocation2 + $0x3f0] sm:$0xf]  ;;  %v6609_v39 = vld [vmem:[#allocation2 + $0x3f4] sm:$0xf0]  ;;  %v4847_v50 = vor.u32 %v6593_v37, %v4846_v36 }
  0x4d   :  { %558 = vmatpush.bf16.msrb.mxu2 %v4529_v12  ;;  %v4679_v12 = vor.u32 %v6551_v3, %v4678_v2  ;;  %v4654_v47 = vld [vmem:[%s8254_s0 + $0x8] sm:$0xf]  ;;  %v6544_v51 = vld [vmem:[%s8254_s0 + $0xc] sm:$0xf]  ;;  %v4838_v53 = vld [vmem:[#allocation2 + $0x360] sm:$0xf] }
  0x4e   :  { %572 = vmatpush.bf16.msrb.mxu3 %v4593_v15  ;;  %531 = vmatmul.bf16.vlgmr.msrb.gmra.mxu0 %v7085_v57  ;;  %v4670_v15 = vld [vmem:[#allocation2 + $0x210] sm:$0xf]  ;;  %v6591_v54 = vld [vmem:[#allocation2 + $0x364] sm:$0xf0]  ;;  %v4902_v55 = vld [vmem:[#allocation2 + $0x3e0] sm:$0xf] }
  0x4f   :  { %785 = vmatpush.bf16.msra.mxu0 %v4719_v16  ;;  %545 = vmatmul.bf16.vlgmr.msrb.gmra.mxu1 %v7094_v5  ;;  %v6549_v16 = vld [vmem:[#allocation2 + $0x214] sm:$0xf0]  ;;  %v6607_v59 = vld [vmem:[#allocation2 + $0x3e4] sm:$0xf0]  ;;  %v6590_v60 = vld [vmem:[#allocation2 + $0x364] sm:$0xf] }
  0x50   :  { %799 = vmatpush.bf16.msra.mxu1 %v4783_v17  ;;  %559 = vmatmul.bf16.vlgmr.msrb.gmra.mxu2 %v7085_v57  ;;  %v4695_v57 = vor.u32 %v6555_v44, %v4694_v43  ;;  %v4734_v17 = vld [vmem:[#allocation2 + $0x290] sm:$0xf]  ;;  %v4671_v24 = vor.u32 %v6549_v16, %v4670_v15  ;;  %v6608_v43 = vld [vmem:[#allocation2 + $0x3f4] sm:$0xf]  ;;  %v4840_v61 = vld [vmem:[#allocation2 + $0x368] sm:$0xf0]  ;;  %v4903_v2 = vor.u32 %v6607_v59, %v4902_v55 }
  0x51   :  { %813 = vmatpush.bf16.msra.mxu2 %v4723_v18  ;;  %573 = vmatmul.bf16.vlgmr.msrb.gmra.mxu3 %v7094_v5  ;;  %v4699_v5 = vor.u32 %v6554_v48, %v4696_v49  ;;  %v4747_v18 = vor.u32 %v6566_v10, %v4744_v11  ;;  %v6545_v48 = vld [vmem:[%s8254_s0 + $0x24] sm:$0xf0]  ;;  %v4843_v3 = vor.u32 %v6590_v60, %v4840_v61  ;;  %v4830_v4 = vld [vmem:[#allocation2 + $0x350] sm:$0xf]  ;;  %v6605_v9 = vld [vmem:[#allocation2 + $0x3d4] sm:$0xf0] }
  0x52   :  { %827 = vmatpush.bf16.msra.mxu3 %v4787_v22  ;;  %v6564_v22 = vld [vmem:[#allocation2 + $0x294] sm:$0xf]  ;;  %v7115_v58 = vor.u32 %v6545_v48, %v4654_v47  ;;  %v4894_v7 = vld [vmem:[#allocation2 + $0x3d0] sm:$0xf]  ;;  %v4832_v11 = vld [vmem:[#allocation2 + $0x358] sm:$0xf0] }
  0x53   :  { %786 = vmatpush.bf16.msra.mxu0 %v4711_v28  ;;  %v4735_v28 = vor.u32 %v6565_v19, %v4734_v17  ;;  %v4739_v33 = vor.u32 %v6564_v22, %v4736_v23  ;;  %v6588_v10 = vld [vmem:[#allocation2 + $0x354] sm:$0xf]  ;;  %v4895_v15 = vor.u32 %v6605_v9, %v4894_v7  ;;  %v4822_v17 = vld [vmem:[#allocation2 + $0x340] sm:$0xf]  ;;  %v6586_v22 = vld [vmem:[#allocation2 + $0x344] sm:$0xf] }
  0x54   :  { %800 = vmatpush.bf16.msra.mxu1 %v4775_v29  ;;  %v4675_v29 = vor.u32 %v6548_v20, %v4672_v21  ;;  %v4835_v16 = vor.u32 %v6588_v10, %v4832_v11  ;;  %v4886_v19 = vld [vmem:[#allocation2 + $0x3c0] sm:$0xf]  ;;  %v6603_v21 = vld [vmem:[#allocation2 + $0x3c4] sm:$0xf0]  ;;  %v4824_v23 = vld [vmem:[#allocation2 + $0x348] sm:$0xf0] }
  0x55   :  { %814 = vmatpush.bf16.msra.mxu2 %v4715_v30  ;;  %v6563_v30 = vld [vmem:[#allocation2 + $0x284] sm:$0xf0]  ;;  %v4878_v31 = vld [vmem:[#allocation2 + $0x3b0] sm:$0xf]  ;;  %v6600_v36 = vld [vmem:[#allocation2 + $0x3b4] sm:$0xf] }
  0x56   :  { %828 = vmatpush.bf16.msra.mxu3 %v4779_v34  ;;  %v6562_v34 = vld [vmem:[#allocation2 + $0x284] sm:$0xf]  ;;  %v4727_v44 = vor.u32 %v6563_v30, %v4726_v27  ;;  %v4887_v27 = vor.u32 %v6603_v21, %v4886_v19  ;;  %v6585_v30 = vld [vmem:[#allocation2 + $0x334] sm:$0xf0]  ;;  %v4880_v37 = vld [vmem:[#allocation2 + $0x3b8] sm:$0xf0] }
  0x57   :  { %787 = vmatpush.bf16.msra.mxu0 %v4703_v40  ;;  %v4663_v40 = vor.u32 %v6547_v26, %v4662_v25  ;;  %v4731_v49 = vor.u32 %v6562_v34, %v4728_v35  ;;  %v4888_v25 = vld [vmem:[#allocation2 + $0x3c8] sm:$0xf0]  ;;  %v6584_v34 = vld [vmem:[#allocation2 + $0x334] sm:$0xf]  ;;  %v4816_v35 = vld [vmem:[#allocation2 + $0x338] sm:$0xf0] }
  0x58   :  { %801 = vmatpush.bf16.msra.mxu1 %v4767_v41  ;;  %v6592_v41 = vld [vmem:[#allocation2 + $0x374] sm:$0xf]  ;;  %v4808_v47 = vld [vmem:[#allocation2 + $0x328] sm:$0xf0]  ;;  %v6598_v48 = vld [vmem:[#allocation2 + $0x3a4] sm:$0xf] }
  0x59   :  { %815 = vmatpush.bf16.msra.mxu2 %v4707_v42  ;;  %v4848_v42 = vld [vmem:[#allocation2 + $0x378] sm:$0xf0]  ;;  %v6597_v55 = vld [vmem:[#allocation2 + $0x394] sm:$0xf0]  ;;  %v6596_v60 = vld [vmem:[#allocation2 + $0x394] sm:$0xf] }
  0x5a   :  { %829 = vmatpush.bf16.msra.mxu3 %v4771_v46  ;;  %v4912_v46 = vld [vmem:[#allocation2 + $0x3f8] sm:$0xf0]  ;;  %v6578_v7 = vld [vmem:[#allocation2 + $0x304] sm:$0xf]  ;;  %v4792_v9 = vld [vmem:[#allocation2 + $0x308] sm:$0xf0] }
  0x5b   :  { %788 = vmatpush.bf16.msra.mxu0 %v4695_v57  ;;  %v4656_v57 = vld [vmem:[%s8254_s0 + $0x28] sm:$0xf0]  ;;  %v4800_v59 = vld [vmem:[#allocation2 + $0x318] sm:$0xf0]  ;;  %v6594_v10 = vld [vmem:[#allocation2 + $0x384] sm:$0xf] }
  0x5c   :  { %802 = vmatpush.bf16.msra.mxu1 %v4759_v52  ;;  %v4911_v52 = vor.u32 %v6609_v39, %v4910_v38  ;;  %v7117_v62 = vor.u32 %v6544_v51, %v4656_v57  ;;  %v4864_v61 = vld [vmem:[#allocation2 + $0x398] sm:$0xf0]  ;;  %v4856_v11 = vld [vmem:[#allocation2 + $0x388] sm:$0xf0]  ;;  %v6642_v21 = vld [vmem:[#allocation2 + $0x4f4] sm:$0xf] }
  0x5d   :  { %816 = vmatpush.bf16.msra.mxu2 %v4699_v5  ;;  %v4851_v5 = vor.u32 %v6592_v41, %v4848_v42  ;;  %v4806_v41 = vld [vmem:[#allocation2 + $0x320] sm:$0xf]  ;;  %v6583_v42 = vld [vmem:[#allocation2 + $0x324] sm:$0xf0]  ;;  %vm2513_vm1 = vcmask 785408   ;;  %vm3529_vm3 = vcmask 523264  }
  0x5e   :  { %830 = vmatpush.bf16.msra.mxu3 %v4763_v56  ;;  %v4915_v56 = vor.u32 %v6608_v43, %v4912_v46  ;;  %v4870_v43 = vld [vmem:[#allocation2 + $0x3a0] sm:$0xf]  ;;  %v6582_v46 = vld [vmem:[#allocation2 + $0x324] sm:$0xf] }
  0x5f   :  { %789 = vmatpush.bf16.msra.mxu0 %v4687_v63  ;;  %v6606_v63 = vld [vmem:[#allocation2 + $0x3e4] sm:$0xf]  ;;  %v4811_v57 = vor.u32 %v6582_v46, %v4808_v47  ;;  %v6638_v46 = vld [vmem:[#allocation2 + $0x4d4] sm:$0xf]  ;;  %v5034_v47 = vld [vmem:[#allocation2 + $0x4d8] sm:$0xf0] }
  0x60   :  { %803 = vmatpush.bf16.msra.mxu1 %v4751_v0  ;;  %v4904_v0 = vld [vmem:[#allocation2 + $0x3e8] sm:$0xf0] }
  0x61   :  { %817 = vmatpush.bf16.msra.mxu2 %v4691_v1  ;;  %v4839_v1 = vor.u32 %v6591_v54, %v4838_v53  ;;  %v4907_v8 = vor.u32 %v6606_v63, %v4904_v0  ;;  %v4862_v53 = vld [vmem:[#allocation2 + $0x390] sm:$0xf]  ;;  %v4790_v0 = vld [vmem:[#allocation2 + $0x300] sm:$0xf] }
  0x62   :  { %831 = vmatpush.bf16.msra.mxu3 %v4755_v6  ;;  %v6589_v6 = vld [vmem:[#allocation2 + $0x354] sm:$0xf0] }
  0x63   :  { %790 = vmatpush.bf16.msra.mxu0 %v4679_v12  ;;  %v6604_v12 = vld [vmem:[#allocation2 + $0x3d4] sm:$0xf] }
  0x64   :  { %804 = vmatpush.bf16.msra.mxu1 %v4743_v13  ;;  %v4896_v13 = vld [vmem:[#allocation2 + $0x3d8] sm:$0xf0] }
  0x65   :  { %818 = vmatpush.bf16.msra.mxu2 %v4683_v14  ;;  %v4831_v14 = vor.u32 %v6589_v6, %v4830_v4  ;;  %v4899_v20 = vor.u32 %v6604_v12, %v4896_v13  ;;  %v4854_v4 = vld [vmem:[#allocation2 + $0x380] sm:$0xf]  ;;  %v6595_v6 = vld [vmem:[#allocation2 + $0x384] sm:$0xf0]  ;;  %v4984_v12 = vld [vmem:[#allocation2 + $0x470] sm:$0xf] }
  0x66   :  { %832 = vmatpush.bf16.msra.mxu3 %v4747_v18  ;;  %v6587_v18 = vld [vmem:[#allocation2 + $0x344] sm:$0xf0]  ;;  %v6627_v13 = vld [vmem:[#allocation2 + $0x474] sm:$0xf0]  ;;  %v4855_v19 = vor.u32 %v6595_v6, %v4854_v4  ;;  %v4954_v4 = vld [vmem:[#allocation2 + $0x438] sm:$0xf0] }
  0x67   :  { %791 = vmatpush.bf16.msra.mxu0 %v4671_v24  ;;  %v6602_v24 = vld [vmem:[#allocation2 + $0x3c4] sm:$0xf]  ;;  %v4823_v26 = vor.u32 %v6587_v18, %v4822_v17  ;;  %v6626_v17 = vld [vmem:[#allocation2 + $0x474] sm:$0xf]  ;;  %v4986_v18 = vld [vmem:[#allocation2 + $0x478] sm:$0xf0] }
  0x68   :  { %805 = vmatpush.bf16.msra.mxu1 %v4735_v28  ;;  %v4827_v28 = vor.u32 %v6586_v22, %v4824_v23  ;;  %v4891_v32 = vor.u32 %v6602_v24, %v4888_v25  ;;  %v5050_v22 = vld [vmem:[#allocation2 + $0x4f8] sm:$0xf0]  ;;  %v4859_v23 = vor.u32 %v6594_v10, %v4856_v11  ;;  %v4985_v24 = vor.u32 %v6627_v13, %v4984_v12  ;;  %v6634_v6 = vld [vmem:[#allocation2 + $0x4b4] sm:$0xf]  ;;  %v4944_v11 = vld [vmem:[#allocation2 + $0x420] sm:$0xf] }
  0x69   :  { %819 = vmatpush.bf16.msra.mxu2 %v4675_v29  ;;  %v4814_v29 = vld [vmem:[#allocation2 + $0x330] sm:$0xf]  ;;  %v6617_v12 = vld [vmem:[#allocation2 + $0x424] sm:$0xf0]  ;;  %v5008_v13 = vld [vmem:[#allocation2 + $0x4a0] sm:$0xf] }
  0x6a   :  { %833 = vmatpush.bf16.msra.mxu3 %v4739_v33  ;;  %v6601_v33 = vld [vmem:[#allocation2 + $0x3b4] sm:$0xf0]  ;;  %v4815_v38 = vor.u32 %v6585_v30, %v4814_v29  ;;  %v5040_v29 = vld [vmem:[#allocation2 + $0x4e0] sm:$0xf]  ;;  %v5053_v30 = vor.u32 %v6642_v21, %v5050_v22 }
  0x6b   :  { %792 = vmatpush.bf16.msra.mxu0 %v4663_v40  ;;  %v4879_v39 = vor.u32 %v6601_v33, %v4878_v31  ;;  %v4819_v40 = vor.u32 %v6584_v34, %v4816_v35  ;;  %v6641_v31 = vld [vmem:[#allocation2 + $0x4e4] sm:$0xf0]  ;;  %v4978_v33 = vld [vmem:[#allocation2 + $0x468] sm:$0xf0]  ;;  %v6640_v34 = vld [vmem:[#allocation2 + $0x4e4] sm:$0xf] }
  0x6c   :  { %806 = vmatpush.bf16.msra.mxu1 %v4727_v44  ;;  %v4883_v44 = vor.u32 %v6600_v36, %v4880_v37  ;;  %v5042_v35 = vld [vmem:[#allocation2 + $0x4e8] sm:$0xf0]  ;;  %v5041_v37 = vor.u32 %v6641_v31, %v5040_v29  ;;  %v4938_v29 = vld [vmem:[#allocation2 + $0x418] sm:$0xf0] }
  0x6d   :  { %820 = vmatpush.bf16.msra.mxu2 %v4667_v45  ;;  %v6599_v45 = vld [vmem:[#allocation2 + $0x3a4] sm:$0xf0]  ;;  %v5002_v31 = vld [vmem:[#allocation2 + $0x498] sm:$0xf0] }
  0x6e   :  { %834 = vmatpush.bf16.msra.mxu3 %v4731_v49  ;;  %793 = vmatmul.bf16.vlgmr.msra.gmra.mxu0 %v7115_v58  ;;  %v4872_v49 = vld [vmem:[#allocation2 + $0x3a8] sm:$0xf0]  ;;  %v4871_v51 = vor.u32 %v6599_v45, %v4870_v43  ;;  %v6639_v43 = vld [vmem:[#allocation2 + $0x4d4] sm:$0xf0]  ;;  %v4970_v45 = vld [vmem:[#allocation2 + $0x458] sm:$0xf0] }
  0x6f   :  { %1038 = vmatpush.bf16.msrb.mxu0 %v4847_v50  ;;  %807 = vmatmul.bf16.vlgmr.msra.gmra.mxu1 %v7117_v62  ;;  %v4807_v50 = vor.u32 %v6583_v42, %v4806_v41  ;;  %v4875_v54 = vor.u32 %v6598_v48, %v4872_v49  ;;  %v5032_v41 = vld [vmem:[#allocation2 + $0x4d0] sm:$0xf]  ;;  %v5045_v42 = vor.u32 %v6640_v34, %v5042_v35  ;;  %v6613_v34 = vld [vmem:[#allocation2 + $0x404] sm:$0xf0]  ;;  %v4992_v35 = vld [vmem:[#allocation2 + $0x480] sm:$0xf] }
  0x70   :  { %1052 = vmatpush.bf16.msrb.mxu1 %v4911_v52  ;;  %821 = vmatmul.bf16.vlgmr.msra.gmra.mxu2 %v7115_v58  ;;  %v4798_v52 = vld [vmem:[#allocation2 + $0x310] sm:$0xf]  ;;  %v5033_v49 = vor.u32 %v6639_v43, %v5032_v41  ;;  %v4994_v43 = vld [vmem:[#allocation2 + $0x488] sm:$0xf0] }
  0x71   :  { %1066 = vmatpush.bf16.msrb.mxu2 %v4851_v5  ;;  %835 = vmatmul.bf16.vlgmr.msra.gmra.mxu3 %v7117_v62  ;;  %v6581_v5 = vld [vmem:[#allocation2 + $0x314] sm:$0xf0] }
  0x72   :  { %1080 = vmatpush.bf16.msrb.mxu3 %v4915_v56  ;;  %v6580_v56 = vld [vmem:[#allocation2 + $0x314] sm:$0xf]  ;;  %v4799_v63 = vor.u32 %v6581_v5, %v4798_v52  ;;  %v5024_v52 = vld [vmem:[#allocation2 + $0x4c0] sm:$0xf]  ;;  %v5037_v5 = vor.u32 %v6638_v46, %v5034_v47  ;;  %v5176_v46 = vld [vmem:[#allocation2 + $0x5f0] sm:$0xf] }
  0x73   :  { %1039 = vmatpush.bf16.msrb.mxu0 %v4839_v1  ;;  %v6579_v1 = vld [vmem:[#allocation2 + $0x304] sm:$0xf0]  ;;  %v6675_v47 = vld [vmem:[#allocation2 + $0x5f4] sm:$0xf0] }
  0x74   :  { %1053 = vmatpush.bf16.msrb.mxu1 %v4903_v2  ;;  %v4863_v2 = vor.u32 %v6597_v55, %v4862_v53  ;;  %v6637_v53 = vld [vmem:[#allocation2 + $0x4c4] sm:$0xf0]  ;;  %v4962_v55 = vld [vmem:[#allocation2 + $0x448] sm:$0xf0] }
  0x75   :  { %1067 = vmatpush.bf16.msrb.mxu2 %v4843_v3  ;;  %v4803_v3 = vor.u32 %v6580_v56, %v4800_v59  ;;  %v6636_v56 = vld [vmem:[#allocation2 + $0x4c4] sm:$0xf] }
  0x76   :  { %1081 = vmatpush.bf16.msrb.mxu3 %v4907_v8  ;;  %v4867_v8 = vor.u32 %v6596_v60, %v4864_v61  ;;  %v4952_v61 = vld [vmem:[#allocation2 + $0x430] sm:$0xf] }
  0x77   :  { %1040 = vmatpush.bf16.msrb.mxu0 %v4831_v14  ;;  %v5048_v14 = vld [vmem:[#allocation2 + $0x4f0] sm:$0xf] }
  0x78   :  { %1054 = vmatpush.bf16.msrb.mxu1 %v4895_v15  ;;  %v4791_v15 = vor.u32 %v6579_v1, %v4790_v0  ;;  %v5016_v0 = vld [vmem:[#allocation2 + $0x4b0] sm:$0xf] }
  0x79   :  { %1068 = vmatpush.bf16.msrb.mxu2 %v4835_v16  ;;  %v6643_v16 = vld [vmem:[#allocation2 + $0x4f4] sm:$0xf0] }
  0x7a   :  { %1082 = vmatpush.bf16.msrb.mxu3 %v4899_v20  ;;  %v4795_v20 = vor.u32 %v6578_v7, %v4792_v9  ;;  %v5049_v25 = vor.u32 %v6643_v16, %v5048_v14  ;;  %v5018_v7 = vld [vmem:[#allocation2 + $0x4b8] sm:$0xf0]  ;;  %v6616_v16 = vld [vmem:[#allocation2 + $0x424] sm:$0xf] }
  0x7b   :  { %1041 = vmatpush.bf16.msrb.mxu0 %v4823_v26  ;;  %v4989_v26 = vor.u32 %v6626_v17, %v4986_v18  ;;  %v5021_v14 = vor.u32 %v6634_v6, %v5018_v7  ;;  %v4946_v17 = vld [vmem:[#allocation2 + $0x428] sm:$0xf0]  ;;  %v6632_v18 = vld [vmem:[#allocation2 + $0x4a4] sm:$0xf] }
  0x7c   :  { %1055 = vmatpush.bf16.msrb.mxu1 %v4887_v27  ;;  %v4976_v27 = vld [vmem:[#allocation2 + $0x460] sm:$0xf]  ;;  %v4949_v22 = vor.u32 %v6616_v16, %v4946_v17  ;;  %v5106_v6 = vld [vmem:[#allocation2 + $0x568] sm:$0xf0]  ;;  %v6671_v17 = vld [vmem:[#allocation2 + $0x5d4] sm:$0xf0] }
  0x7d   :  { %1069 = vmatpush.bf16.msrb.mxu2 %v4827_v28  ;;  %v6625_v28 = vld [vmem:[#allocation2 + $0x464] sm:$0xf0] }
  0x7e   :  { %1083 = vmatpush.bf16.msrb.mxu3 %v4891_v32  ;;  %v6624_v32 = vld [vmem:[#allocation2 + $0x464] sm:$0xf]  ;;  %v4977_v36 = vor.u32 %v6625_v28, %v4976_v27  ;;  %v6631_v27 = vld [vmem:[#allocation2 + $0x494] sm:$0xf0]  ;;  %v6614_v28 = vld [vmem:[#allocation2 + $0x414] sm:$0xf] }
  0x7f   :  { %1042 = vmatpush.bf16.msrb.mxu0 %v4815_v38  ;;  %v4981_v38 = vor.u32 %v6624_v32, %v4978_v33  ;;  %v4928_v33 = vld [vmem:[#allocation2 + $0x400] sm:$0xf] }
  0x80   :  { %1056 = vmatpush.bf16.msrb.mxu1 %v4879_v39  ;;  %v4968_v39 = vld [vmem:[#allocation2 + $0x450] sm:$0xf] }
  0x81   :  { %1070 = vmatpush.bf16.msrb.mxu2 %v4819_v40  ;;  %v6623_v40 = vld [vmem:[#allocation2 + $0x454] sm:$0xf0] }
  0x82   :  { %1084 = vmatpush.bf16.msrb.mxu3 %v4883_v44  ;;  %v6622_v44 = vld [vmem:[#allocation2 + $0x454] sm:$0xf]  ;;  %v4969_v48 = vor.u32 %v6623_v40, %v4968_v39  ;;  %v6612_v39 = vld [vmem:[#allocation2 + $0x404] sm:$0xf]  ;;  %v4930_v40 = vld [vmem:[#allocation2 + $0x408] sm:$0xf0] }
  0x83   :  { %1043 = vmatpush.bf16.msrb.mxu0 %v4807_v50  ;;  %v4973_v50 = vor.u32 %v6622_v44, %v4970_v45  ;;  %v5112_v44 = vld [vmem:[#allocation2 + $0x570] sm:$0xf]  ;;  %v6659_v45 = vld [vmem:[#allocation2 + $0x574] sm:$0xf0] }
  0x84   :  { %1057 = vmatpush.bf16.msrb.mxu1 %v4871_v51  ;;  %v4960_v51 = vld [vmem:[#allocation2 + $0x440] sm:$0xf] }
  0x85   :  { %1071 = vmatpush.bf16.msrb.mxu2 %v4811_v57  ;;  %v6621_v57 = vld [vmem:[#allocation2 + $0x444] sm:$0xf0] }
  0x86   :  { %1085 = vmatpush.bf16.msrb.mxu3 %v4875_v54  ;;  %v6620_v54 = vld [vmem:[#allocation2 + $0x444] sm:$0xf]  ;;  %v4961_v59 = vor.u32 %v6621_v57, %v4960_v51  ;;  %v6674_v51 = vld [vmem:[#allocation2 + $0x5f4] sm:$0xf] }
  0x87   :  { %1044 = vmatpush.bf16.msrb.mxu0 %v4799_v63  ;;  %v4965_v60 = vor.u32 %v6620_v54, %v4962_v55  ;;  %v6619_v63 = vld [vmem:[#allocation2 + $0x434] sm:$0xf0]  ;;  %v6611_v54 = vld [vmem:[%s8254_s0 + $0x2c] sm:$0xf0] }
  0x88   :  { %1058 = vmatpush.bf16.msrb.mxu1 %v4863_v2  ;;  %v6635_v2 = vld [vmem:[#allocation2 + $0x4b4] sm:$0xf0] }
  0x89   :  { %1072 = vmatpush.bf16.msrb.mxu2 %v4803_v3  ;;  %v6618_v3 = vld [vmem:[#allocation2 + $0x434] sm:$0xf]  ;;  %v5017_v9 = vor.u32 %v6635_v2, %v5016_v0  ;;  %v5168_v0 = vld [vmem:[#allocation2 + $0x5e0] sm:$0xf] }
  0x8a   :  { %1086 = vmatpush.bf16.msrb.mxu3 %v4867_v8  ;;  %v4953_v8 = vor.u32 %v6619_v63, %v4952_v61  ;;  %v4957_v10 = vor.u32 %v6618_v3, %v4954_v4  ;;  %v5104_v61 = vld [vmem:[#allocation2 + $0x560] sm:$0xf]  ;;  %v6657_v63 = vld [vmem:[#allocation2 + $0x564] sm:$0xf0]  ;;  %v6656_v4 = vld [vmem:[#allocation2 + $0x564] sm:$0xf] }
  0x8b   :  { %1045 = vmatpush.bf16.msrb.mxu0 %v4791_v15  ;;  %v6633_v15 = vld [vmem:[#allocation2 + $0x4a4] sm:$0xf0] }
  0x8c   :  { %1059 = vmatpush.bf16.msrb.mxu1 %v4855_v19  ;;  %v5010_v19 = vld [vmem:[#allocation2 + $0x4a8] sm:$0xf0]  ;;  %v5009_v21 = vor.u32 %v6633_v15, %v5008_v13  ;;  %v6673_v3 = vld [vmem:[#allocation2 + $0x5e4] sm:$0xf0]  ;;  %v5096_v13 = vld [vmem:[#allocation2 + $0x550] sm:$0xf] }
  0x8d   :  { %1073 = vmatpush.bf16.msrb.mxu2 %v4795_v20  ;;  %v4945_v20 = vor.u32 %v6617_v12, %v4944_v11  ;;  %v5169_v11 = vor.u32 %v6673_v3, %v5168_v0  ;;  %v5109_v12 = vor.u32 %v6656_v4, %v5106_v6  ;;  %v5160_v15 = vld [vmem:[#allocation2 + $0x5d0] sm:$0xf]  ;;  %v6647_v0 = vld [vmem:[#allocation2 + $0x514] sm:$0xf0]  ;;  %v6646_v6 = vld [vmem:[#allocation2 + $0x514] sm:$0xf] }
  0x8e   :  { %1087 = vmatpush.bf16.msrb.mxu3 %v4859_v23  ;;  %1046 = vmatmul.bf16.vlgmr.msrb.gmra.mxu0 %v7115_v58  ;;  %v4936_v23 = vld [vmem:[#allocation2 + $0x410] sm:$0xf]  ;;  %v6663_v4 = vld [vmem:[#allocation2 + $0x594] sm:$0xf0] }
  0x8f   :  { %1312 = vmatpush.bf16.msra.mxu0 %v4985_v24  ;;  %1060 = vmatmul.bf16.vlgmr.msrb.gmra.mxu1 %v7117_v62  ;;  %v6615_v24 = vld [vmem:[#allocation2 + $0x414] sm:$0xf0] }
  0x90   :  { %1326 = vmatpush.bf16.msra.mxu1 %v5049_v25  ;;  %1074 = vmatmul.bf16.vlgmr.msrb.gmra.mxu2 %v7115_v58  ;;  %v5026_v58 = vld [vmem:[#allocation2 + $0x4c8] sm:$0xf0]  ;;  %v5000_v25 = vld [vmem:[#allocation2 + $0x490] sm:$0xf]  ;;  %v4937_v32 = vor.u32 %v6615_v24, %v4936_v23  ;;  %v5161_v23 = vor.u32 %v6671_v17, %v5160_v15  ;;  %v5056_v15 = vld [vmem:[#allocation2 + $0x500] sm:$0xf] }
  0x91   :  { %1340 = vmatpush.bf16.msra.mxu2 %v4989_v26  ;;  %1088 = vmatmul.bf16.vlgmr.msrb.gmra.mxu3 %v7117_v62  ;;  %v5025_v62 = vor.u32 %v6637_v53, %v5024_v52  ;;  %v5029_v1 = vor.u32 %v6636_v56, %v5026_v58  ;;  %v5013_v26 = vor.u32 %v6632_v18, %v5010_v19  ;;  %v4920_v53 = vld [vmem:[%s8254_s0 + $0x10] sm:$0xf]  ;;  %v6610_v58 = vld [vmem:[%s8254_s0 + $0x14] sm:$0xf]  ;;  %v5098_v19 = vld [vmem:[#allocation2 + $0x558] sm:$0xf0] }
  0x92   :  { %1354 = vmatpush.bf16.msra.mxu3 %v5053_v30  ;;  %v6630_v30 = vld [vmem:[#allocation2 + $0x494] sm:$0xf]  ;;  %v4933_v52 = vor.u32 %v6612_v39, %v4930_v40  ;;  %v5113_v56 = vor.u32 %v6659_v45, %v5112_v44  ;;  %v7139_v2 = vor.u32 %v6611_v54, %v4920_v53  ;;  %v5144_v39 = vld [vmem:[#allocation2 + $0x5b0] sm:$0xf]  ;;  %v5146_v45 = vld [vmem:[#allocation2 + $0x5b8] sm:$0xf0] }
  0x93   :  { %1313 = vmatpush.bf16.msra.mxu0 %v4977_v36  ;;  %v5001_v36 = vor.u32 %v6631_v27, %v5000_v25  ;;  %v5005_v41 = vor.u32 %v6630_v30, %v5002_v31  ;;  %v6654_v18 = vld [vmem:[#allocation2 + $0x554] sm:$0xf]  ;;  %v5088_v25 = vld [vmem:[#allocation2 + $0x540] sm:$0xf]  ;;  %v6652_v30 = vld [vmem:[#allocation2 + $0x544] sm:$0xf] }
  0x94   :  { %1327 = vmatpush.bf16.msra.mxu1 %v5041_v37  ;;  %v4941_v37 = vor.u32 %v6614_v28, %v4938_v29  ;;  %v5101_v24 = vor.u32 %v6654_v18, %v5098_v19  ;;  %v5152_v27 = vld [vmem:[#allocation2 + $0x5c0] sm:$0xf]  ;;  %v6669_v29 = vld [vmem:[#allocation2 + $0x5c4] sm:$0xf0]  ;;  %v5090_v31 = vld [vmem:[#allocation2 + $0x548] sm:$0xf0] }
  0x95   :  { %1341 = vmatpush.bf16.msra.mxu2 %v4981_v38  ;;  %v6629_v38 = vld [vmem:[#allocation2 + $0x484] sm:$0xf0]  ;;  %v6666_v44 = vld [vmem:[#allocation2 + $0x5b4] sm:$0xf]  ;;  %v5120_v19 = vld [vmem:[#allocation2 + $0x580] sm:$0xf] }
  0x96   :  { %1355 = vmatpush.bf16.msra.mxu3 %v5045_v42  ;;  %v6628_v42 = vld [vmem:[#allocation2 + $0x484] sm:$0xf]  ;;  %v4993_v57 = vor.u32 %v6629_v38, %v4992_v35  ;;  %v5153_v35 = vor.u32 %v6669_v29, %v5152_v27  ;;  %v6651_v38 = vld [vmem:[#allocation2 + $0x534] sm:$0xf0]  ;;  %v5149_v53 = vor.u32 %v6666_v44, %v5146_v45  ;;  %v6665_v54 = vld [vmem:[#allocation2 + $0x5a4] sm:$0xf0] }
  0x97   :  { %1314 = vmatpush.bf16.msra.mxu0 %v4969_v48  ;;  %v4929_v48 = vor.u32 %v6613_v34, %v4928_v33  ;;  %v4997_v55 = vor.u32 %v6628_v42, %v4994_v43  ;;  %v5154_v33 = vld [vmem:[#allocation2 + $0x5c8] sm:$0xf0]  ;;  %v6650_v42 = vld [vmem:[#allocation2 + $0x534] sm:$0xf]  ;;  %v5082_v43 = vld [vmem:[#allocation2 + $0x538] sm:$0xf0] }
  0x98   :  { %1328 = vmatpush.bf16.msra.mxu1 %v5033_v49  ;;  %v6658_v49 = vld [vmem:[#allocation2 + $0x574] sm:$0xf]  ;;  %v6693_v27 = vld [vmem:[#allocation2 + $0x674] sm:$0xf0] }
  0x99   :  { %1342 = vmatpush.bf16.msra.mxu2 %v4973_v50  ;;  %v5114_v50 = vld [vmem:[#allocation2 + $0x578] sm:$0xf0] }
  0x9a   :  { %1356 = vmatpush.bf16.msra.mxu3 %v5037_v5  ;;  %v5178_v5 = vld [vmem:[#allocation2 + $0x5f8] sm:$0xf0] }
  0x9b   :  { %1315 = vmatpush.bf16.msra.mxu0 %v4961_v59  ;;  %v4922_v59 = vld [vmem:[%s8254_s0 + $0x30] sm:$0xf0] }
  0x9c   :  { %1329 = vmatpush.bf16.msra.mxu1 %v5025_v62  ;;  %v5177_v62 = vor.u32 %v6675_v47, %v5176_v46  ;;  %v7141_v7 = vor.u32 %v6610_v58, %v4922_v59  ;;  %v6664_v58 = vld [vmem:[#allocation2 + $0x5a4] sm:$0xf]  ;;  %v5138_v59 = vld [vmem:[#allocation2 + $0x5a8] sm:$0xf0] }
  0x9d   :  { %1343 = vmatpush.bf16.msra.mxu2 %v4965_v60  ;;  %v5117_v60 = vor.u32 %v6658_v49, %v5114_v50  ;;  %v5141_v3 = vor.u32 %v6664_v58, %v5138_v59  ;;  %v5298_v59 = vld [vmem:[#allocation2 + $0x6d0] sm:$0xf] }
  0x9e   :  { %1357 = vmatpush.bf16.msra.mxu3 %v5029_v1  ;;  %v5181_v1 = vor.u32 %v6674_v51, %v5178_v5  ;;  %v5085_v51 = vor.u32 %v6650_v42, %v5082_v43  ;;  %v5136_v5 = vld [vmem:[#allocation2 + $0x5a0] sm:$0xf]  ;;  %v6691_v42 = vld [vmem:[#allocation2 + $0x664] sm:$0xf0] }
  0x9f   :  { %1316 = vmatpush.bf16.msra.mxu0 %v4953_v8  ;;  %v6672_v8 = vld [vmem:[#allocation2 + $0x5e4] sm:$0xf]  ;;  %v5306_v43 = vld [vmem:[#allocation2 + $0x6e0] sm:$0xf] }
  0xa0   :  { %1330 = vmatpush.bf16.msra.mxu1 %v5017_v9  ;;  %v5170_v9 = vld [vmem:[#allocation2 + $0x5e8] sm:$0xf0] }
  0xa1   :  { %1344 = vmatpush.bf16.msra.mxu2 %v4957_v10  ;;  %v5105_v10 = vor.u32 %v6657_v63, %v5104_v61  ;;  %v5173_v16 = vor.u32 %v6672_v8, %v5170_v9  ;;  %v5064_v63 = vld [vmem:[#allocation2 + $0x510] sm:$0xf]  ;;  %v5066_v8 = vld [vmem:[#allocation2 + $0x518] sm:$0xf0] }
  0xa2   :  { %1358 = vmatpush.bf16.msra.mxu3 %v5021_v14  ;;  %v6655_v14 = vld [vmem:[#allocation2 + $0x554] sm:$0xf0]  ;;  %v5069_v18 = vor.u32 %v6646_v6, %v5066_v8  ;;  %v6704_v8 = vld [vmem:[#allocation2 + $0x6d4] sm:$0xf] }
  0xa3   :  { %1317 = vmatpush.bf16.msra.mxu0 %v4945_v20  ;;  %v6670_v20 = vld [vmem:[#allocation2 + $0x5d4] sm:$0xf] }
  0xa4   :  { %1331 = vmatpush.bf16.msra.mxu1 %v5009_v21  ;;  %v5162_v21 = vld [vmem:[#allocation2 + $0x5d8] sm:$0xf0] }
  0xa5   :  { %1345 = vmatpush.bf16.msra.mxu2 %v4949_v22  ;;  %v5097_v22 = vor.u32 %v6655_v14, %v5096_v13  ;;  %v5165_v28 = vor.u32 %v6670_v20, %v5162_v21  ;;  %v5065_v14 = vor.u32 %v6647_v0, %v5064_v63  ;;  %v6661_v20 = vld [vmem:[#allocation2 + $0x584] sm:$0xf0]  ;;  %v6644_v21 = vld [vmem:[#allocation2 + $0x504] sm:$0xf]  ;;  %v6688_v0 = vld [vmem:[#allocation2 + $0x654] sm:$0xf] }
  0xa6   :  { %1359 = vmatpush.bf16.msra.mxu3 %v5013_v26  ;;  %v6653_v26 = vld [vmem:[#allocation2 + $0x544] sm:$0xf0] }
  0xa7   :  { %1318 = vmatpush.bf16.msra.mxu0 %v4937_v32  ;;  %v6668_v32 = vld [vmem:[#allocation2 + $0x5c4] sm:$0xf]  ;;  %v5089_v34 = vor.u32 %v6653_v26, %v5088_v25  ;;  %v5122_v25 = vld [vmem:[#allocation2 + $0x588] sm:$0xf0]  ;;  %v5250_v26 = vld [vmem:[#allocation2 + $0x670] sm:$0xf] }
  0xa8   :  { %1332 = vmatpush.bf16.msra.mxu1 %v5001_v36  ;;  %v5093_v36 = vor.u32 %v6652_v30, %v5090_v31  ;;  %v5157_v40 = vor.u32 %v6668_v32, %v5154_v33  ;;  %v6709_v30 = vld [vmem:[#allocation2 + $0x6f4] sm:$0xf0]  ;;  %v6692_v31 = vld [vmem:[#allocation2 + $0x674] sm:$0xf]  ;;  %v5252_v32 = vld [vmem:[#allocation2 + $0x678] sm:$0xf0]  ;;  %v5121_v33 = vor.u32 %v6661_v20, %v5120_v19 }
  0xa9   :  { %1346 = vmatpush.bf16.msra.mxu2 %v4941_v37  ;;  %v5080_v37 = vld [vmem:[#allocation2 + $0x530] sm:$0xf]  ;;  %v6686_v19 = vld [vmem:[#allocation2 + $0x644] sm:$0xf]  ;;  %v5228_v20 = vld [vmem:[#allocation2 + $0x648] sm:$0xf0] }
  0xaa   :  { %1360 = vmatpush.bf16.msra.mxu3 %v5005_v41  ;;  %v6667_v41 = vld [vmem:[#allocation2 + $0x5b4] sm:$0xf0] }
  0xab   :  { %1319 = vmatpush.bf16.msra.mxu0 %v4929_v48  ;;  %v305_v46 = vpop.f32.mrf.mxu0  ;;  %v5081_v48 = vor.u32 %v6651_v38, %v5080_v37  ;;  %v5145_v50 = vor.u32 %v6667_v41, %v5144_v39  ;;  %v5251_v38 = vor.u32 %v6693_v27, %v5250_v26  ;;  %v5242_v41 = vld [vmem:[#allocation2 + $0x660] sm:$0xf] }
  0xac   :  { %1333 = vmatpush.bf16.msra.mxu1 %v4993_v57  ;;  %v319_v47 = vpop.f32.mrf.mxu1  ;;  %v5072_v57 = vld [vmem:[#allocation2 + $0x520] sm:$0xf] }
  0xad   :  { %1347 = vmatpush.bf16.msra.mxu2 %v4933_v52  ;;  %v7147_v49 = vadd.f32 %v319_v47, %v305_v46  ;;  %v6649_v52 = vld [vmem:[#allocation2 + $0x524] sm:$0xf0]  ;;  %v356_v46 = vlaneseq }
  0xae   :  { %1361 = vmatpush.bf16.msra.mxu3 %v4997_v55  ;;  %1320 = vmatmul.bf16.vlgmr.msra.gmra.mxu0 %v7139_v2  ;;  %v6648_v55 = vld [vmem:[#allocation2 + $0x524] sm:$0xf] }
  0xaf   :  { %1565 = vmatpush.bf16.msrb.mxu0 %v5113_v56  ;;  %1334 = vmatmul.bf16.vlgmr.msra.gmra.mxu1 %v7141_v7  ;;  %v5074_v56 = vld [vmem:[#allocation2 + $0x528] sm:$0xf0]  ;;  %v352_v63 = vrot.slane %v7147_v49, 1 }
  0xb0   :  { %1579 = vmatpush.bf16.msrb.mxu1 %v5177_v62  ;;  %1348 = vmatmul.bf16.vlgmr.msra.gmra.mxu2 %v7139_v2  ;;  %v5073_v62 = vor.u32 %v6649_v52, %v5072_v57  ;;  %v5077_v61 = vor.u32 %v6648_v55, %v5074_v56  ;;  %v6706_v52 = vld [vmem:[#allocation2 + $0x6e4] sm:$0xf]  ;;  %v6689_v55 = vld [vmem:[#allocation2 + $0x654] sm:$0xf0] }
  0xb1   :  { %1593 = vmatpush.bf16.msrb.mxu2 %v5117_v60  ;;  %1362 = vmatmul.bf16.vlgmr.msra.gmra.mxu3 %v7141_v7  ;;  %v5137_v60 = vor.u32 %v6665_v54, %v5136_v5  ;;  %v5308_v5 = vld [vmem:[#allocation2 + $0x6e8] sm:$0xf0]  ;;  %v5234_v54 = vld [vmem:[#allocation2 + $0x650] sm:$0xf] }
  0xb2   :  { %1607 = vmatpush.bf16.msrb.mxu3 %v5181_v1  ;;  %v5128_v1 = vld [vmem:[#allocation2 + $0x590] sm:$0xf] }
  0xb3   :  { %1566 = vmatpush.bf16.msrb.mxu0 %v5105_v10  ;;  %v333_v9 = vpop.f32.mrf.mxu2  ;;  %v5129_v17 = vor.u32 %v6663_v4, %v5128_v1  ;;  %v307_v44 = vpop.f32.mrf.mxu0  ;;  %v5236_v1 = vld [vmem:[#allocation2 + $0x658] sm:$0xf0] }
  0xb4   :  { %1580 = vmatpush.bf16.msrb.mxu1 %v5169_v11  ;;  %v347_v10 = vpop.f32.mrf.mxu3  ;;  %v6662_v11 = vld [vmem:[#allocation2 + $0x594] sm:$0xf]  ;;  %v321_v45 = vpop.f32.mrf.mxu1 }
  0xb5   :  { %1594 = vmatpush.bf16.msrb.mxu2 %v5109_v12  ;;  %v5130_v12 = vld [vmem:[#allocation2 + $0x598] sm:$0xf0]  ;;  %v7149_v13 = vadd.f32 %v347_v10, %v333_v9  ;;  %v7151_v57 = vadd.f32 %v321_v45, %v307_v44 }
  0xb6   :  { %1608 = vmatpush.bf16.msrb.mxu3 %v5173_v16  ;;  %v6645_v16 = vld [vmem:[#allocation2 + $0x504] sm:$0xf0]  ;;  %v5300_v9 = vld [vmem:[#allocation2 + $0x6d8] sm:$0xf0] }
  0xb7   :  { %1567 = vmatpush.bf16.msrb.mxu0 %v5097_v22  ;;  %v5133_v22 = vor.u32 %v6662_v11, %v5130_v12  ;;  %v5057_v29 = vor.u32 %v6645_v16, %v5056_v15  ;;  %v354_v6 = vrot.slane %v7151_v57, 1  ;;  %v5235_v11 = vor.u32 %v6689_v55, %v5234_v54  ;;  %v5226_v12 = vld [vmem:[#allocation2 + $0x640] sm:$0xf]  ;;  %v6687_v16 = vld [vmem:[#allocation2 + $0x644] sm:$0xf0] }
  0xb8   :  { %1581 = vmatpush.bf16.msrb.mxu1 %v5161_v23  ;;  %v5058_v23 = vld [vmem:[#allocation2 + $0x508] sm:$0xf0]  ;;  %v5239_v15 = vor.u32 %v6688_v0, %v5236_v1  ;;  %v6698_v55 = vld [vmem:[#allocation2 + $0x6a4] sm:$0xf]  ;;  %v5202_v0 = vld [vmem:[#allocation2 + $0x610] sm:$0xf] }
  0xb9   :  { %1595 = vmatpush.bf16.msrb.mxu2 %v5101_v24  ;;  %v6660_v24 = vld [vmem:[#allocation2 + $0x584] sm:$0xf]  ;;  %v6681_v1 = vld [vmem:[#allocation2 + $0x614] sm:$0xf0] }
  0xba   :  { %1609 = vmatpush.bf16.msrb.mxu3 %v5165_v28  ;;  %v5314_v28 = vld [vmem:[#allocation2 + $0x6f0] sm:$0xf]  ;;  %v5125_v37 = vor.u32 %v6660_v24, %v5122_v25  ;;  %v5292_v24 = vld [vmem:[#allocation2 + $0x6c8] sm:$0xf0]  ;;  %v5227_v25 = vor.u32 %v6687_v16, %v5226_v12  ;;  %v6696_v12 = vld [vmem:[#allocation2 + $0x694] sm:$0xf] }
  0xbb   :  { %1568 = vmatpush.bf16.msrb.mxu0 %v5089_v34  ;;  %v5061_v34 = vor.u32 %v6644_v21, %v5058_v23  ;;  %v5315_v39 = vor.u32 %v6709_v30, %v5314_v28  ;;  %v353_v21 = vrot.slane %v7149_v13, 1  ;;  %v6702_v23 = vld [vmem:[#allocation2 + $0x6c4] sm:$0xf]  ;;  %v5231_v28 = vor.u32 %v6686_v19, %v5228_v20  ;;  %v6685_v30 = vld [vmem:[#allocation2 + $0x634] sm:$0xf0] }
  0xbc   :  { %1582 = vmatpush.bf16.msrb.mxu1 %v5153_v35  ;;  %v6708_v35 = vld [vmem:[#allocation2 + $0x6f4] sm:$0xf]  ;;  %v349_v4 = vpop.f32.mrf.mxu3  ;;  %v5194_v16 = vld [vmem:[#allocation2 + $0x600] sm:$0xf]  ;;  %v6695_v20 = vld [vmem:[#allocation2 + $0x684] sm:$0xf0] }
  0xbd   :  { %1596 = vmatpush.bf16.msrb.mxu2 %v5093_v36  ;;  %v5316_v36 = vld [vmem:[#allocation2 + $0x6f8] sm:$0xf0] }
  0xbe   :  { %1610 = vmatpush.bf16.msrb.mxu3 %v5157_v40  ;;  %v5255_v40 = vor.u32 %v6692_v31, %v5252_v32  ;;  %v5319_v47 = vor.u32 %v6708_v35, %v5316_v36  ;;  %v5282_v31 = vld [vmem:[#allocation2 + $0x6b0] sm:$0xf]  ;;  %v6684_v35 = vld [vmem:[#allocation2 + $0x634] sm:$0xf]  ;;  %v5220_v36 = vld [vmem:[#allocation2 + $0x638] sm:$0xf0] }
  0xbf   :  { %1569 = vmatpush.bf16.msrb.mxu0 %v5081_v48  ;;  %v6707_v48 = vld [vmem:[#allocation2 + $0x6e4] sm:$0xf0]  ;;  %v5223_v44 = vor.u32 %v6684_v35, %v5220_v36 }
  0xc0   :  { %1583 = vmatpush.bf16.msrb.mxu1 %v5145_v50  ;;  %v6690_v50 = vld [vmem:[#allocation2 + $0x664] sm:$0xf]  ;;  %v5307_v56 = vor.u32 %v6707_v48, %v5306_v43  ;;  %v5274_v48 = vld [vmem:[#allocation2 + $0x6a0] sm:$0xf] }
  0xc1   :  { %1597 = vmatpush.bf16.msrb.mxu2 %v5085_v51  ;;  %v5244_v51 = vld [vmem:[#allocation2 + $0x668] sm:$0xf0] }
  0xc2   :  { %1611 = vmatpush.bf16.msrb.mxu3 %v5149_v53  ;;  %v5243_v53 = vor.u32 %v6691_v42, %v5242_v41  ;;  %v5247_v58 = vor.u32 %v6690_v50, %v5244_v51 }
  0xc3   :  { %1570 = vmatpush.bf16.msrb.mxu0 %v5073_v62  ;;  %v6705_v62 = vld [vmem:[#allocation2 + $0x6d4] sm:$0xf0] }
  0xc4   :  { %1584 = vmatpush.bf16.msrb.mxu1 %v5137_v60  ;;  %v7153_v60 = vshrl.u32 %v356_v46, 7  ;;  %v5210_v46 = vld [vmem:[#allocation2 + $0x620] sm:$0xf] }
  0xc5   :  { %1598 = vmatpush.bf16.msrb.mxu2 %v5077_v61  ;;  %v5311_v61 = vor.u32 %v6706_v52, %v5308_v5  ;;  %v6699_v52 = vld [vmem:[#allocation2 + $0x6a4] sm:$0xf0]  ;;  %v6682_v5 = vld [vmem:[#allocation2 + $0x624] sm:$0xf] }
  0xc6   :  { %1612 = vmatpush.bf16.msrb.mxu3 %v5141_v3  ;;  %v335_v3 = vpop.f32.mrf.mxu2  ;;  %vm358_vm0 = vcmp.lt.s32.totalorder %v7153_v60, 7  ;;  %vm3292_vm2 = vcmp.lt.s32.totalorder %v7153_v60, 6  ;;  %vm4155_vm4 = vcmp.lt.s32.totalorder %v7153_v60, 5  ;;  %vm4365_vm5 = vcmp.lt.s32.totalorder %v7153_v60, 4 }
  0xc7   :  { %1571 = vmatpush.bf16.msrb.mxu0 %v5065_v14  ;;  %v7160_v10 = vadd.f32 %v349_v4, %v335_v3  ;;  %v5299_v14 = vor.u32 %v6705_v62, %v5298_v59  ;;  %v5275_v62 = vor.u32 %v6699_v52, %v5274_v48  ;;  %v5266_v3 = vld [vmem:[#allocation2 + $0x690] sm:$0xf]  ;;  %v6723_v48 = vld [vmem:[#allocation2 + $0x764] sm:$0xf0] }
  0xc8   :  { %1585 = vmatpush.bf16.msrb.mxu1 %v5129_v17  ;;  %v5290_v17 = vld [vmem:[#allocation2 + $0x6c0] sm:$0xf] }
  0xc9   :  { %1599 = vmatpush.bf16.msrb.mxu2 %v5069_v18  ;;  %v5303_v18 = vor.u32 %v6704_v8, %v5300_v9  ;;  %v6697_v8 = vld [vmem:[#allocation2 + $0x694] sm:$0xf0]  ;;  %v6680_v9 = vld [vmem:[#allocation2 + $0x614] sm:$0xf] }
  0xca   :  { %1613 = vmatpush.bf16.msrb.mxu3 %v5133_v22  ;;  %v355_v22 = vrot.slane %v7160_v10, 1 }
  0xcb   :  { %1572 = vmatpush.bf16.msrb.mxu0 %v5057_v29  ;;  %v532_v26 = vpop.f32.mrf.mxu0  ;;  %v5218_v29 = vld [vmem:[#allocation2 + $0x630] sm:$0xf] }
  0xcc   :  { %1586 = vmatpush.bf16.msrb.mxu1 %v5121_v33  ;;  %v5295_v33 = vor.u32 %v6702_v23, %v5292_v24  ;;  %v5219_v42 = vor.u32 %v6685_v30, %v5218_v29  ;;  %v5196_v23 = vld [vmem:[#allocation2 + $0x608] sm:$0xf0]  ;;  %v5442_v29 = vld [vmem:[#allocation2 + $0x7f0] sm:$0xf]  ;;  %v6741_v30 = vld [vmem:[#allocation2 + $0x7f4] sm:$0xf0]  ;;  %v362_v49 = vsel %vm358_vm0, %v355_v22, %v353_v21 }
  0xcd   :  { %1600 = vmatpush.bf16.msrb.mxu2 %v5061_v34  ;;  %v6701_v34 = vld [vmem:[#allocation2 + $0x6b4] sm:$0xf0] }
  0xce   :  { %1614 = vmatpush.bf16.msrb.mxu3 %v5125_v37  ;;  %1573 = vmatmul.bf16.vlgmr.msrb.gmra.mxu0 %v7139_v2  ;;  %v546_v37 = vpop.f32.mrf.mxu1  ;;  %v5283_v43 = vor.u32 %v6701_v34, %v5282_v31  ;;  %v6740_v34 = vld [vmem:[#allocation2 + $0x7f4] sm:$0xf] }
  0xcf   :  { %1839 = vmatpush.bf16.msra.mxu0 %v5251_v38  ;;  %1587 = vmatmul.bf16.vlgmr.msrb.gmra.mxu1 %v7141_v7  ;;  %v6700_v38 = vld [vmem:[#allocation2 + $0x6b4] sm:$0xf] }
  0xd0   :  { %1853 = vmatpush.bf16.msra.mxu1 %v5315_v39  ;;  %1601 = vmatmul.bf16.vlgmr.msrb.gmra.mxu2 %v7139_v2  ;;  %v6703_v2 = vld [vmem:[#allocation2 + $0x6c4] sm:$0xf0]  ;;  %v5284_v39 = vld [vmem:[#allocation2 + $0x6b8] sm:$0xf0] }
  0xd1   :  { %1867 = vmatpush.bf16.msra.mxu2 %v5255_v40  ;;  %1615 = vmatmul.bf16.vlgmr.msrb.gmra.mxu3 %v7141_v7  ;;  %v359_v7 = vsel %vm358_vm0, %v352_v63, %v354_v6  ;;  %v5291_v27 = vor.u32 %v6703_v2, %v5290_v17  ;;  %v360_v40 = vsel %vm358_vm0, %v353_v21, %v355_v22  ;;  %v6679_v17 = vld [vmem:[#allocation2 + $0x604] sm:$0xf0] }
  0xd2   :  { %1881 = vmatpush.bf16.msra.mxu3 %v5319_v47  ;;  %v533_v32 = vadd.f32 %v532_v26, %v359_v7  ;;  %v6683_v47 = vld [vmem:[#allocation2 + $0x624] sm:$0xf0]  ;;  %v5287_v50 = vor.u32 %v6700_v38, %v5284_v39  ;;  %v5267_v2 = vor.u32 %v6697_v8, %v5266_v3  ;;  %v6678_v7 = vld [vmem:[#allocation2 + $0x604] sm:$0xf]  ;;  %v5260_v26 = vld [vmem:[#allocation2 + $0x688] sm:$0xf0]  ;;  %v5195_v31 = vor.u32 %v6679_v17, %v5194_v16 }
  0xd3   :  { %1840 = vmatpush.bf16.msra.mxu0 %v5243_v53  ;;  %v560_v45 = vpop.f32.mrf.mxu2  ;;  %v5212_v53 = vld [vmem:[#allocation2 + $0x628] sm:$0xf0]  ;;  %v5211_v59 = vor.u32 %v6683_v47, %v5210_v46  ;;  %v5199_v36 = vor.u32 %v6678_v7, %v5196_v23  ;;  %v5186_v38 = vld [vmem:[%s8254_s0 + $0x18] sm:$0xf]  ;;  %v5370_v47 = vld [vmem:[#allocation2 + $0x760] sm:$0xf] }
  0xd4   :  { %1854 = vmatpush.bf16.msra.mxu1 %v5307_v56  ;;  %v7178_v41 = vadd.f32 %v546_v37, %v533_v32  ;;  %v561_v51 = vadd.f32 %v560_v45, %v360_v40  ;;  %v574_v54 = vpop.f32.mrf.mxu3  ;;  %v5276_v56 = vld [vmem:[#allocation2 + $0x6a8] sm:$0xf0]  ;;  %v6724_v32 = vld [vmem:[#allocation2 + $0x774] sm:$0xf]  ;;  %v5444_v37 = vld [vmem:[#allocation2 + $0x7f8] sm:$0xf0]  ;;  %v5443_v45 = vor.u32 %v6741_v30, %v5442_v29 }
  0xd5   :  { %1868 = vmatpush.bf16.msra.mxu2 %v5247_v58  ;;  %v5279_v4 = vor.u32 %v6698_v55, %v5276_v56  ;;  %v6677_v39 = vld [vmem:[%s8254_s0 + $0x34] sm:$0xf0]  ;;  %v7196_v55 = vpop.f32.mrf.mxu0  ;;  %v6736_v16 = vld [vmem:[#allocation2 + $0x7d4] sm:$0xf]  ;;  %v5428_v17 = vld [vmem:[#allocation2 + $0x7d8] sm:$0xf0] }
  0xd6   :  { %1882 = vmatpush.bf16.msra.mxu3 %v5311_v61  ;;  %v7180_v58 = vadd.f32 %v574_v54, %v561_v51  ;;  %v5215_v61 = vor.u32 %v6682_v5, %v5212_v53  ;;  %v5447_v51 = vor.u32 %v6740_v34, %v5444_v37  ;;  %v7194_v52 = vor.u32 %v6677_v39, %v5186_v38  ;;  %v6739_v5 = vld [vmem:[#allocation2 + $0x7e4] sm:$0xf0]  ;;  %v6722_v53 = vld [vmem:[#allocation2 + $0x764] sm:$0xf]  ;;  %v5372_v54 = vld [vmem:[#allocation2 + $0x768] sm:$0xf0] }
  0xd7   :  { %1841 = vmatpush.bf16.msra.mxu0 %v5235_v11  ;;  %v5204_v11 = vld [vmem:[#allocation2 + $0x618] sm:$0xf0]  ;;  %v5375_v3 = vor.u32 %v6722_v53, %v5372_v54  ;;  %v6721_v8 = vld [vmem:[#allocation2 + $0x754] sm:$0xf0]  ;;  %v6719_v7 = vld [vmem:[#allocation2 + $0x744] sm:$0xf0] }
  0xd8   :  { %1855 = vmatpush.bf16.msra.mxu1 %v5299_v14  ;;  %v5268_v14 = vld [vmem:[#allocation2 + $0x698] sm:$0xf0]  ;;  %v5207_v19 = vor.u32 %v6680_v9, %v5204_v11  ;;  %v5426_v9 = vld [vmem:[#allocation2 + $0x7d0] sm:$0xf]  ;;  %v5418_v23 = vld [vmem:[#allocation2 + $0x7c0] sm:$0xf] }
  0xd9   :  { %1869 = vmatpush.bf16.msra.mxu2 %v5239_v15  ;;  %v5203_v15 = vor.u32 %v6681_v1, %v5202_v0  ;;  %v5271_v24 = vor.u32 %v6696_v12, %v5268_v14  ;;  %v5371_v0 = vor.u32 %v6723_v48, %v5370_v47  ;;  %v6737_v12 = vld [vmem:[#allocation2 + $0x7d4] sm:$0xf0]  ;;  %v6720_v14 = vld [vmem:[#allocation2 + $0x754] sm:$0xf]  ;;  %v5346_v38 = vld [vmem:[#allocation2 + $0x730] sm:$0xf] }
  0xda   :  { %1883 = vmatpush.bf16.msra.mxu3 %v5303_v18  ;;  %v5258_v18 = vld [vmem:[#allocation2 + $0x680] sm:$0xf]  ;;  %v6717_v39 = vld [vmem:[#allocation2 + $0x734] sm:$0xf0]  ;;  %v6732_v47 = vld [vmem:[#allocation2 + $0x7b4] sm:$0xf] }
  0xdb   :  { %1842 = vmatpush.bf16.msra.mxu0 %v5227_v25  ;;  %v6694_v25 = vld [vmem:[#allocation2 + $0x684] sm:$0xf]  ;;  %v5259_v35 = vor.u32 %v6695_v20, %v5258_v18  ;;  %v5354_v20 = vld [vmem:[#allocation2 + $0x740] sm:$0xf]  ;;  %v5412_v48 = vld [vmem:[#allocation2 + $0x7b8] sm:$0xf0] }
  0xdc   :  { %1856 = vmatpush.bf16.msra.mxu1 %v5291_v27  ;;  %v5378_v27 = vld [vmem:[#allocation2 + $0x770] sm:$0xf]  ;;  %v5263_v40 = vor.u32 %v6694_v25, %v5260_v26  ;;  %v5431_v25 = vor.u32 %v6736_v16, %v5428_v17  ;;  %v6735_v26 = vld [vmem:[#allocation2 + $0x7c4] sm:$0xf0]  ;;  %v7208_v29 = vpop.f32.mrf.mxu3  ;;  %v5355_v34 = vor.u32 %v6719_v7, %v5354_v20  ;;  %v5338_v53 = vld [vmem:[#allocation2 + $0x720] sm:$0xf] }
  0xdd   :  { %1870 = vmatpush.bf16.msra.mxu2 %v5231_v28  ;;  %v6725_v28 = vld [vmem:[#allocation2 + $0x774] sm:$0xf0]  ;;  %v6715_v54 = vld [vmem:[#allocation2 + $0x724] sm:$0xf0]  ;;  %v5330_v16 = vld [vmem:[#allocation2 + $0x710] sm:$0xf] }
  0xde   :  { %1884 = vmatpush.bf16.msra.mxu3 %v5295_v33  ;;  %v5380_v33 = vld [vmem:[#allocation2 + $0x778] sm:$0xf0]  ;;  %v6713_v17 = vld [vmem:[#allocation2 + $0x714] sm:$0xf0]  ;;  %v6712_v7 = vld [vmem:[#allocation2 + $0x714] sm:$0xf] }
  0xdf   :  { %1843 = vmatpush.bf16.msra.mxu0 %v5219_v42  ;;  %v5379_v42 = vor.u32 %v6725_v28, %v5378_v27  ;;  %v5383_v46 = vor.u32 %v6724_v32, %v5380_v33  ;;  %v6718_v27 = vld [vmem:[#allocation2 + $0x744] sm:$0xf]  ;;  %v5356_v28 = vld [vmem:[#allocation2 + $0x748] sm:$0xf0]  ;;  %v6729_v20 = vld [vmem:[#allocation2 + $0x794] sm:$0xf0] }
  0xe0   :  { %1857 = vmatpush.bf16.msra.mxu1 %v5283_v43  ;;  %v6676_v43 = vld [vmem:[%s8254_s0 + $0x1c] sm:$0xf]  ;;  %v5420_v32 = vld [vmem:[#allocation2 + $0x7c8] sm:$0xf0]  ;;  %v5359_v37 = vor.u32 %v6718_v27, %v5356_v28  ;;  %v5331_v27 = vor.u32 %v6713_v17, %v5330_v16 }
  0xe1   :  { %1871 = vmatpush.bf16.msra.mxu2 %v5223_v44  ;;  %v5188_v44 = vld [vmem:[%s8254_s0 + $0x38] sm:$0xf0] }
  0xe2   :  { %1885 = vmatpush.bf16.msra.mxu3 %v5287_v50  ;;  %v5434_v50 = vld [vmem:[#allocation2 + $0x7e0] sm:$0xf]  ;;  %v7198_v56 = vor.u32 %v6676_v43, %v5188_v44  ;;  %v6733_v43 = vld [vmem:[#allocation2 + $0x7b4] sm:$0xf0]  ;;  %v6716_v44 = vld [vmem:[#allocation2 + $0x734] sm:$0xf] }
  0xe3   :  { %1844 = vmatpush.bf16.msra.mxu0 %v5211_v59  ;;  %v6738_v59 = vld [vmem:[#allocation2 + $0x7e4] sm:$0xf]  ;;  %v5435_v1 = vor.u32 %v6739_v5, %v5434_v50  ;;  %v5347_v50 = vor.u32 %v6717_v39, %v5346_v38  ;;  %v5388_v38 = vld [vmem:[#allocation2 + $0x788] sm:$0xf0] }
  0xe4   :  { %1858 = vmatpush.bf16.msra.mxu1 %v5275_v62  ;;  %v5436_v62 = vld [vmem:[#allocation2 + $0x7e8] sm:$0xf0] }
  0xe5   :  { %1872 = vmatpush.bf16.msra.mxu2 %v5215_v61  ;;  %v7200_v61 = vpop.f32.mrf.mxu1  ;;  %v5439_v11 = vor.u32 %v6738_v59, %v5436_v62  ;;  %v5402_v59 = vld [vmem:[#allocation2 + $0x7a0] sm:$0xf]  ;;  %v5415_v62 = vor.u32 %v6732_v47, %v5412_v48 }
  0xe6   :  { %1886 = vmatpush.bf16.msra.mxu3 %v5279_v4  ;;  %v5362_v4 = vld [vmem:[#allocation2 + $0x750] sm:$0xf] }
  0xe7   :  { %1845 = vmatpush.bf16.msra.mxu0 %v5203_v15  ;;  %v5364_v15 = vld [vmem:[#allocation2 + $0x758] sm:$0xf0]  ;;  %v5363_v18 = vor.u32 %v6721_v8, %v5362_v4  ;;  %v5340_v4 = vld [vmem:[#allocation2 + $0x728] sm:$0xf0] }
  0xe8   :  { %1859 = vmatpush.bf16.msra.mxu1 %v5267_v2  ;;  %v5427_v2 = vor.u32 %v6737_v12, %v5426_v9  ;;  %v5404_v9 = vld [vmem:[#allocation2 + $0x7a8] sm:$0xf0]  ;;  %v5339_v12 = vor.u32 %v6715_v54, %v5338_v53  ;;  %v361_v53 = vsel %vm358_vm0, %v354_v6, %v352_v63 }
  0xe9   :  { %1873 = vmatpush.bf16.msra.mxu2 %v5207_v19  ;;  %v5367_v19 = vor.u32 %v6720_v14, %v5364_v15  ;;  %v535_v54 = vadd.f32 %v7196_v55, %v361_v53  ;;  %v5530_v53 = vld [vmem:[%s8257_s3 + $0x180] sm:$0xf] }
  0xea   :  { %1887 = vmatpush.bf16.msra.mxu3 %v5271_v24  ;;  %v7206_v24 = vpop.f32.mrf.mxu2 }
  0xeb   :  { %1846 = vmatpush.bf16.msra.mxu0 %v5195_v31  ;;  %v794_v30 = vpop.f32.mrf.mxu0  ;;  %v6734_v31 = vld [vmem:[#allocation2 + $0x7c4] sm:$0xf]  ;;  %v563_v63 = vadd.f32 %v7206_v24, %v362_v49  ;;  %v5664_v49 = vld [vmem:[%s8257_s3 + $0x294] sm:$0xf0] }
  0xec   :  { %1860 = vmatpush.bf16.msra.mxu1 %v5259_v35 }
  0xed   :  { %1874 = vmatpush.bf16.msra.mxu2 %v5199_v36  ;;  %v808_v33 = vpop.f32.mrf.mxu1  ;;  %v5419_v36 = vor.u32 %v6735_v26, %v5418_v23  ;;  %v5332_v23 = vld [vmem:[#allocation2 + $0x718] sm:$0xf0]  ;;  %v577_v21 = vadd.f32 %v7208_v29, %v563_v63  ;;  %v6806_v29 = vld [vmem:[%s8257_s3 + $0x200] sm:$0xf0]  ;;  %v5518_v63 = vld [vmem:[%s8257_s3 + $0x168] sm:$0xf] }
  0xee   :  { %1888 = vmatpush.bf16.msra.mxu3 %v5263_v40  ;;  %1847 = vmatmul.bf16.vlgmr.msra.gmra.mxu0 %v7194_v52  ;;  %v809_v35 = vadd.f32 %v808_v33, %v794_v30  ;;  %v5410_v40 = vld [vmem:[#allocation2 + $0x7b0] sm:$0xf]  ;;  %v5396_v26 = vld [vmem:[#allocation2 + $0x798] sm:$0xf0]  ;;  %v5335_v30 = vor.u32 %v6712_v7, %v5332_v23  ;;  %v5386_v33 = vld [vmem:[#allocation2 + $0x780] sm:$0xf] }
  0xef   :  { %2092 = vmatpush.bf16.msrb.mxu0 %v5379_v42  ;;  %1861 = vmatmul.bf16.vlgmr.msra.gmra.mxu1 %v7198_v56  ;;  %v5423_v42 = vor.u32 %v6734_v31, %v5420_v32  ;;  %v5322_v31 = vld [vmem:[#allocation2 + $0x700] sm:$0xf]  ;;  %v6711_v32 = vld [vmem:[#allocation2 + $0x704] sm:$0xf0] }
  0xf0   :  { %2106 = vmatpush.bf16.msrb.mxu1 %v5443_v45  ;;  %1875 = vmatmul.bf16.vlgmr.msra.gmra.mxu2 %v7194_v52  ;;  %v5348_v45 = vld [vmem:[#allocation2 + $0x738] sm:$0xf0]  ;;  %v5323_v39 = vor.u32 %v6711_v32, %v5322_v31  ;;  %v5566_v23 = vld [vmem:[%s8257_s3 + $0x1c8] sm:$0xf]  ;;  %v5554_v31 = vld [vmem:[%s8257_s3 + $0x1b0] sm:$0xf] }
  0xf1   :  { %2120 = vmatpush.bf16.msrb.mxu2 %v5383_v46  ;;  %1889 = vmatmul.bf16.vlgmr.msra.gmra.mxu3 %v7198_v56  ;;  %v7211_v46 = vadd.f32 %v809_v35, %v7178_v41  ;;  %v5351_v5 = vor.u32 %v6716_v44, %v5348_v45  ;;  %v6730_v41 = vld [vmem:[#allocation2 + $0x7a4] sm:$0xf]  ;;  %v6727_v35 = vld [vmem:[#allocation2 + $0x784] sm:$0xf0]  ;;  %v6797_v32 = vld [vmem:[%s8257_s3 + $0x1b8] sm:$0xf0] }
  0xf2   :  { %2134 = vmatpush.bf16.msrb.mxu3 %v5447_v51  ;;  %v5411_v51 = vor.u32 %v6733_v43, %v5410_v40  ;;  %v5387_v40 = vor.u32 %v6727_v35, %v5386_v33  ;;  %v6802_v33 = vld [vmem:[%s8257_s3 + $0x1e4] sm:$0xf]  ;;  %v5580_v35 = vld [vmem:[%s8257_s3 + $0x1ec] sm:$0xf0] }
  0xf3   :  { %2093 = vmatpush.bf16.msrb.mxu0 %v5371_v0  ;;  %v822_v0 = vpop.f32.mrf.mxu2  ;;  %v796_v44 = vpop.f32.mrf.mxu0 }
  0xf4   :  { %2107 = vmatpush.bf16.msrb.mxu1 %v5435_v1  ;;  %v6731_v1 = vld [vmem:[#allocation2 + $0x7a4] sm:$0xf0]  ;;  %v836_v8 = vpop.f32.mrf.mxu3 }
  0xf5   :  { %2121 = vmatpush.bf16.msrb.mxu2 %v5375_v3  ;;  %v6714_v3 = vld [vmem:[#allocation2 + $0x724] sm:$0xf]  ;;  %v5403_v14 = vor.u32 %v6731_v1, %v5402_v59  ;;  %v810_v45 = vpop.f32.mrf.mxu1 }
  0xf6   :  { %2135 = vmatpush.bf16.msrb.mxu3 %v5439_v11  ;;  %v837_v11 = vadd.f32 %v836_v8, %v822_v0  ;;  %v5343_v15 = vor.u32 %v6714_v3, %v5340_v4  ;;  %v549_v8 = vadd.f32 %v7200_v61, %v535_v54  ;;  %v6791_v54 = vld [vmem:[%s8257_s3 + $0x188] sm:$0xf0] }
  0xf7   :  { %2094 = vmatpush.bf16.msrb.mxu0 %v5363_v18  ;;  %v5394_v18 = vld [vmem:[#allocation2 + $0x790] sm:$0xf] }
  0xf8   :  { %2108 = vmatpush.bf16.msrb.mxu1 %v5427_v2  ;;  %v7214_v2 = vadd.f32 %v837_v11, %v7180_v58  ;;  %v5395_v28 = vor.u32 %v6729_v20, %v5394_v18  ;;  %v6710_v58 = vld [vmem:[#allocation2 + $0x704] sm:$0xf]  ;;  %v5590_v18 = vld [vmem:[%s8257_s3 + $0x1f8] sm:$0xf] }
  0xf9   :  { %2122 = vmatpush.bf16.msrb.mxu2 %v5367_v19  ;;  %v5407_v19 = vor.u32 %v6730_v41, %v5404_v9  ;;  %v5591_v20 = vor.u32 %v6806_v29, %v5590_v18  ;;  %v5506_v18 = vld [vmem:[%s8257_s3 + $0x150] sm:$0xf]  ;;  %v6785_v29 = vld [vmem:[%s8257_s3 + $0x158] sm:$0xf0] }
  0xfa   :  { %2136 = vmatpush.bf16.msrb.mxu3 %v5431_v25  ;;  %v6728_v25 = vld [vmem:[#allocation2 + $0x794] sm:$0xf] }
  0xfb   :  { %2095 = vmatpush.bf16.msrb.mxu0 %v5355_v34  ;;  %v5399_v34 = vor.u32 %v6728_v25, %v5396_v26  ;;  %v824_v47 = vpop.f32.mrf.mxu2  ;;  %v6800_v25 = vld [vmem:[%s8257_s3 + $0x1d0] sm:$0xf0]  ;;  %v6805_v26 = vld [vmem:[%s8257_s3 + $0x1fc] sm:$0xf] }
  0xfc   :  { %2109 = vmatpush.bf16.msrb.mxu1 %v5419_v36  ;;  %v5324_v36 = vld [vmem:[#allocation2 + $0x708] sm:$0xf0]  ;;  %v838_v48 = vpop.f32.mrf.mxu3 }
  0xfd   :  { %2123 = vmatpush.bf16.msrb.mxu2 %v5359_v37  ;;  %v6726_v37 = vld [vmem:[#allocation2 + $0x784] sm:$0xf]  ;;  %v839_v13 = vadd.f32 %v838_v48, %v824_v47  ;;  %v5568_v47 = vld [vmem:[%s8257_s3 + $0x1d4] sm:$0xf0] }
  0xfe   :  { %2137 = vmatpush.bf16.msrb.mxu3 %v5423_v42  ;;  %v5327_v42 = vor.u32 %v6710_v58, %v5324_v36  ;;  %v5391_v43 = vor.u32 %v6726_v37, %v5388_v38  ;;  %v5583_v58 = vor.u32 %v6802_v33, %v5580_v35  ;;  %v5662_v36 = vld [vmem:[%s8257_s3 + $0x288] sm:$0xf]  ;;  %v6824_v37 = vld [vmem:[%s8257_s3 + $0x290] sm:$0xf0]  ;;  %v6787_v35 = vld [vmem:[%s8257_s3 + $0x16c] sm:$0xf] }
  0xff   :  { %2096 = vmatpush.bf16.msrb.mxu0 %v5347_v50  ;;  %v844_v24 = vadd.f32 %v839_v13, %v577_v21  ;;  %v5626_v21 = vld [vmem:[%s8257_s3 + $0x240] sm:$0xf] }
 0x100   :  { %2110 = vmatpush.bf16.msrb.mxu1 %v5411_v51 }
 0x101   :  { %2124 = vmatpush.bf16.msrb.mxu2 %v5351_v5 }
 0x102   :  { %2138 = vmatpush.bf16.msrb.mxu3 %v5415_v62 }
 0x103   :  { %2097 = vmatpush.bf16.msrb.mxu0 %v5339_v12 }
 0x104   :  { %2111 = vmatpush.bf16.msrb.mxu1 %v5403_v14 }
 0x105   :  { %2125 = vmatpush.bf16.msrb.mxu2 %v5343_v15 }
 0x106   :  { %2139 = vmatpush.bf16.msrb.mxu3 %v5407_v19  ;;  %v5578_v19 = vld [vmem:[%s8257_s3 + $0x1e0] sm:$0xf] }
 0x107   :  { %2098 = vmatpush.bf16.msrb.mxu0 %v5331_v27  ;;  %v5567_v27 = vor.u32 %v6800_v25, %v5566_v23  ;;  %v5761_v23 = vld [vmem:[%s8257_s3 + $0xa8] sm:$0xf] }
 0x108   :  { %2112 = vmatpush.bf16.msrb.mxu1 %v5395_v28  ;;  %v5592_v28 = vld [vmem:[%s8257_s3 + $0x204] sm:$0xf0] }
 0x109   :  { %2126 = vmatpush.bf16.msrb.mxu2 %v5335_v30  ;;  %v5595_v30 = vor.u32 %v6805_v26, %v5592_v28  ;;  %v6764_v26 = vld [vmem:[%s8257_s3 + $0xb0] sm:$0xf0] }
 0x10a   :  { %2140 = vmatpush.bf16.msrb.mxu3 %v5399_v34  ;;  %v5555_v34 = vor.u32 %v6797_v32, %v5554_v31  ;;  %v5762_v28 = vor.u32 %v6764_v26, %v5761_v23  ;;  %v6817_v31 = vld [vmem:[%s8257_s3 + $0x25c] sm:$0xf]  ;;  %v5640_v32 = vld [vmem:[%s8257_s3 + $0x264] sm:$0xf0] }
 0x10b   :  { %2099 = vmatpush.bf16.msrb.mxu0 %v5323_v39  ;;  %v1047_v50 = vpop.f32.mrf.mxu0  ;;  %v5663_v39 = vor.u32 %v6824_v37, %v5662_v36  ;;  %v5749_v36 = vld [vmem:[%s8257_s3 + $0x90] sm:$0xf] }
 0x10c   :  { %2113 = vmatpush.bf16.msrb.mxu1 %v5387_v40  ;;  %v1061_v51 = vpop.f32.mrf.mxu1 }
 0x10d   :  { %2127 = vmatpush.bf16.msrb.mxu2 %v5327_v42  ;;  %v1062_v5 = vadd.f32 %v1061_v51, %v1047_v50  ;;  %v5542_v42 = vld [vmem:[%s8257_s3 + $0x198] sm:$0xf]  ;;  %v5650_v50 = vld [vmem:[%s8257_s3 + $0x270] sm:$0xf]  ;;  %v6821_v51 = vld [vmem:[%s8257_s3 + $0x278] sm:$0xf0] }
 0x10e   :  { %2141 = vmatpush.bf16.msrb.mxu3 %v5391_v43  ;;  %2100 = vmatmul.bf16.vlgmr.msrb.gmra.mxu0 %v7194_v52  ;;  %v6794_v43 = vld [vmem:[%s8257_s3 + $0x1a0] sm:$0xf0] }
 0x10f   :  { %2114 = vmatmul.bf16.vlgmr.msrb.gmra.mxu1 %v7198_v56  ;;  %v1094_v3 = vrot.slane %v1062_v5, 1  ;;  %2517 = vmatpush.bf16.msra.mxu0 %v5591_v20  ;;  %v5651_v5 = vor.u32 %v6821_v51, %v5650_v50  ;;  %v5507_v20 = vor.u32 %v6785_v29, %v5506_v18  ;;  %v6814_v51 = vld [vmem:[%s8257_s3 + $0x244] sm:$0xf]  ;;  %v6755_v18 = vld [vmem:[%s8257_s3 + $0x68] sm:$0xf0] }
 0x110   :  { %2128 = vmatmul.bf16.vlgmr.msrb.gmra.mxu2 %v7194_v52  ;;  %v811_v52 = vadd.f32 %v810_v45, %v796_v44  ;;  %v6799_v44 = vld [vmem:[%s8257_s3 + $0x1cc] sm:$0xf]  ;;  %2533 = vmatpush.bf16.msra.mxu1 %v5663_v39  ;;  %v5543_v45 = vor.u32 %v6794_v43, %v5542_v42  ;;  %v6761_v42 = vld [vmem:[%s8257_s3 + $0x98] sm:$0xf0]  ;;  %v5602_v43 = vld [vmem:[%s8257_s3 + $0x210] sm:$0xf] }
 0x111   :  { %2142 = vmatmul.bf16.vlgmr.msrb.gmra.mxu3 %v7198_v56  ;;  %2545 = vmatpush.bf16.msra.mxu2 %v5595_v30  ;;  %v5571_v48 = vor.u32 %v6799_v44, %v5568_v47  ;;  %v6812_v30 = vld [vmem:[%s8257_s3 + $0x230] sm:$0xf0]  ;;  %v6809_v44 = vld [vmem:[%s8257_s3 + $0x218] sm:$0xf0]  ;;  %v5821_v29 = vld [vmem:[%s8257_s3 + $0x120] sm:$0xf] }
 0x112   :  { %v843_v57 = vadd.f32 %v811_v52, %v549_v8  ;;  %v5603_v50 = vor.u32 %v6809_v44, %v5602_v43  ;;  %v5562_v44 = vld [vmem:[%s8257_s3 + $0x1b8] sm:$0xf] }
 0x113   :  { %v1075_v59 = vpop.f32.mrf.mxu2  ;;  %v1049_v0 = vpop.f32.mrf.mxu0 }
 0x114   :  { %v1089_v62 = vpop.f32.mrf.mxu3  ;;  %v1063_v56 = vpop.f32.mrf.mxu1  ;;  %2534 = vmatpush.bf16.msra.mxu1 %v5651_v5  ;;  %v5628_v5 = vld [vmem:[%s8257_s3 + $0x24c] sm:$0xf0] }
 0x115   :  { %v1090_v1 = vadd.f32 %v1089_v62, %v1075_v59  ;;  %v1064_v4 = vadd.f32 %v1063_v56, %v1049_v0  ;;  %2546 = vmatpush.bf16.msra.mxu2 %v5583_v58  ;;  %v6796_v59 = vld [vmem:[%s8257_s3 + $0x1b4] sm:$0xf]  ;;  %v5531_v62 = vor.u32 %v6791_v54, %v5530_v53  ;;  %v5556_v0 = vld [vmem:[%s8257_s3 + $0x1bc] sm:$0xf0]  ;;  %v5638_v56 = vld [vmem:[%s8257_s3 + $0x258] sm:$0xf] }
 0x116   :  { %v5520_v58 = vld [vmem:[%s8257_s3 + $0x174] sm:$0xf0]  ;;  %v5598_v53 = vld [vmem:[%s8257_s3 + $0x200] sm:$0xf] }
 0x117   :  { %v1096_v41 = vrot.slane %v1064_v4, 1  ;;  %v1095_v12 = vrot.slane %v1090_v1, 1  ;;  %v5559_v1 = vor.u32 %v6796_v59, %v5556_v0  ;;  %v5523_v39 = vor.u32 %v6787_v35, %v5520_v58  ;;  %v5713_v35 = vld [vmem:[%s8257_s3 + $0x48] sm:$0xf]  ;;  %v6752_v58 = vld [vmem:[%s8257_s3 + $0x50] sm:$0xf0] }
 0x118   :  { %v5631_v59 = vor.u32 %v6814_v51, %v5628_v5  ;;  %v6822_v5 = vld [vmem:[%s8257_s3 + $0x280] sm:$0xf0] }
 0x119   :  { %v1098_v6 = vsel %vm358_vm0, %v1094_v3, %v1096_v41  ;;  %v1100_v55 = vsel %vm358_vm0, %v1096_v41, %v1094_v3  ;;  %2547 = vmatpush.bf16.msra.mxu2 %v5571_v48  ;;  %v6818_v3 = vld [vmem:[%s8257_s3 + $0x260] sm:$0xf0]  ;;  %v6823_v41 = vld [vmem:[%s8257_s3 + $0x28c] sm:$0xf]  ;;  %v5750_v48 = vor.u32 %v6761_v42, %v5749_v36  ;;  %v5809_v36 = vld [vmem:[%s8257_s3 + $0x108] sm:$0xf] }
 0x11a   :  { %v7240_v61 = vadd.f32 %v1098_v6, %v7211_v46  ;;  %v7242_v11 = vadd.f32 %v1100_v55, %v843_v57  ;;  %v5639_v8 = vor.u32 %v6818_v3, %v5638_v56  ;;  %v5667_v57 = vor.u32 %v6823_v41, %v5664_v49  ;;  %v6788_v6 = vld [vmem:[%s8257_s3 + $0x170] sm:$0xf0]  ;;  %v6793_v55 = vld [vmem:[%s8257_s3 + $0x19c] sm:$0xf]  ;;  %v5508_v56 = vld [vmem:[%s8257_s3 + $0x15c] sm:$0xf0] }
 0x11b   :  { %v1077_v9 = vpop.f32.mrf.mxu2  ;;  %v5519_v13 = vor.u32 %v6788_v6, %v5518_v63  ;;  %v6758_v41 = vld [vmem:[%s8257_s3 + $0x80] sm:$0xf0]  ;;  %v5833_v49 = vld [vmem:[%s8257_s3 + $0x138] sm:$0xf]  ;;  %v6811_v6 = vld [vmem:[%s8257_s3 + $0x22c] sm:$0xf] }
 0x11c   :  { %v1091_v10 = vpop.f32.mrf.mxu3  ;;  %2535 = vmatpush.bf16.msra.mxu1 %v5639_v8  ;;  %2561 = vmatpush.bf16.msra.mxu3 %v5667_v57  ;;  %v5737_v8 = vld [vmem:[%s8257_s3 + $0x78] sm:$0xf]  ;;  %v6782_v63 = vld [vmem:[%s8257_s3 + $0x140] sm:$0xf0]  ;;  %v6776_v42 = vld [vmem:[%s8257_s3 + $0x110] sm:$0xf0] }
 0x11d   :  { %v1092_v14 = vadd.f32 %v1091_v10, %v1077_v9  ;;  %2548 = vmatpush.bf16.msra.mxu2 %v5559_v1  ;;  %v5544_v10 = vld [vmem:[%s8257_s3 + $0x1a4] sm:$0xf0]  ;;  %v6784_v1 = vld [vmem:[%s8257_s3 + $0x154] sm:$0xf]  ;;  %v5738_v57 = vor.u32 %v6758_v41, %v5737_v8  ;;  %v5810_v43 = vor.u32 %v6776_v42, %v5809_v36  ;;  %v6789_v42 = vld [vmem:[%s8257_s3 + $0x178] sm:$0xf0] }
 0x11e   :  { %v5511_v3 = vor.u32 %v6784_v1, %v5508_v56 }
 0x11f   :  { %v1097_v22 = vrot.slane %v1092_v14, 1  ;;  %v5547_v14 = vor.u32 %v6793_v55, %v5544_v10  ;;  %v5616_v55 = vld [vmem:[%s8257_s3 + $0x234] sm:$0xf0] }
 0x120   :  { %v5619_v10 = vor.u32 %v6811_v6, %v5616_v55  ;;  %v5646_v6 = vld [vmem:[%s8257_s3 + $0x260] sm:$0xf] }
 0x121   :  { %v1099_v15 = vsel %vm358_vm0, %v1095_v12, %v1097_v22  ;;  %v1101_v16 = vsel %vm358_vm0, %v1097_v22, %v1095_v12  ;;  %v6815_v22 = vld [vmem:[%s8257_s3 + $0x248] sm:$0xf0]  ;;  %2549 = vmatpush.bf16.msra.mxu2 %v5547_v14  ;;  %v5586_v14 = vld [vmem:[%s8257_s3 + $0x1e8] sm:$0xf] }
 0x122   :  { %v7250_v17 = vadd.f32 %v1099_v15, %v7214_v2  ;;  %v7252_v46 = vadd.f32 %v1101_v16, %v844_v24  ;;  %v6803_v2 = vld [vmem:[%s8257_s3 + $0x1e8] sm:$0xf0]  ;;  %v6820_v24 = vld [vmem:[%s8257_s3 + $0x274] sm:$0xf]  ;;  %v5627_v15 = vor.u32 %v6815_v22, %v5626_v21  ;;  %v5652_v16 = vld [vmem:[%s8257_s3 + $0x27c] sm:$0xf0] }
 0x123   :  { %v5579_v7 = vor.u32 %v6803_v2, %v5578_v19  ;;  %v5655_v19 = vor.u32 %v6820_v24, %v5652_v16  ;;  %v6790_v2 = vld [vmem:[%s8257_s3 + $0x184] sm:$0xf]  ;;  %v6804_v21 = vld [vmem:[%s8257_s3 + $0x1f0] sm:$0xf0]  ;;  %v5725_v16 = vld [vmem:[%s8257_s3 + $0x60] sm:$0xf] }
 0x124   :  { %2536 = vmatpush.bf16.msra.mxu1 %v5627_v15  ;;  %v5587_v24 = vor.u32 %v6804_v21, %v5586_v14  ;;  %v5689_v21 = vld [vmem:[%s8257_s3 + $0x18] sm:$0xf] }
 0x125   :  { %2518 = vmatpush.bf16.msra.mxu0 %v5579_v7  ;;  %v5532_v7 = vld [vmem:[%s8257_s3 + $0x18c] sm:$0xf0]  ;;  %2562 = vmatpush.bf16.msra.mxu3 %v5655_v19  ;;  %v5726_v19 = vor.u32 %v6755_v18, %v5725_v16  ;;  %v5785_v18 = vld [vmem:[%s8257_s3 + $0xd8] sm:$0xf] }
 0x126   :  { %v5535_v25 = vor.u32 %v6790_v2, %v5532_v7  ;;  %v6808_v2 = vld [vmem:[%s8257_s3 + $0x214] sm:$0xf]  ;;  %v5604_v7 = vld [vmem:[%s8257_s3 + $0x21c] sm:$0xf0] }
 0x127   :  { %v5607_v26 = vor.u32 %v6808_v2, %v5604_v7  ;;  %v6792_v2 = vld [vmem:[%s8257_s3 + $0x190] sm:$0xf0]  ;;  %v5634_v7 = vld [vmem:[%s8257_s3 + $0x248] sm:$0xf] }
 0x128   :  { %2550 = vmatpush.bf16.msra.mxu2 %v5535_v25 }
 0x129   :  { %2519 = vmatpush.bf16.msra.mxu0 %v5567_v27  ;;  %v5614_v27 = vld [vmem:[%s8257_s3 + $0x228] sm:$0xf] }
 0x12a   :  { %v5615_v33 = vor.u32 %v6812_v30, %v5614_v27  ;;  %v5574_v27 = vld [vmem:[%s8257_s3 + $0x1d0] sm:$0xf] }
 0x12b   :  { %v7296_v38 = vpop.f32.mrf.mxu0  ;;  %v5670_v30 = vld [vmem:[%s8257_s3 + $0x290] sm:$0xf] }
 0x12c   :  { %v7298_v40 = vpop.f32.mrf.mxu1  ;;  %2537 = vmatpush.bf16.msra.mxu1 %v5615_v33  ;;  %2551 = vmatpush.bf16.msra.mxu2 %v5523_v39  ;;  %v6825_v33 = vld [vmem:[%s8257_s3 + $0x298] sm:$0xf0]  ;;  %v5714_v39 = vor.u32 %v6752_v58, %v5713_v35  ;;  %v6767_v35 = vld [vmem:[%s8257_s3 + $0xc8] sm:$0xf0] }
 0x12d   :  { %2520 = vmatpush.bf16.msra.mxu0 %v5555_v34  ;;  %v5643_v34 = vor.u32 %v6817_v31, %v5640_v32 }
 0x12f   :  { %2563 = vmatpush.bf16.msra.mxu3 %v5643_v34  ;;  %v5671_v34 = vor.u32 %v6825_v33, %v5670_v30  ;;  %v6743_v30 = vld [vmem:[%s8257_s3 + $0x8] sm:$0xf0] }
 0x130   :  { %2538 = vmatpush.bf16.msra.mxu1 %v5603_v50  ;;  %2552 = vmatpush.bf16.msra.mxu2 %v5511_v3  ;;  %v5658_v50 = vld [vmem:[%s8257_s3 + $0x278] sm:$0xf]  ;;  %v6773_v3 = vld [vmem:[%s8257_s3 + $0xf8] sm:$0xf0] }
 0x131   :  { %2521 = vmatpush.bf16.msra.mxu0 %v5543_v45 }
 0x133   :  { %v7330_v52 = vpop.f32.mrf.mxu2  ;;  %v7355_v9 = vpop.f32.mrf.mxu0  ;;  %2564 = vmatpush.bf16.msra.mxu3 %v5631_v59  ;;  %v5701_v59 = vld [vmem:[%s8257_s3 + $0x30] sm:$0xf] }
 0x134   :  { %v7338_v4 = vpop.f32.mrf.mxu3  ;;  %v7360_v12 = vpop.f32.mrf.mxu1 }
 0x135   :  { %2522 = vmatpush.bf16.msra.mxu0 %v5531_v62  ;;  %v6807_v62 = vld [vmem:[%s8257_s3 + $0x208] sm:$0xf0] }
 0x136   :  { %v5599_v0 = vor.u32 %v6807_v62, %v5598_v53  ;;  %v5659_v53 = vor.u32 %v6822_v5, %v5658_v50  ;;  %v6749_v62 = vld [vmem:[%s8257_s3 + $0x38] sm:$0xf0] }
 0x137   :  { %2565 = vmatpush.bf16.msra.mxu3 %v5619_v10  ;;  %v5702_v56 = vor.u32 %v6749_v62, %v5701_v59  ;;  %v6819_v10 = vld [vmem:[%s8257_s3 + $0x268] sm:$0xf0]  ;;  %v6813_v50 = vld [vmem:[%s8257_s3 + $0x238] sm:$0xf0]  ;;  %v6786_v59 = vld [vmem:[%s8257_s3 + $0x160] sm:$0xf0] }
 0x138   :  { %2573 = vmatpush.bf16.msrb.mxu1 %v5599_v0  ;;  %v5797_v0 = vld [vmem:[%s8257_s3 + $0xf0] sm:$0xf]  ;;  %v5647_v14 = vor.u32 %v6819_v10, %v5646_v6 }
 0x139   :  { %2523 = vmatpush.bf16.msra.mxu0 %v5519_v13  ;;  %v5834_v13 = vor.u32 %v6782_v63, %v5833_v49  ;;  %v5798_v49 = vor.u32 %v6773_v3, %v5797_v0  ;;  %v6795_v63 = vld [vmem:[%s8257_s3 + $0x1a8] sm:$0xf0]  ;;  %v5610_v0 = vld [vmem:[%s8257_s3 + $0x218] sm:$0xf] }
 0x13b   :  { %v7413_v37 = vpop.f32.mrf.mxu2  ;;  %2853 = vmatpush.bf16.msrb.mxu2 %v5834_v13  ;;  %2566 = vmatpush.bf16.msra.mxu3 %v5607_v26  ;;  %v6816_v26 = vld [vmem:[%s8257_s3 + $0x250] sm:$0xf0] }
 0x13c   :  { %v7424_v45 = vpop.f32.mrf.mxu3  ;;  %2574 = vmatpush.bf16.msrb.mxu1 %v5587_v24  ;;  %v6746_v24 = vld [vmem:[%s8257_s3 + $0x20] sm:$0xf0] }
 0x13d   :  { %2524 = vmatpush.bf16.msra.mxu0 %v5507_v20  ;;  %v6779_v20 = vld [vmem:[%s8257_s3 + $0x128] sm:$0xf0]  ;;  %v5690_v16 = vor.u32 %v6746_v24, %v5689_v21  ;;  %v1338_v21 = vadd.f32 %v7360_v12, %v7355_v9 }
 0x13e   :  { %v5822_v25 = vor.u32 %v6779_v20, %v5821_v29  ;;  %v6770_v29 = vld [vmem:[%s8257_s3 + $0xe0] sm:$0xf0]  ;;  %v5538_v20 = vld [vmem:[%s8257_s3 + $0x188] sm:$0xf] }
 0x13f   :  { %2589 = vmatpush.bf16.msrb.mxu3 %v5671_v34 }
 0x140   :  { %2854 = vmatpush.bf16.msrb.mxu2 %v5822_v25  ;;  %v5539_v25 = vor.u32 %v6792_v2, %v5538_v20  ;;  %v2160_v2 = vld [vmem:[%s8256_s2] sm:$0x3] }
 0x141   :  { %2837 = vmatpush.bf16.msrb.mxu0 %v5762_v28  ;;  %v6801_v28 = vld [vmem:[%s8257_s3 + $0x1d8] sm:$0xf0] }
 0x142   :  { %v5575_v32 = vor.u32 %v6801_v28, %v5574_v27  ;;  %v5635_v27 = vor.u32 %v6816_v26, %v5634_v7  ;;  %v5677_v28 = vld [vmem:[%s8257_s3] sm:$0xf]  ;;  %v1366_v26 = vadd.f32 %v7424_v45, %v7413_v37 }
 0x143   :  { %2590 = vmatpush.bf16.msrb.mxu3 %v5659_v53  ;;  %v5678_v34 = vor.u32 %v6743_v30, %v5677_v28  ;;  %v5514_v53 = vld [vmem:[%s8257_s3 + $0x158] sm:$0xf]  ;;  %v2162_v30 = vperm.slane %v2160_v2, 0 }
 0x144   :  { %2575 = vmatpush.bf16.msrb.mxu1 %v5575_v32  ;;  %2855 = vmatpush.bf16.msrb.mxu2 %v5810_v43  ;;  %v5773_v32 = vld [vmem:[%s8257_s3 + $0xc0] sm:$0xf]  ;;  %v5622_v43 = vld [vmem:[%s8257_s3 + $0x230] sm:$0xf]  ;;  %v5515_v62 = vor.u32 %v6786_v59, %v5514_v53 }
 0x145   :  { %2838 = vmatpush.bf16.msrb.mxu0 %v5750_v48  ;;  %v6798_v48 = vld [vmem:[%s8257_s3 + $0x1c0] sm:$0xf0]  ;;  %v5774_v36 = vor.u32 %v6767_v35, %v5773_v32  ;;  %v5623_v5 = vor.u32 %v6813_v50, %v5622_v43 }
 0x146   :  { %v5563_v51 = vor.u32 %v6798_v48, %v5562_v44 }
 0x147   :  { %2591 = vmatpush.bf16.msrb.mxu3 %v5647_v14  ;;  %v1336_v14 = vadd.f32 %v7298_v40, %v7296_v38 }
 0x148   :  { %2576 = vmatpush.bf16.msrb.mxu1 %v5563_v51  ;;  %2856 = vmatpush.bf16.msrb.mxu2 %v5798_v49 }
 0x149   :  { %2839 = vmatpush.bf16.msrb.mxu0 %v5738_v57  ;;  %v5550_v57 = vld [vmem:[%s8257_s3 + $0x1a0] sm:$0xf] }
 0x14a   :  { %v5551_v13 = vor.u32 %v6795_v63, %v5550_v57 }
 0x14b   :  { %v7426_v47 = vpop.f32.mrf.mxu0  ;;  %2592 = vmatpush.bf16.msrb.mxu3 %v5635_v27 }
 0x14c   :  { %v7437_v54 = vpop.f32.mrf.mxu1  ;;  %2577 = vmatpush.bf16.msrb.mxu1 %v5551_v13 }
 0x14d   :  { %2840 = vmatpush.bf16.msrb.mxu0 %v5726_v19  ;;  %v5786_v19 = vor.u32 %v6770_v29, %v5785_v18  ;;  %v1589_v57 = vadd.f32 %v7437_v54, %v7426_v47 }
 0x14f   :  { %2857 = vmatpush.bf16.msrb.mxu2 %v5786_v19  ;;  %2593 = vmatpush.bf16.msrb.mxu3 %v5623_v5  ;;  %v1621_v24 = vrot.slane %v1589_v57, 1  ;;  %v5841_v5 = vld [vmem:[%s8257_s3 + $0x140] sm:$0xf]  ;;  %v2163_v57 = vperm.slane %v2160_v2, 1 }
 0x150   :  { %2578 = vmatpush.bf16.msrb.mxu1 %v5539_v25 }
 0x151   :  { %2841 = vmatpush.bf16.msrb.mxu0 %v5714_v39  ;;  %v5526_v39 = vld [vmem:[%s8257_s3 + $0x170] sm:$0xf] }
 0x152   :  { %v5527_v48 = vor.u32 %v6789_v42, %v5526_v39  ;;  %v1371_v42 = vadd.f32 %v1366_v26, %v7252_v46  ;;  %v6783_v46 = vld [vmem:[%s8257_s3 + $0x148] sm:$0xf0] }
 0x153   :  { %v7472_v22 = vpop.f32.mrf.mxu2  ;;  %v7494_v23 = vpop.f32.mrf.mxu0  ;;  %2858 = vmatpush.bf16.msrb.mxu2 %v5774_v36 }
 0x154   :  { %v7474_v15 = vpop.f32.mrf.mxu3  ;;  %v7505_v31 = vpop.f32.mrf.mxu1  ;;  %2579 = vmatpush.bf16.msrb.mxu1 %v5527_v48 }
 0x155   :  { %2842 = vmatpush.bf16.msrb.mxu0 %v5702_v56  ;;  %v6810_v56 = vld [vmem:[%s8257_s3 + $0x220] sm:$0xf0]  ;;  %v1591_v63 = vadd.f32 %v7505_v31, %v7494_v23  ;;  %v1617_v18 = vadd.f32 %v7474_v15, %v7472_v22  ;;  %v1368_v23 = vadd.f32 %v1336_v14, %v7240_v61  ;;  %v1370_v31 = vadd.f32 %v1338_v21, %v7242_v11 }
 0x156   :  { %v5611_v3 = vor.u32 %v6810_v56, %v5610_v0  ;;  %v1364_v61 = vadd.f32 %v7338_v4, %v7330_v52 }
 0x157   :  { %v1622_v19 = vrot.slane %v1617_v18, 1  ;;  %v6780_v18 = vld [vmem:[%s8257_s3 + $0x130] sm:$0xf0] }
 0x158   :  { %2580 = vmatpush.bf16.msrb.mxu1 %v5515_v62  ;;  %2594 = vmatpush.bf16.msrb.mxu3 %v5611_v3  ;;  %v1369_v52 = vadd.f32 %v1364_v61, %v7250_v17 }
 0x159   :  { %2843 = vmatpush.bf16.msrb.mxu0 %v5690_v16  ;;  %v1623_v16 = vrot.slane %v1591_v63, 1 }
 0x15b   :  { %v7543_v1 = vpop.f32.mrf.mxu2  ;;  %v1625_v38 = vsel %vm358_vm0, %v1621_v24, %v1623_v16  ;;  %v1627_v40 = vsel %vm358_vm0, %v1623_v16, %v1621_v24  ;;  %v5829_v16 = vld [vmem:[%s8257_s3 + $0x128] sm:$0xf] }
 0x15c   :  { %v7548_v8 = vpop.f32.mrf.mxu3  ;;  %v1629_v7 = vadd.f32 %v1625_v38, %v1368_v23  ;;  %v1631_v25 = vadd.f32 %v1627_v40, %v1370_v31  ;;  %v6763_v23 = vld [vmem:[%s8257_s3 + $0xac] sm:$0xf]  ;;  %v5763_v31 = vld [vmem:[%s8257_s3 + $0xb4] sm:$0xf0] }
 0x15d   :  { %2844 = vmatpush.bf16.msrb.mxu0 %v5678_v34  ;;  %v1619_v47 = vadd.f32 %v7548_v8, %v7543_v1 }
 0x15f   :  { %v1624_v20 = vrot.slane %v1619_v47, 1 }
 0x161   :  { %v1628_v37 = vsel %vm358_vm0, %v1624_v20, %v1622_v19 }
 0x162   :  { %v1632_v59 = vadd.f32 %v1628_v37, %v1371_v42  ;;  %v6775_v42 = vld [vmem:[%s8257_s3 + $0x10c] sm:$0xf] }
 0x16b   :  { %v7550_v41 = vpop.f32.mrf.mxu0 }
 0x16c   :  { %v7561_v55 = vpop.f32.mrf.mxu1 }
 0x16d   :  { %v1863_v22 = vadd.f32 %v7561_v55, %v7550_v41  ;;  %v1626_v41 = vsel %vm358_vm0, %v1622_v19, %v1624_v20  ;;  %v5835_v19 = vld [vmem:[%s8257_s3 + $0x144] sm:$0xf0]  ;;  %v5745_v20 = vld [vmem:[%s8257_s3 + $0x80] sm:$0xf] }
 0x16e   :  { %v1630_v43 = vadd.f32 %v1626_v41, %v1369_v52  ;;  %v6778_v41 = vld [vmem:[%s8257_s3 + $0x124] sm:$0xf]  ;;  %v6756_v52 = vld [vmem:[%s8257_s3 + $0x70] sm:$0xf0] }
 0x16f   :  { %v1895_v28 = vadd.f32 %v1863_v22, %v1629_v7  ;;  %v6759_v22 = vld [vmem:[%s8257_s3 + $0x88] sm:$0xf0]  ;;  %v6760_v7 = vld [vmem:[%s8257_s3 + $0x94] sm:$0xf] }
 0x173   :  { %v7599_v33 = vpop.f32.mrf.mxu2  ;;  %v1850_v44 = vpop.f32.mrf.mxu0 }
 0x174   :  { %v1890_v58 = vpop.f32.mrf.mxu3  ;;  %v1864_v51 = vpop.f32.mrf.mxu1 }
 0x175   :  { %v1865_v15 = vadd.f32 %v1864_v51, %v1850_v44  ;;  %v1891_v4 = vadd.f32 %v1890_v58, %v7599_v33  ;;  %v5769_v33 = vld [vmem:[%s8257_s3 + $0xb0] sm:$0xf]  ;;  %v6765_v51 = vld [vmem:[%s8257_s3 + $0xb8] sm:$0xf0] }
 0x176   :  { %v5770_v63 = vor.u32 %v6765_v51, %v5769_v33  ;;  %v5793_v33 = vld [vmem:[%s8257_s3 + $0xe0] sm:$0xf]  ;;  %v6754_v51 = vld [vmem:[%s8257_s3 + $0x64] sm:$0xf] }
 0x177   :  { %v1897_v55 = vadd.f32 %v1865_v15, %v1631_v25  ;;  %v1896_v53 = vadd.f32 %v1891_v4, %v1630_v43  ;;  %v5817_v15 = vld [vmem:[%s8257_s3 + $0x110] sm:$0xf]  ;;  %v5751_v25 = vld [vmem:[%s8257_s3 + $0x9c] sm:$0xf0]  ;;  %v5805_v4 = vld [vmem:[%s8257_s3 + $0xf8] sm:$0xf] }
 0x178   :  { %v5811_v43 = vld [vmem:[%s8257_s3 + $0x114] sm:$0xf0] }
 0x17b   :  { %v1878_v49 = vpop.f32.mrf.mxu2 }
 0x17c   :  { %v1892_v6 = vpop.f32.mrf.mxu3 }
 0x17d   :  { %v1893_v44 = vadd.f32 %v1892_v6, %v1878_v49  ;;  %v5842_v6 = vor.u32 %v6783_v46, %v5841_v5  ;;  %v5727_v5 = vld [vmem:[%s8257_s3 + $0x6c] sm:$0xf0]  ;;  %v6772_v46 = vld [vmem:[%s8257_s3 + $0xf4] sm:$0xf] }
 0x17f   :  { %v1898_v49 = vadd.f32 %v1893_v44, %v1632_v59  ;;  %v5721_v44 = vld [vmem:[%s8257_s3 + $0x50] sm:$0xf] }
 0x18b   :  { %v2101_v13 = vpop.f32.mrf.mxu0 }
 0x18c   :  { %v2115_v10 = vpop.f32.mrf.mxu1 }
 0x18d   :  { %v2116_v54 = vadd.f32 %v2115_v10, %v2101_v13  ;;  %v5757_v13 = vld [vmem:[%s8257_s3 + $0x98] sm:$0xf]  ;;  %v6762_v10 = vld [vmem:[%s8257_s3 + $0xa0] sm:$0xf0] }
 0x18f   :  { %v2148_v8 = vrot.slane %v2116_v54, 1 }
 0x193   :  { %v2129_v29 = vpop.f32.mrf.mxu2  ;;  %v2103_v12 = vpop.f32.mrf.mxu0 }
 0x194   :  { %v2143_v9 = vpop.f32.mrf.mxu3  ;;  %v2117_v1 = vpop.f32.mrf.mxu1 }
 0x195   :  { %v2118_v11 = vadd.f32 %v2117_v1, %v2103_v12  ;;  %v2144_v45 = vadd.f32 %v2143_v9, %v2129_v29  ;;  %v5758_v29 = vor.u32 %v6762_v10, %v5757_v13  ;;  %v5830_v9 = vor.u32 %v6780_v18, %v5829_v16  ;;  %v6781_v12 = vld [vmem:[%s8257_s3 + $0x13c] sm:$0xf]  ;;  %v5990_v13 = vld [vmem:[%s8257_s3 + $0x354] sm:$0xf0]  ;;  %v6751_v18 = vld [vmem:[%s8257_s3 + $0x4c] sm:$0xf] }
 0x196   :  { %v6777_v1 = vld [vmem:[%s8257_s3 + $0x118] sm:$0xf0]  ;;  %v5838_v2 = vor.u32 %v6781_v12, %v5835_v19  ;;  %v6748_v12 = vld [vmem:[%s8257_s3 + $0x34] sm:$0xf]  ;;  %v6766_v19 = vld [vmem:[%s8257_s3 + $0xc4] sm:$0xf] }
 0x197   :  { %v2150_v27 = vrot.slane %v2118_v11, 1  ;;  %v2149_v62 = vrot.slane %v2144_v45, 1  ;;  %v5766_v11 = vor.u32 %v6763_v23, %v5763_v31  ;;  %v6757_v45 = vld [vmem:[%s8257_s3 + $0x7c] sm:$0xf]  ;;  %v6747_v23 = vld [vmem:[%s8257_s3 + $0x28] sm:$0xf0] }
 0x198   :  { %v6769_v10 = vld [vmem:[%s8257_s3 + $0xdc] sm:$0xf] }
 0x199   :  { %v2152_v32 = vsel %vm358_vm0, %v2148_v8, %v2150_v27  ;;  %v2154_v34 = vsel %vm358_vm0, %v2150_v27, %v2148_v8  ;;  %v5746_v27 = vor.u32 %v6759_v22, %v5745_v20  ;;  %v5775_v20 = vld [vmem:[%s8257_s3 + $0xcc] sm:$0xf0] }
 0x19a   :  { %v2156_v35 = vadd.f32 %v2152_v32, %v1895_v28  ;;  %v2158_v36 = vadd.f32 %v2154_v34, %v1897_v55  ;;  %v5818_v28 = vor.u32 %v6777_v1, %v5817_v15  ;;  %v5823_v55 = vld [vmem:[%s8257_s3 + $0x12c] sm:$0xf0]  ;;  %v6774_v32 = vld [vmem:[%s8257_s3 + $0x100] sm:$0xf0]  ;;  %v5754_v34 = vor.u32 %v6760_v7, %v5751_v25  ;;  %v5703_v15 = vld [vmem:[%s8257_s3 + $0x3c] sm:$0xf0] }
 0x19b   :  { %v2131_v39 = vpop.f32.mrf.mxu2  ;;  %v5826_v37 = vor.u32 %v6778_v41, %v5823_v55  ;;  %v5988_v1 = vld [vmem:[%s8257_s3 + $0x348] sm:$0xf]  ;;  %v6841_v7 = vld [vmem:[%s8257_s3 + $0x31c] sm:$0xf]  ;;  %v5778_v25 = vor.u32 %v6766_v19, %v5775_v20  ;;  %v5706_v55 = vor.u32 %v6748_v12, %v5703_v15  ;;  %v6860_v19 = vld [vmem:[%s8257_s3 + $0x3b0] sm:$0xf0] }
 0x19c   :  { %v2145_v17 = vpop.f32.mrf.mxu3  ;;  %v2166_v58 = vadd.f32 %v2162_v30, %v2156_v35  ;;  %v2168_v48 = vadd.f32 %v2162_v30, %v2158_v36  ;;  %v5733_v30 = vld [vmem:[%s8257_s3 + $0x68] sm:$0xf]  ;;  %v5806_v36 = vor.u32 %v6774_v32, %v5805_v4  ;;  %v6829_v20 = vld [vmem:[%s8257_s3 + $0x2bc] sm:$0xf] }
 0x19d   :  { %v2146_v50 = vadd.f32 %v2145_v17, %v2131_v39  ;;  %v5734_v35 = vor.u32 %v6756_v52, %v5733_v30  ;;  %v5739_v39 = vld [vmem:[%s8257_s3 + $0x84] sm:$0xf0]  ;;  %v6753_v17 = vld [vmem:[%s8257_s3 + $0x58] sm:$0xf0] }
 0x19e   :  { %v2170_v0 = vmax.f32 %v2166_v58, 0.0  ;;  %v2172_v56 = vmax.f32 %v2168_v48, 0.0  ;;  %v6771_v58 = vld [vmem:[%s8257_s3 + $0xe8] sm:$0xf0]  ;;  %v5742_v48 = vor.u32 %v6757_v45, %v5739_v39  ;;  %v5722_v59 = vor.u32 %v6753_v17, %v5721_v44  ;;  %v6062_v41 = vld [vmem:[%s8257_s3 + $0x3e4] sm:$0xf0] }
 0x19f   :  { %v2151_v3 = vrot.slane %v2146_v50, 1  ;;  %v5814_v50 = vor.u32 %v6775_v42, %v5811_v43  ;;  %v6745_v52 = vld [vmem:[%s8257_s3 + $0x1c] sm:$0xf]  ;;  %v5691_v32 = vld [vmem:[%s8257_s3 + $0x24] sm:$0xf0] }
 0x1a0   :  { %v7684_v14 = vpack.c.bf16 %v2172_v56, %v2170_v0  ;;  %v5709_v0 = vld [vmem:[%s8257_s3 + $0x38] sm:$0xf]  ;;  %v6750_v56 = vld [vmem:[%s8257_s3 + $0x40] sm:$0xf0]  ;;  %v5954_v39 = vld [vmem:[%s8257_s3 + $0x30c] sm:$0xf0]  ;;  %v5694_v44 = vor.u32 %v6745_v52, %v5691_v32 }
 0x1a1   :  { %v2153_v21 = vsel %vm358_vm0, %v2149_v62, %v2151_v3  ;;  %v2155_v24 = vsel %vm358_vm0, %v2151_v3, %v2149_v62  ;;  %v5794_v62 = vor.u32 %v6771_v58, %v5793_v33  ;;  %v5781_v3 = vld [vmem:[%s8257_s3 + $0xc8] sm:$0xf]  ;;  %v6862_v42 = vld [vmem:[%s8257_s3 + $0x3c4] sm:$0xf]  ;;  %v6050_v43 = vld [vmem:[%s8257_s3 + $0x3cc] sm:$0xf0] }
 0x1a2   :  { %v2157_v47 = vadd.f32 %v2153_v21, %v1896_v53  ;;  %v2159_v54 = vadd.f32 %v2155_v24, %v1898_v49  ;;  %2525 = vmatmul.bf16.vlgmr.msra.gmra.mxu0 %v7684_v14  ;;  %2553 = vmatmul.bf16.vlgmr.msra.gmra.mxu2 %v7684_v14  ;;  %v5799_v53 = vld [vmem:[%s8257_s3 + $0xfc] sm:$0xf0]  ;;  %v6768_v49 = vld [vmem:[%s8257_s3 + $0xd0] sm:$0xf0]  ;;  %v5787_v21 = vld [vmem:[%s8257_s3 + $0xe4] sm:$0xf0]  ;;  %v5710_v24 = vor.u32 %v6750_v56, %v5709_v0 }
 0x1a3   :  { %2893 = vmatpush.bf16.msra.mxu2 %v5770_v63  ;;  %2909 = vmatpush.bf16.msra.mxu0 %v5842_v6  ;;  %v5802_v63 = vor.u32 %v6772_v46, %v5799_v53  ;;  %v6847_v6 = vld [vmem:[%s8257_s3 + $0x34c] sm:$0xf]  ;;  %v5782_v16 = vor.u32 %v6768_v49, %v5781_v3  ;;  %v5790_v31 = vor.u32 %v6769_v10, %v5787_v21  ;;  %v6742_v33 = vld [vmem:[%s8257_s3 + $0x4] sm:$0xf]  ;;  %v5679_v58 = vld [vmem:[%s8257_s3 + $0xc] sm:$0xf0] }
 0x1a4   :  { %v2167_v38 = vadd.f32 %v2163_v57, %v2157_v47  ;;  %v2169_v40 = vadd.f32 %v2163_v57, %v2159_v54  ;;  %v5730_v57 = vor.u32 %v6754_v51, %v5727_v5  ;;  %v5715_v47 = vld [vmem:[%s8257_s3 + $0x54] sm:$0xf0]  ;;  %v5993_v54 = vor.u32 %v6847_v6, %v5990_v13  ;;  %v6866_v53 = vld [vmem:[%s8257_s3 + $0x3e0] sm:$0xf0]  ;;  %v6859_v0 = vld [vmem:[%s8257_s3 + $0x3ac] sm:$0xf] }
 0x1a5   :  { %v6053_v5 = vor.u32 %v6862_v42, %v6050_v43  ;;  %v6060_v46 = vld [vmem:[%s8257_s3 + $0x3d8] sm:$0xf]  ;;  %v5682_v3 = vor.u32 %v6742_v33, %v5679_v58  ;;  %v6839_v6 = vld [vmem:[%s8257_s3 + $0x308] sm:$0xf0]  ;;  %v6048_v21 = vld [vmem:[%s8257_s3 + $0x3c0] sm:$0xf] }
 0x1a6   :  { %v2171_v61 = vmax.f32 %v2167_v38, 0.0  ;;  %v2173_v8 = vmax.f32 %v2169_v40, 0.0  ;;  %v6844_v38 = vld [vmem:[%s8257_s3 + $0x334] sm:$0xf]  ;;  %v5978_v40 = vld [vmem:[%s8257_s3 + $0x33c] sm:$0xf0] }
 0x1a7   :  { %2894 = vmatpush.bf16.msra.mxu2 %v5758_v29  ;;  %2910 = vmatpush.bf16.msra.mxu0 %v5830_v9  ;;  %v5697_v29 = vld [vmem:[%s8257_s3 + $0x20] sm:$0xf]  ;;  %v5718_v9 = vor.u32 %v6751_v18, %v5715_v47  ;;  %v6038_v56 = vld [vmem:[%s8257_s3 + $0x3b4] sm:$0xf0]  ;;  %v6856_v47 = vld [vmem:[%s8257_s3 + $0x394] sm:$0xf] }
 0x1a8   :  { %v7728_v26 = vpack.c.bf16 %v2173_v8, %v2171_v61  ;;  %v5698_v22 = vor.u32 %v6747_v23, %v5697_v29  ;;  %v6848_v61 = vld [vmem:[%s8257_s3 + $0x350] sm:$0xf0]  ;;  %v5981_v8 = vor.u32 %v6844_v38, %v5978_v40  ;;  %v6041_v10 = vor.u32 %v6859_v0, %v6038_v56  ;;  %v5930_v18 = vld [vmem:[%s8257_s3 + $0x2dc] sm:$0xf0]  ;;  %v6036_v12 = vld [vmem:[%s8257_s3 + $0x3a8] sm:$0xf] }
 0x1a9   :  { %v5989_v30 = vor.u32 %v6848_v61, %v5988_v1  ;;  %v6836_v38 = vld [vmem:[%s8257_s3 + $0x2f0] sm:$0xf0]  ;;  %v6853_v15 = vld [vmem:[%s8257_s3 + $0x37c] sm:$0xf]  ;;  %v6014_v1 = vld [vmem:[%s8257_s3 + $0x384] sm:$0xf0] }
 0x1aa   :  { %5672 = vmatmul.msk.bf16.vlgmr.msra.gmra.mxu1 %vm2513_vm1, %v7728_v26  ;;  %5673 = vmatmul.msk.bf16.vlgmr.msra.gmra.mxu3 %vm2513_vm1, %v7728_v26  ;;  %v6002_v52 = vld [vmem:[%s8257_s3 + $0x36c] sm:$0xf0]  ;;  %v6000_v33 = vld [vmem:[%s8257_s3 + $0x360] sm:$0xf]  ;;  %v6851_v58 = vld [vmem:[%s8257_s3 + $0x368] sm:$0xf0] }
 0x1ab   :  { %2865 = vmatpush.bf16.msra.mxu3 %v5766_v11  ;;  %2881 = vmatpush.bf16.msra.mxu1 %v5838_v2  ;;  %v5685_v11 = vld [vmem:[%s8257_s3 + $0x8] sm:$0xf]  ;;  %v6744_v2 = vld [vmem:[%s8257_s3 + $0x10] sm:$0xf0] }
 0x1ac   :  { %2895 = vmatpush.bf16.msra.mxu2 %v5746_v27  ;;  %2911 = vmatpush.bf16.msra.mxu0 %v5818_v28  ;;  %v5966_v27 = vld [vmem:[%s8257_s3 + $0x324] sm:$0xf0]  ;;  %v6865_v28 = vld [vmem:[%s8257_s3 + $0x3dc] sm:$0xf]  ;;  %v5686_v4 = vor.u32 %v6744_v2, %v5685_v11  ;;  %v5928_v11 = vld [vmem:[%s8257_s3 + $0x2d0] sm:$0xf] }
 0x1ad   :  { %v5969_v45 = vor.u32 %v6841_v7, %v5966_v27  ;;  %v6833_v2 = vld [vmem:[%s8257_s3 + $0x2d8] sm:$0xf0]  ;;  %v6024_v27 = vld [vmem:[%s8257_s3 + $0x390] sm:$0xf]  ;;  %v6056_v0 = vld [vmem:[%s8257_s3 + $0x3c8] sm:$0xf] }
 0x1ae   :  { %v6864_v56 = vld [vmem:[%s8257_s3 + $0x3d0] sm:$0xf0] }
 0x1af   :  { %2866 = vmatpush.bf16.msra.mxu3 %v5754_v34  ;;  %2882 = vmatpush.bf16.msra.mxu1 %v5826_v37  ;;  %v5976_v34 = vld [vmem:[%s8257_s3 + $0x330] sm:$0xf]  ;;  %v6845_v37 = vld [vmem:[%s8257_s3 + $0x338] sm:$0xf0] }
 0x1b0   :  { %2896 = vmatpush.bf16.msra.mxu2 %v5734_v35  ;;  %2912 = vmatpush.bf16.msra.mxu0 %v5806_v36  ;;  %v6065_v35 = vor.u32 %v6865_v28, %v6062_v41  ;;  %v6838_v36 = vld [vmem:[%s8257_s3 + $0x304] sm:$0xf]  ;;  %v5977_v17 = vor.u32 %v6845_v37, %v5976_v34  ;;  %v6857_v28 = vld [vmem:[%s8257_s3 + $0x398] sm:$0xf0]  ;;  %v5916_v34 = vld [vmem:[%s8257_s3 + $0x2b8] sm:$0xf] }
 0x1b1   :  { %v5957_v51 = vor.u32 %v6838_v36, %v5954_v39  ;;  %v6826_v41 = vld [vmem:[%s8257_s3 + $0x2a4] sm:$0xf]  ;;  %v6025_v32 = vor.u32 %v6857_v28, %v6024_v27  ;;  %v6012_v36 = vld [vmem:[%s8257_s3 + $0x378] sm:$0xf]  ;;  %v5912_v27 = vld [vmem:[%s8257_s3 + $0x2a8] sm:$0xf] }
 0x1b2   :  { %2845 = vmatmul.bf16.vlgmr.msrb.gmra.mxu0 %v7684_v14  ;;  %5843 = vmatmul.msk.bf16.vlgmr.msrb.gmra.mxu2 %vm2513_vm1, %v7728_v26  ;;  %v6830_v37 = vld [vmem:[%s8257_s3 + $0x2c0] sm:$0xf0]  ;;  %v6828_v28 = vld [vmem:[%s8257_s3 + $0x2b0] sm:$0xf0] }
 0x1b3   :  { %2867 = vmatpush.bf16.msra.mxu3 %v5742_v48  ;;  %2883 = vmatpush.bf16.msra.mxu1 %v5814_v50  ;;  %v5964_v48 = vld [vmem:[%s8257_s3 + $0x318] sm:$0xf]  ;;  %v6842_v50 = vld [vmem:[%s8257_s3 + $0x320] sm:$0xf0]  ;;  %v5917_v42 = vor.u32 %v6830_v37, %v5916_v34 }
 0x1b4   :  { %2897 = vmatpush.bf16.msra.mxu2 %v5722_v59  ;;  %2913 = vmatpush.bf16.msra.mxu0 %v5794_v62  ;;  %v6835_v59 = vld [vmem:[%s8257_s3 + $0x2ec] sm:$0xf]  ;;  %v5942_v62 = vld [vmem:[%s8257_s3 + $0x2f4] sm:$0xf0]  ;;  %v5965_v49 = vor.u32 %v6842_v50, %v5964_v48  ;;  %v6854_v39 = vld [vmem:[%s8257_s3 + $0x380] sm:$0xf0] }
 0x1b5   :  { %v5945_v13 = vor.u32 %v6835_v59, %v5942_v62  ;;  %v6013_v43 = vor.u32 %v6854_v39, %v6012_v36  ;;  %v6068_v48 = vld [vmem:[%s8257_s3 + $0x3e0] sm:$0xf]  ;;  %v6867_v50 = vld [vmem:[%s8257_s3 + $0x3e8] sm:$0xf0]  ;;  %v6903_v36 = vld [vmem:[#allocation4 + $0x118] sm:$0xff] }
 0x1b6   :  { %v6069_v59 = vor.u32 %v6867_v50, %v6068_v48  ;;  %v6892_v37 = vld [vmem:[#allocation4 + $0xc0] sm:$0xff]  ;;  %v6875_v50 = vld [vmem:[#allocation4 + $0x38] sm:$0xff] }
 0x1b7   :  { %2868 = vmatpush.bf16.msra.mxu3 %v5730_v57  ;;  %2884 = vmatpush.bf16.msra.mxu1 %v5802_v63  ;;  %v6061_v57 = vor.u32 %v6866_v53, %v6060_v46  ;;  %v5952_v63 = vld [vmem:[%s8257_s3 + $0x300] sm:$0xf]  ;;  %v6001_v53 = vor.u32 %v6851_v58, %v6000_v33  ;;  %v6889_v33 = vld [vmem:[#allocation4 + $0xa8] sm:$0xff] }
 0x1b8   :  { %2898 = vmatpush.bf16.msra.mxu2 %v5710_v24  ;;  %2914 = vmatpush.bf16.msra.mxu0 %v5782_v16  ;;  %v6863_v24 = vld [vmem:[%s8257_s3 + $0x3c8] sm:$0xf0]  ;;  %v6832_v16 = vld [vmem:[%s8257_s3 + $0x2d4] sm:$0xf]  ;;  %v5953_v29 = vor.u32 %v6839_v6, %v5952_v63  ;;  %v6044_v6 = vld [vmem:[%s8257_s3 + $0x3b0] sm:$0xf] }
 0x1b9   :  { %v6049_v23 = vor.u32 %v6863_v24, %v6048_v21  ;;  %v5933_v40 = vor.u32 %v6832_v16, %v5930_v18  ;;  %v6843_v21 = vld [vmem:[%s8257_s3 + $0x328] sm:$0xf0]  ;;  %v6032_v18 = vld [vmem:[%s8257_s3 + $0x398] sm:$0xf] }
 0x1ba   :  { %2581 = vmatmul.bf16.vlgmr.msrb.gmra.mxu1 %v7684_v14  ;;  %5674 = vmatmul.msk.bf16.vlgmr.msrb.gmra.mxu3 %vm2513_vm1, %v7728_v26  ;;  %v6901_v58 = vld [vmem:[#allocation4 + $0x108] sm:$0xff] }
 0x1bb   :  { %2885 = vmatpush.bf16.msra.mxu1 %v5790_v31  ;;  %2869 = vmatpush.bf16.msra.mxu3 %v5718_v9  ;;  %v5940_v31 = vld [vmem:[%s8257_s3 + $0x2e8] sm:$0xf] }
 0x1bc   :  { %3230 = vmatpush.bf16.msrb.mxu0 %v5993_v54  ;;  %2899 = vmatpush.bf16.msra.mxu2 %v5698_v22  ;;  %v6026_v54 = vld [vmem:[%s8257_s3 + $0x39c] sm:$0xf0]  ;;  %v5918_v22 = vld [vmem:[%s8257_s3 + $0x2c4] sm:$0xf0]  ;;  %v5941_v61 = vor.u32 %v6836_v38, %v5940_v31 }
 0x1bd   :  { %v6029_v9 = vor.u32 %v6856_v47, %v6026_v54  ;;  %v5921_v7 = vor.u32 %v6829_v20, %v5918_v22  ;;  %v6858_v47 = vld [vmem:[%s8257_s3 + $0x3a0] sm:$0xf0]  ;;  %v5960_v54 = vld [vmem:[%s8257_s3 + $0x308] sm:$0xf]  ;;  %v6020_v38 = vld [vmem:[%s8257_s3 + $0x380] sm:$0xf] }
 0x1be   :  { %v6008_v22 = vld [vmem:[%s8257_s3 + $0x368] sm:$0xf] }
 0x1bf   :  { %2886 = vmatpush.bf16.msra.mxu1 %v5778_v25  ;;  %2870 = vmatpush.bf16.msra.mxu3 %v5706_v55  ;;  %v6017_v25 = vor.u32 %v6853_v15, %v6014_v1  ;;  %v5906_v55 = vld [vmem:[%s8257_s3 + $0x2ac] sm:$0xf0]  ;;  %v6852_v15 = vld [vmem:[%s8257_s3 + $0x370] sm:$0xf0]  ;;  %v5936_v1 = vld [vmem:[%s8257_s3 + $0x2d8] sm:$0xf] }
 0x1c0   :  { %3231 = vmatpush.bf16.msrb.mxu0 %v5981_v8  ;;  %2900 = vmatpush.bf16.msra.mxu2 %v5686_v4  ;;  %v6037_v8 = vor.u32 %v6860_v19, %v6036_v12  ;;  %v5929_v4 = vor.u32 %v6833_v2, %v5928_v11  ;;  %v6837_v12 = vld [vmem:[%s8257_s3 + $0x2f8] sm:$0xf0]  ;;  %v5924_v2 = vld [vmem:[%s8257_s3 + $0x2c0] sm:$0xf] }
 0x1c2   :  { %5845 = vmatmul.msk.bf16.vlgmr.msra.gmra.mxu0 %vm2513_vm1, %v7728_v26 }
 0x1c3   :  { %3202 = vmatpush.bf16.msrb.mxu1 %v5989_v30  ;;  %2871 = vmatpush.bf16.msra.mxu3 %v5694_v44  ;;  %v6850_v30 = vld [vmem:[%s8257_s3 + $0x364] sm:$0xf]  ;;  %v5904_v44 = vld [vmem:[%s8257_s3 + $0x2a0] sm:$0xf] }
 0x1c4   :  { %3232 = vmatpush.bf16.msrb.mxu0 %v5969_v45  ;;  %3246 = vmatpush.bf16.msrb.mxu2 %v6065_v35  ;;  %v5909_v45 = vor.u32 %v6826_v41, %v5906_v55  ;;  %v6005_v35 = vor.u32 %v6850_v30, %v6002_v52  ;;  %v5913_v41 = vor.u32 %v6828_v28, %v5912_v27  ;;  %v6895_v55 = vld [vmem:[#allocation4 + $0xd8] sm:$0xff]  ;;  %v6894_v52 = vld [vmem:[#allocation4 + $0xd0] sm:$0xff]  ;;  %v6904_v27 = vld [vmem:[#allocation4 + $0x120] sm:$0xff] }
 0x1c5   :  { %2901 = vmatmul.bf16.vlgmr.msra.gmra.mxu2 %v7684_v14  ;;  %v6876_v28 = vld [vmem:[#allocation4 + $0x40] sm:$0xff] }
 0x1c7   :  { %3203 = vmatpush.bf16.msrb.mxu1 %v5977_v17  ;;  %2872 = vmatpush.bf16.msra.mxu3 %v5682_v3  ;;  %v6827_v17 = vld [vmem:[%s8257_s3 + $0x2a8] sm:$0xf0]  ;;  %v5984_v3 = vld [vmem:[%s8257_s3 + $0x338] sm:$0xf] }
 0x1c8   :  { %3233 = vmatpush.bf16.msrb.mxu0 %v5957_v51  ;;  %3247 = vmatpush.bf16.msrb.mxu2 %v6053_v5  ;;  %v5996_v51 = vld [vmem:[%s8257_s3 + $0x350] sm:$0xf]  ;;  %v6849_v5 = vld [vmem:[%s8257_s3 + $0x358] sm:$0xf0]  ;;  %v5905_v46 = vor.u32 %v6827_v17, %v5904_v44 }
 0x1c9   :  { %v5997_v62 = vor.u32 %v6849_v5, %v5996_v51  ;;  %v6888_v51 = vld [vmem:[#allocation4 + $0xa0] sm:$0xff] }
 0x1ca   :  { %2873 = vmatmul.bf16.vlgmr.msra.gmra.mxu3 %v7684_v14  ;;  %5844 = vmatmul.msk.bf16.vlgmr.msra.gmra.mxu1 %vm2513_vm1, %v7728_v26  ;;  %v6900_v5 = vld [vmem:[#allocation4 + $0x100] sm:$0xff] }
 0x1cb   :  { %3204 = vmatpush.bf16.msrb.mxu1 %v5965_v49  ;;  %3218 = vmatpush.bf16.msrb.mxu3 %v6061_v57  ;;  %v6846_v49 = vld [vmem:[%s8257_s3 + $0x340] sm:$0xf0]  ;;  %v6057_v57 = vor.u32 %v6864_v56, %v6056_v0  ;;  %v6899_v0 = vld [vmem:[#allocation4 + $0xf8] sm:$0xff] }
 0x1cc   :  { %3234 = vmatpush.bf16.msrb.mxu0 %v5945_v13  ;;  %3248 = vmatpush.bf16.msrb.mxu2 %v6041_v10  ;;  %v5985_v63 = vor.u32 %v6846_v49, %v5984_v3  ;;  %v6861_v13 = vld [vmem:[%s8257_s3 + $0x3b8] sm:$0xf0]  ;;  %v5972_v10 = vld [vmem:[%s8257_s3 + $0x320] sm:$0xf]  ;;  %v6882_v49 = vld [vmem:[#allocation4 + $0x70] sm:$0xff] }
 0x1cd   :  { %v6045_v24 = vor.u32 %v6861_v13, %v6044_v6  ;;  %v5973_v16 = vor.u32 %v6843_v21, %v5972_v10  ;;  %v6898_v6 = vld [vmem:[#allocation4 + $0xf0] sm:$0xff]  ;;  %v6881_v13 = vld [vmem:[#allocation4 + $0x68] sm:$0xff]  ;;  %v6872_v10 = vld [vmem:[#allocation4 + $0x20] sm:$0xff] }
 0x1cf   :  { %3205 = vmatpush.bf16.msrb.mxu1 %v5953_v29  ;;  %3219 = vmatpush.bf16.msrb.mxu3 %v6049_v23  ;;  %v6840_v29 = vld [vmem:[%s8257_s3 + $0x310] sm:$0xf0]  ;;  %v6033_v23 = vor.u32 %v6858_v47, %v6032_v18  ;;  %v6880_v18 = vld [vmem:[#allocation4 + $0x60] sm:$0xff]  ;;  %v6871_v47 = vld [vmem:[#allocation4 + $0x18] sm:$0xff] }
 0x1d0   :  { %3235 = vmatpush.bf16.msrb.mxu0 %v5933_v40  ;;  %3249 = vmatpush.bf16.msrb.mxu2 %v6029_v9  ;;  %v5961_v31 = vor.u32 %v6840_v29, %v5960_v54  ;;  %v6855_v40 = vld [vmem:[%s8257_s3 + $0x388] sm:$0xf0]  ;;  %v5948_v9 = vld [vmem:[%s8257_s3 + $0x2f0] sm:$0xf]  ;;  %v6896_v29 = vld [vmem:[#allocation4 + $0xe0] sm:$0xff] }
 0x1d1   :  { %v6021_v19 = vor.u32 %v6855_v40, %v6020_v38  ;;  %v5949_v20 = vor.u32 %v6837_v12, %v5948_v9  ;;  %v6879_v38 = vld [vmem:[#allocation4 + $0x58] sm:$0xff]  ;;  %v6870_v9 = vld [vmem:[#allocation4 + $0x10] sm:$0xff] }
 0x1d2   :  { %v6887_v40 = vld [vmem:[#allocation4 + $0x98] sm:$0xff] }
 0x1d3   :  { %3206 = vmatpush.bf16.msrb.mxu1 %v5941_v61  ;;  %3220 = vmatpush.bf16.msrb.mxu3 %v6037_v8  ;;  %v6834_v61 = vld [vmem:[%s8257_s3 + $0x2e0] sm:$0xf0]  ;;  %v6009_v8 = vor.u32 %v6852_v15, %v6008_v22  ;;  %v6886_v22 = vld [vmem:[#allocation4 + $0x90] sm:$0xff]  ;;  %v6869_v15 = vld [vmem:[#allocation4 + $0x8] sm:$0xff] }
 0x1d4   :  { %3236 = vmatpush.bf16.msrb.mxu0 %v5921_v7  ;;  %3250 = vmatpush.bf16.msrb.mxu2 %v6017_v25  ;;  %v5937_v11 = vor.u32 %v6834_v61, %v5936_v1  ;;  %v6831_v7 = vld [vmem:[%s8257_s3 + $0x2c8] sm:$0xf0] }
 0x1d5   :  { %v5925_v25 = vor.u32 %v6831_v7, %v5924_v2  ;;  %v6885_v2 = vld [vmem:[#allocation4 + $0x88] sm:$0xff]  ;;  %v6868_v7 = vld [vmem:[#allocation4] sm:$0xff] }
 0x1d7   :  { %3207 = vmatpush.bf16.msrb.mxu1 %v5929_v4  ;;  %3221 = vmatpush.bf16.msrb.mxu3 %v6025_v32  ;;  %v6893_v32 = vld [vmem:[#allocation4 + $0xc8] sm:$0xff] }
 0x1d8   :  { %3237 = vmatpush.bf16.msrb.mxu0 %v5909_v45  ;;  %3251 = vmatpush.bf16.msrb.mxu2 %v6005_v35 }
 0x1db   :  { %3208 = vmatpush.bf16.msrb.mxu1 %v5917_v42  ;;  %3222 = vmatpush.bf16.msrb.mxu3 %v6013_v43  ;;  %v6890_v42 = vld [vmem:[#allocation4 + $0xb0] sm:$0xff] }
 0x1dc   :  { %3238 = vmatmul.bf16.vlgmr.msrb.gmra.mxu0 %v7684_v14  ;;  %6071 = vmatmul.msk.bf16.vlgmr.msrb.gmra.mxu2 %vm2513_vm1, %v7728_v26  ;;  %v6902_v43 = vld [vmem:[#allocation4 + $0x110] sm:$0xff] }
 0x1dd   :  { %3533 = vmatpush.bf16.msra.mxu2 %v6895_v55  ;;  %3547 = vmatpush.bf16.msra.mxu0 %v6903_v36  ;;  %v6915_v55 = vld [vmem:[#allocation4 + $0x178] sm:$0xff] }
 0x1df   :  { %3209 = vmatpush.bf16.msrb.mxu1 %v5905_v46  ;;  %3223 = vmatpush.bf16.msrb.mxu3 %v6001_v53  ;;  %v6883_v53 = vld [vmem:[#allocation4 + $0x78] sm:$0xff] }
 0x1e1   :  { %3534 = vmatpush.bf16.msra.mxu2 %v6894_v52  ;;  %3548 = vmatpush.bf16.msra.mxu0 %v6902_v43 }
 0x1e2   :  { %3210 = vmatmul.bf16.vlgmr.msrb.gmra.mxu1 %v7684_v14  ;;  %6070 = vmatmul.msk.bf16.vlgmr.msrb.gmra.mxu3 %vm2513_vm1, %v7728_v26 }
 0x1e3   :  { %3274 = vmatpush.bf16.msra.mxu1 %v6069_v59  ;;  %3258 = vmatpush.bf16.msra.mxu3 %v5997_v62  ;;  %v6874_v59 = vld [vmem:[#allocation4 + $0x30] sm:$0xff] }
 0x1e5   :  { %3535 = vmatpush.bf16.msra.mxu2 %v6893_v32  ;;  %3549 = vmatpush.bf16.msra.mxu0 %v6901_v58  ;;  %v6927_v32 = vld [vmem:[#allocation4 + $0x1d8] sm:$0xff] }
 0x1e7   :  { %3275 = vmatpush.bf16.msra.mxu1 %v6057_v57  ;;  %3259 = vmatpush.bf16.msra.mxu3 %v5985_v63  ;;  %v6873_v57 = vld [vmem:[#allocation4 + $0x28] sm:$0xff] }
 0x1e9   :  { %3536 = vmatpush.bf16.msra.mxu2 %v6892_v37  ;;  %3550 = vmatpush.bf16.msra.mxu0 %v6900_v5  ;;  %v6914_v37 = vld [vmem:[#allocation4 + $0x170] sm:$0xff]  ;;  %v6913_v5 = vld [vmem:[#allocation4 + $0x168] sm:$0xff] }
 0x1eb   :  { %3276 = vmatpush.bf16.msra.mxu1 %v6045_v24  ;;  %3260 = vmatpush.bf16.msra.mxu3 %v5973_v16  ;;  %v6897_v24 = vld [vmem:[#allocation4 + $0xe8] sm:$0xff] }
 0x1ed   :  { %3551 = vmatpush.bf16.msra.mxu0 %v6899_v0  ;;  %v6912_v0 = vld [vmem:[#allocation4 + $0x160] sm:$0xff] }
 0x1ef   :  { %3277 = vmatpush.bf16.msra.mxu1 %v6033_v23  ;;  %3261 = vmatpush.bf16.msra.mxu3 %v5961_v31  ;;  %v6907_v31 = vld [vmem:[#allocation4 + $0x138] sm:$0xff] }
 0x1f1   :  { %3552 = vmatpush.bf16.msra.mxu0 %v6898_v6 }
 0x1f3   :  { %3278 = vmatpush.bf16.msra.mxu1 %v6021_v19  ;;  %3262 = vmatpush.bf16.msra.mxu3 %v5949_v20  ;;  %v6906_v19 = vld [vmem:[#allocation4 + $0x130] sm:$0xff] }
 0x1f4   :  { %v6878_v20 = vld [vmem:[#allocation4 + $0x50] sm:$0xff] }
 0x1f5   :  { %3553 = vmatpush.bf16.msra.mxu0 %v6897_v24  ;;  %v6924_v24 = vld [vmem:[#allocation4 + $0x1c0] sm:$0xff] }
 0x1f7   :  { %3279 = vmatpush.bf16.msra.mxu1 %v6009_v8  ;;  %3263 = vmatpush.bf16.msra.mxu3 %v5937_v11  ;;  %v6905_v8 = vld [vmem:[#allocation4 + $0x128] sm:$0xff] }
 0x1f8   :  { %v6877_v11 = vld [vmem:[#allocation4 + $0x48] sm:$0xff] }
 0x1f9   :  { %3554 = vmatpush.bf16.msra.mxu0 %v6896_v29  ;;  %v6911_v29 = vld [vmem:[#allocation4 + $0x158] sm:$0xff] }
 0x1fa   :  { %6072 = vmatmul.msk.bf16.vlgmr.msra.gmra.mxu1 %vm2513_vm1, %v7728_v26 }
 0x1fb   :  { %3264 = vmatpush.bf16.msra.mxu3 %v5925_v25  ;;  %3565 = vmatpush.bf16.msrb.mxu1 %v6907_v31 }
 0x1fd   :  { %3731 = vmatpush.bf16.msrb.mxu0 %v6887_v40 }
 0x1ff   :  { %3265 = vmatpush.bf16.msra.mxu3 %v5913_v41  ;;  %3566 = vmatpush.bf16.msrb.mxu1 %v6906_v19  ;;  %v6884_v41 = vld [vmem:[#allocation4 + $0x80] sm:$0xff] }
 0x201   :  { %3732 = vmatpush.bf16.msrb.mxu0 %v6886_v22 }
 0x202   :  { %3266 = vmatmul.bf16.vlgmr.msra.gmra.mxu3 %v7684_v14  ;;  %v6891_v14 = vld [vmem:[#allocation4 + $0xb8] sm:$0xff] }
 0x203   :  { %3537 = vmatpush.bf16.msra.mxu2 %v6891_v14  ;;  %3699 = vmatpush.bf16.msrb.mxu3 %v6875_v50  ;;  %v6926_v50 = vld [vmem:[#allocation4 + $0x1d0] sm:$0xff] }
 0x204   :  { %3567 = vmatpush.bf16.msrb.mxu1 %v6905_v8 }
 0x205   :  { %3733 = vmatpush.bf16.msrb.mxu0 %v6885_v2 }
 0x207   :  { %3538 = vmatpush.bf16.msra.mxu2 %v6890_v42  ;;  %3700 = vmatpush.bf16.msrb.mxu3 %v6874_v59 }
 0x208   :  { %3568 = vmatpush.bf16.msrb.mxu1 %v6904_v27 }
 0x209   :  { %3734 = vmatpush.bf16.msrb.mxu0 %v6884_v41 }
 0x20b   :  { %3539 = vmatpush.bf16.msra.mxu2 %v6889_v33  ;;  %3701 = vmatpush.bf16.msrb.mxu3 %v6873_v57 }
 0x20c   :  { %3902 = vmatpush.bf16.msra.mxu1 %v6915_v55 }
 0x20f   :  { %3540 = vmatpush.bf16.msra.mxu2 %v6888_v51  ;;  %3702 = vmatpush.bf16.msrb.mxu3 %v6872_v10 }
 0x210   :  { %3903 = vmatpush.bf16.msra.mxu1 %v6914_v37 }
 0x213   :  { %3713 = vmatpush.bf16.msrb.mxu2 %v6883_v53  ;;  %3703 = vmatpush.bf16.msrb.mxu3 %v6871_v47 }
 0x214   :  { %3904 = vmatpush.bf16.msra.mxu1 %v6913_v5 }
 0x217   :  { %3714 = vmatpush.bf16.msrb.mxu2 %v6882_v49  ;;  %3704 = vmatpush.bf16.msrb.mxu3 %v6870_v9 }
 0x218   :  { %3905 = vmatpush.bf16.msra.mxu1 %v6912_v0  ;;  %v6921_v0 = vld [vmem:[#allocation4 + $0x1a8] sm:$0xff] }
 0x21b   :  { %3715 = vmatpush.bf16.msrb.mxu2 %v6881_v13  ;;  %3705 = vmatpush.bf16.msrb.mxu3 %v6869_v15  ;;  %v8176_v13 = vld [vmem:[%s8258_s4] sm:$0x7] }
 0x21c   :  { %v3308_v40 = vperm.slane %v8176_v13, 1  ;;  %3906 = vmatpush.bf16.msra.mxu1 %v6911_v29  ;;  %v6918_v29 = vld [vmem:[#allocation4 + $0x190] sm:$0xff] }
 0x21f   :  { %v8121_v30 = vpop.f32.mrf.mxu0  ;;  %3716 = vmatpush.bf16.msrb.mxu2 %v6880_v18  ;;  %3706 = vmatpush.bf16.msrb.mxu3 %v6868_v7  ;;  %v6910_v7 = vld [vmem:[#allocation4 + $0x150] sm:$0xff] }
 0x220   :  { %3907 = vmatpush.bf16.msra.mxu1 %v6910_v7 }
 0x223   :  { %3717 = vmatpush.bf16.msrb.mxu2 %v6879_v38  ;;  %3934 = vmatpush.bf16.msra.mxu3 %v6927_v32 }
 0x225   :  { %v8123_v4 = vpop.f32.mrf.mxu2 }
 0x227   :  { %v8125_v34 = vpop.f32.mrf.mxu1  ;;  %v8127_v45 = vpop.f32.mrf.mxu0  ;;  %3718 = vmatpush.bf16.msrb.mxu2 %v6878_v20  ;;  %3935 = vmatpush.bf16.msra.mxu3 %v6926_v50 }
 0x22b   :  { %3719 = vmatpush.bf16.msrb.mxu2 %v6877_v11 }
 0x22d   :  { %v8129_v26 = vpop.f32.mrf.mxu3  ;;  %v8131_v35 = vpop.f32.mrf.mxu2 }
 0x22e   :  { %v2569_v33 = vadd.f32 %v8129_v26, %v8123_v4 }
 0x22f   :  { %v8133_v39 = vpop.f32.mrf.mxu1  ;;  %v8135_v44 = vpop.f32.mrf.mxu0  ;;  %3720 = vmatpush.bf16.msrb.mxu2 %v6876_v28 }
 0x230   :  { %v2543_v58 = vadd.f32 %v8133_v39, %v8127_v45  ;;  %v2602_v59 = vrot.slane %v2569_v33, 1  ;;  %v6909_v33 = vld [vmem:[#allocation4 + $0x148] sm:$0xff] }
 0x231   :  { %3908 = vmatpush.bf16.msra.mxu1 %v6909_v33  ;;  %v6966_v33 = vld [vmem:[#allocation4 + $0x310] sm:$0xff] }
 0x235   :  { %v8137_v17 = vpop.f32.mrf.mxu3  ;;  %v8139_v48 = vpop.f32.mrf.mxu2 }
 0x236   :  { %v2571_v42 = vadd.f32 %v8137_v17, %v8131_v35  ;;  %v2604_v35 = vrot.slane %v2543_v58, 1 }
 0x237   :  { %v2582_v46 = vpop.f32.mrf.mxu1  ;;  %v8141_v56 = vpop.f32.mrf.mxu0 }
 0x238   :  { %v2605_v51 = vrot.slane %v2571_v42, 1 }
 0x23a   :  { %v2608_v4 = vsel %vm358_vm0, %v2602_v59, %v2605_v51  ;;  %v2611_v45 = vsel %vm358_vm0, %v2605_v51, %v2602_v59 }
 0x23d   :  { %v2596_v62 = vpop.f32.mrf.mxu3  ;;  %v8145_v63 = vpop.f32.mrf.mxu2 }
 0x23e   :  { %v8143_v3 = vadd.f32 %v2596_v62, %v2582_v46  ;;  %v2541_v46 = vadd.f32 %v8125_v34, %v8121_v30  ;;  %v6925_v62 = vld [vmem:[#allocation4 + $0x1c8] sm:$0xff] }
 0x23f   :  { %v8147_v21 = vpop.f32.mrf.mxu1  ;;  %v8151_v54 = vpop.f32.mrf.mxu0  ;;  %3936 = vmatpush.bf16.msra.mxu3 %v6925_v62 }
 0x240   :  { %v2601_v39 = vrot.slane %v2541_v46, 1  ;;  %v6908_v46 = vld [vmem:[#allocation4 + $0x140] sm:$0xff] }
 0x241   :  { %3909 = vmatpush.bf16.msra.mxu1 %v6908_v46  ;;  %v6952_v46 = vld [vmem:[#allocation4 + $0x2a0] sm:$0xff] }
 0x242   :  { %v2607_v10 = vsel %vm358_vm0, %v2601_v39, %v2604_v35 }
 0x243   :  { %3937 = vmatpush.bf16.msra.mxu3 %v6924_v24  ;;  %v2847_v9 = vadd.f32 %v8135_v44, %v2607_v10  ;;  %v6932_v24 = vld [vmem:[#allocation4 + $0x200] sm:$0xff] }
 0x245   :  { %v8149_v16 = vpop.f32.mrf.mxu3  ;;  %v2861_v41 = vadd.f32 %v8139_v48, %v2847_v9 }
 0x247   :  { %v8155_v12 = vpop.f32.mrf.mxu1  ;;  %v8157_v61 = vpop.f32.mrf.mxu0 }
 0x248   :  { %v8153_v23 = vpop.f32.mrf.mxu2 }
 0x24d   :  { %v2874_v1 = vpop.f32.mrf.mxu3 }
 0x24e   :  { %v2875_v49 = vadd.f32 %v2874_v1, %v2608_v4  ;;  %v6934_v4 = vld [vmem:[#allocation4 + $0x210] sm:$0xff] }
 0x24f   :  { %v2890_v52 = vpop.f32.mrf.mxu1 }
 0x250   :  { %v8159_v25 = vpop.f32.mrf.mxu2  ;;  %v2889_v31 = vadd.f32 %v8155_v12, %v2875_v49  ;;  %v2610_v12 = vsel %vm358_vm0, %v2604_v35, %v2601_v39  ;;  %v6935_v35 = vld [vmem:[#allocation4 + $0x218] sm:$0xff]  ;;  %v2599_v39 = vadd.f32 %v8149_v16, %v8147_v21 }
 0x251   :  { %v2849_v27 = vadd.f32 %v8141_v56, %v2610_v12  ;;  %v6923_v56 = vld [vmem:[#allocation4 + $0x1b8] sm:$0xff] }
 0x252   :  { %v2606_v10 = vrot.slane %v2599_v39, 1  ;;  %v6931_v16 = vld [vmem:[#allocation4 + $0x1f8] sm:$0xff]  ;;  %v6937_v39 = vld [vmem:[#allocation4 + $0x228] sm:$0xff] }
 0x253   :  { %v2863_v32 = vadd.f32 %v8145_v63, %v2849_v27  ;;  %v6922_v63 = vld [vmem:[#allocation4 + $0x1b0] sm:$0xff] }
 0x255   :  { %v2876_v14 = vpop.f32.mrf.mxu3 }
 0x256   :  { %v2877_v57 = vadd.f32 %v2876_v14, %v2611_v45  ;;  %v6946_v45 = vld [vmem:[#allocation4 + $0x270] sm:$0xff] }
 0x258   :  { %v2891_v38 = vadd.f32 %v2890_v52, %v2877_v57  ;;  %v6933_v57 = vld [vmem:[#allocation4 + $0x208] sm:$0xff] }
 0x259   :  { %v3239_v36 = vpop.f32.mrf.mxu0 }
 0x25f   :  { %v3253_v43 = vpop.f32.mrf.mxu2  ;;  %v3211_v53 = vpop.f32.mrf.mxu1 }
 0x260   :  { %v3254_v26 = vadd.f32 %v3253_v43, %v3239_v36  ;;  %v3307_v36 = vperm.slane %v8176_v13, 0 }
 0x261   :  { %v3241_v6 = vpop.f32.mrf.mxu0 }
 0x262   :  { %v3287_v18 = vrot.slane %v3254_v26, 2  ;;  %v6920_v26 = vld [vmem:[#allocation4 + $0x1a0] sm:$0xff] }
 0x265   :  { %v3225_v17 = vpop.f32.mrf.mxu3 }
 0x266   :  { %v3226_v19 = vadd.f32 %v3225_v17, %v3211_v53  ;;  %v6947_v17 = vld [vmem:[#allocation4 + $0x278] sm:$0xff] }
 0x267   :  { %v3255_v30 = vpop.f32.mrf.mxu2  ;;  %v3213_v15 = vpop.f32.mrf.mxu1 }
 0x268   :  { %v3256_v34 = vadd.f32 %v3255_v30, %v3241_v6  ;;  %v3286_v55 = vrot.slane %v3226_v19, 2  ;;  %v6945_v6 = vld [vmem:[#allocation4 + $0x268] sm:$0xff] }
 0x26a   :  { %v3290_v47 = vrot.slane %v3256_v34, 2  ;;  %v6919_v34 = vld [vmem:[#allocation4 + $0x198] sm:$0xff] }
 0x26c   :  { %v3294_v20 = vsel %vm3292_vm2, %v3287_v18, %v3290_v47  ;;  %v3297_v22 = vsel %vm3292_vm2, %v3290_v47, %v3287_v18  ;;  %v6944_v18 = vld [vmem:[#allocation4 + $0x260] sm:$0xff]  ;;  %v2603_v47 = vrot.slane %v8143_v3, 1  ;;  %v6917_v3 = vld [vmem:[#allocation4 + $0x188] sm:$0xff] }
 0x26d   :  { %v3300_v1 = vadd.f32 %v3294_v20, %v2889_v31  ;;  %v3303_v8 = vadd.f32 %v3297_v22, %v2891_v38  ;;  %v3227_v11 = vpop.f32.mrf.mxu3 }
 0x26e   :  { %v3228_v2 = vadd.f32 %v3227_v11, %v3213_v15  ;;  %v2609_v21 = vsel %vm358_vm0, %v2603_v47, %v2606_v10  ;;  %v2612_v31 = vsel %vm358_vm0, %v2606_v10, %v2603_v47  ;;  %v6930_v15 = vld [vmem:[#allocation4 + $0x1f0] sm:$0xff] }
 0x26f   :  { %v3314_v44 = vadd.f32 %v3308_v40, %v3300_v1  ;;  %v3317_v28 = vadd.f32 %v3308_v40, %v3303_v8  ;;  %v2903_v40 = vadd.f32 %v8153_v23, %v2609_v21  ;;  %v2905_v9 = vadd.f32 %v8159_v25, %v2612_v31  ;;  %v6916_v23 = vld [vmem:[#allocation4 + $0x180] sm:$0xff] }
 0x270   :  { %v3289_v52 = vrot.slane %v3228_v2, 2  ;;  %v3309_v2 = vperm.slane %v8176_v13, 2 }
 0x271   :  { %v3320_v37 = vmax.f32 %v3314_v44, 0.0  ;;  %v3323_v14 = vmax.f32 %v3317_v28, 0.0  ;;  %v2917_v11 = vadd.f32 %v8151_v54, %v2903_v40  ;;  %v2919_v12 = vadd.f32 %v8157_v61, %v2905_v9  ;;  %v6929_v28 = vld [vmem:[#allocation4 + $0x1e8] sm:$0xff]  ;;  %v6928_v61 = vld [vmem:[#allocation4 + $0x1e0] sm:$0xff] }
 0x272   :  { %v3293_v42 = vsel %vm3292_vm2, %v3286_v55, %v3289_v52  ;;  %v3296_v43 = vsel %vm3292_vm2, %v3289_v52, %v3286_v55 }
 0x273   :  { %v8198_v58 = vpack.c.bf16 %v3323_v14, %v3320_v37  ;;  %v3299_v48 = vadd.f32 %v3293_v42, %v2861_v41  ;;  %v3302_v50 = vadd.f32 %v3296_v43, %v2863_v32  ;;  %v6943_v32 = vld [vmem:[#allocation4 + $0x258] sm:$0xff]  ;;  %v6942_v42 = vld [vmem:[#allocation4 + $0x250] sm:$0xff] }
 0x274   :  { %v6955_v37 = vld [vmem:[#allocation4 + $0x2b8] sm:$0xff]  ;;  %v6954_v43 = vld [vmem:[#allocation4 + $0x2b0] sm:$0xff] }
 0x275   :  { %v3313_v51 = vadd.f32 %v3307_v36, %v3299_v48  ;;  %v3316_v5 = vadd.f32 %v3307_v36, %v3302_v50  ;;  %3555 = vmatmul.bf16.vlgmr.msra.gmra.mxu0 %v8198_v58  ;;  %v6963_v14 = vld [vmem:[#allocation4 + $0x2f8] sm:$0xff]  ;;  %v6941_v48 = vld [vmem:[#allocation4 + $0x248] sm:$0xff] }
 0x276   :  { %3916 = vmatpush.bf16.msra.mxu0 %v6923_v56  ;;  %v6967_v36 = vld [vmem:[#allocation4 + $0x318] sm:$0xff]  ;;  %v6962_v56 = vld [vmem:[#allocation4 + $0x2f0] sm:$0xff]  ;;  %v6953_v50 = vld [vmem:[#allocation4 + $0x2a8] sm:$0xff] }
 0x277   :  { %v3319_v53 = vmax.f32 %v3313_v51, 0.0  ;;  %v3322_v59 = vmax.f32 %v3316_v5, 0.0  ;;  %v3281_v49 = vpop.f32.mrf.mxu1  ;;  %v6961_v51 = vld [vmem:[#allocation4 + $0x2e8] sm:$0xff] }
 0x278   :  { %v6965_v5 = vld [vmem:[#allocation4 + $0x308] sm:$0xff] }
 0x279   :  { %v8201_v62 = vpack.c.bf16 %v3322_v59, %v3319_v53  ;;  %v6960_v53 = vld [vmem:[#allocation4 + $0x2e0] sm:$0xff] }
 0x27a   :  { %3917 = vmatpush.bf16.msra.mxu0 %v6922_v63  ;;  %v6940_v63 = vld [vmem:[#allocation4 + $0x240] sm:$0xff] }
 0x27b   :  { %3541 = vmatmul.bf16.vlgmr.msra.gmra.mxu2 %v8201_v62  ;;  %3707 = vmatmul.bf16.vlgmr.msrb.gmra.mxu3 %v8201_v62  ;;  %v6964_v59 = vld [vmem:[#allocation4 + $0x300] sm:$0xff] }
 0x27c   :  { %4111 = vmatpush.bf16.msra.mxu2 %v6935_v35  ;;  %4143 = vmatpush.bf16.msrb.mxu3 %v6947_v17  ;;  %v6939_v35 = vld [vmem:[#allocation4 + $0x238] sm:$0xff] }
 0x27d   :  { %v6951_v17 = vld [vmem:[#allocation4 + $0x298] sm:$0xff] }
 0x27e   :  { %3918 = vmatpush.bf16.msra.mxu0 %v6921_v0  ;;  %v6959_v0 = vld [vmem:[#allocation4 + $0x2d8] sm:$0xff] }
 0x27f   :  { %v3283_v19 = vpop.f32.mrf.mxu1 }
 0x280   :  { %4112 = vmatpush.bf16.msra.mxu2 %v6934_v4  ;;  %4144 = vmatpush.bf16.msrb.mxu3 %v6946_v45  ;;  %v6938_v4 = vld [vmem:[#allocation4 + $0x230] sm:$0xff] }
 0x281   :  { %v6950_v45 = vld [vmem:[#allocation4 + $0x290] sm:$0xff] }
 0x282   :  { %3919 = vmatpush.bf16.msra.mxu0 %v6920_v26  ;;  %v6958_v26 = vld [vmem:[#allocation4 + $0x2d0] sm:$0xff] }
 0x284   :  { %4113 = vmatpush.bf16.msra.mxu2 %v6933_v57  ;;  %4145 = vmatpush.bf16.msrb.mxu3 %v6945_v6  ;;  %v6957_v57 = vld [vmem:[#allocation4 + $0x2c8] sm:$0xff]  ;;  %v6936_v6 = vld [vmem:[#allocation4 + $0x220] sm:$0xff] }
 0x285   :  { %v3267_v30 = vpop.f32.mrf.mxu3 }
 0x286   :  { %3920 = vmatpush.bf16.msra.mxu0 %v6919_v34  ;;  %v3282_v38 = vadd.f32 %v3281_v49, %v3267_v30  ;;  %v6949_v49 = vld [vmem:[#allocation4 + $0x288] sm:$0xff]  ;;  %v6948_v30 = vld [vmem:[#allocation4 + $0x280] sm:$0xff] }
 0x287   :  { %v6956_v34 = vld [vmem:[#allocation4 + $0x2c0] sm:$0xff] }
 0x288   :  { %4114 = vmatpush.bf16.msra.mxu2 %v6932_v24  ;;  %4146 = vmatpush.bf16.msrb.mxu3 %v6944_v18  ;;  %v3288_v1 = vrot.slane %v3282_v38, 2 }
 0x28a   :  { %3921 = vmatpush.bf16.msra.mxu0 %v6918_v29 }
 0x28b   :  { %3721 = vmatmul.bf16.vlgmr.msrb.gmra.mxu2 %v8198_v58 }
 0x28c   :  { %4115 = vmatpush.bf16.msra.mxu2 %v6931_v16 }
 0x28d   :  { %v3269_v20 = vpop.f32.mrf.mxu3 }
 0x28e   :  { %v3284_v22 = vadd.f32 %v3283_v19, %v3269_v20  ;;  %3922 = vmatpush.bf16.msra.mxu0 %v6917_v3 }
 0x290   :  { %v3291_v8 = vrot.slane %v3284_v22, 2  ;;  %4116 = vmatpush.bf16.msra.mxu2 %v6930_v15 }
 0x292   :  { %v3295_v25 = vsel %vm3292_vm2, %v3288_v1, %v3291_v8  ;;  %v3298_v7 = vsel %vm3292_vm2, %v3291_v8, %v3288_v1  ;;  %3923 = vmatpush.bf16.msra.mxu0 %v6916_v23 }
 0x293   :  { %v3301_v27 = vadd.f32 %v3295_v25, %v2917_v11  ;;  %v3304_v44 = vadd.f32 %v3298_v7, %v2919_v12 }
 0x294   :  { %4117 = vmatpush.bf16.msra.mxu2 %v6929_v28 }
 0x295   :  { %v3315_v41 = vadd.f32 %v3309_v2, %v3301_v27  ;;  %v3318_v55 = vadd.f32 %v3309_v2, %v3304_v44 }
 0x297   :  { %v3321_v54 = vmax.f32 %v3315_v41, 0.0  ;;  %v3324_v52 = vmax.f32 %v3318_v55, 0.0 }
 0x298   :  { %4118 = vmatpush.bf16.msra.mxu2 %v6928_v61 }
 0x299   :  { %v3327_v13 = vpack.c.bf16 %v3324_v52, %v3321_v54 }
 0x29b   :  { %6153 = vmatmul.msk.bf16.vlgmr.msrb.gmra.mxu1 %vm3529_vm3, %v3327_v13  ;;  %6234 = vmatmul.msk.bf16.vlgmr.msrb.gmra.mxu0 %vm3529_vm3, %v3327_v13 }
 0x29c   :  { %6315 = vmatmul.msk.bf16.vlgmr.msra.gmra.mxu3 %vm3529_vm3, %v3327_v13  ;;  %4125 = vmatpush.bf16.msrb.mxu1 %v6943_v32 }
 0x29d   :  { %4321 = vmatpush.bf16.msrb.mxu0 %v6955_v37  ;;  %4335 = vmatpush.bf16.msra.mxu3 %v6963_v14 }
 0x29e   :  { %4353 = vmatpush.bf16.msrb.mxu2 %v6967_v36 }
 0x29f   :  { %4119 = vmatmul.bf16.vlgmr.msra.gmra.mxu2 %v8201_v62 }
 0x2a0   :  { %4126 = vmatpush.bf16.msrb.mxu1 %v6942_v42 }
 0x2a1   :  { %4322 = vmatpush.bf16.msrb.mxu0 %v6954_v43  ;;  %4336 = vmatpush.bf16.msra.mxu3 %v6962_v56 }
 0x2a2   :  { %4354 = vmatpush.bf16.msrb.mxu2 %v6966_v33 }
 0x2a4   :  { %4127 = vmatpush.bf16.msrb.mxu1 %v6941_v48 }
 0x2a5   :  { %4323 = vmatpush.bf16.msrb.mxu0 %v6953_v50  ;;  %4337 = vmatpush.bf16.msra.mxu3 %v6961_v51 }
 0x2a6   :  { %4355 = vmatpush.bf16.msrb.mxu2 %v6965_v5 }
 0x2a8   :  { %4128 = vmatpush.bf16.msrb.mxu1 %v6940_v63 }
 0x2a9   :  { %4324 = vmatpush.bf16.msrb.mxu0 %v6952_v46  ;;  %4338 = vmatpush.bf16.msra.mxu3 %v6960_v53 }
 0x2aa   :  { %4356 = vmatpush.bf16.msrb.mxu2 %v6964_v59 }
 0x2ab   :  { %3910 = vmatmul.bf16.vlgmr.msra.gmra.mxu1 %v8201_v62  ;;  %3924 = vmatmul.bf16.vlgmr.msra.gmra.mxu0 %v8198_v58 }
 0x2ac   :  { %6396 = vmatmul.msk.bf16.vlgmr.msrb.gmra.mxu3 %vm3529_vm3, %v3327_v13  ;;  %4129 = vmatpush.bf16.msrb.mxu1 %v6939_v35 }
 0x2ad   :  { %4325 = vmatpush.bf16.msrb.mxu0 %v6951_v17  ;;  %4339 = vmatpush.bf16.msra.mxu3 %v6959_v0 }
 0x2af   :  { %6477 = vmatmul.msk.bf16.vlgmr.msrb.gmra.mxu2 %vm3529_vm3, %v3327_v13 }
 0x2b0   :  { %4130 = vmatpush.bf16.msrb.mxu1 %v6938_v4 }
 0x2b1   :  { %4326 = vmatpush.bf16.msrb.mxu0 %v6950_v45  ;;  %4340 = vmatpush.bf16.msra.mxu3 %v6958_v26 }
 0x2b4   :  { %4131 = vmatpush.bf16.msrb.mxu1 %v6937_v39 }
 0x2b5   :  { %4327 = vmatpush.bf16.msrb.mxu0 %v6949_v49  ;;  %4341 = vmatpush.bf16.msra.mxu3 %v6957_v57 }
 0x2b8   :  { %4132 = vmatpush.bf16.msrb.mxu1 %v6936_v6 }
 0x2b9   :  { %4328 = vmatpush.bf16.msrb.mxu0 %v6948_v30  ;;  %4342 = vmatpush.bf16.msra.mxu3 %v6956_v34 }
 0x2bb   :  { %4133 = vmatmul.bf16.vlgmr.msrb.gmra.mxu1 %v8198_v58 }
 0x2bc   :  { %4329 = vmatmul.bf16.vlgmr.msrb.gmra.mxu0 %v8201_v62  ;;  %4343 = vmatmul.bf16.vlgmr.msra.gmra.mxu3 %v8198_v58 }
 0x2f2   :  { %v3556_v24 = vpop.f32.mrf.mxu0 }
 0x2fa   :  { %v3558_v29 = vpop.f32.mrf.mxu0 }
 0x2fe   :  { %v3542_v10 = vpop.f32.mrf.mxu2  ;;  %v3708_v18 = vpop.f32.mrf.mxu3 }
 0x2ff   :  { %v3557_v2 = vadd.f32 %v3556_v24, %v3542_v10 }
 0x306   :  { %v3544_v47 = vpop.f32.mrf.mxu2  ;;  %v3710_v21 = vpop.f32.mrf.mxu3 }
 0x307   :  { %v3559_v11 = vadd.f32 %v3558_v29, %v3544_v47 }
 0x30e   :  { %v3722_v16 = vpop.f32.mrf.mxu2 }
 0x316   :  { %v3724_v20 = vpop.f32.mrf.mxu2 }
 0x318   :  { %v3570_v31 = vpop.f32.mrf.mxu1  ;;  %v3736_v38 = vpop.f32.mrf.mxu0 }
 0x319   :  { %v3571_v7 = vadd.f32 %v3570_v31, %v3557_v2  ;;  %v6974_v31 = vld [vmem:[%s8260_s6] ss:$0 sm:$0xff] }
 0x31b   :  { %v3575_v41 = vrot.slane %v3571_v7, 1 }
 0x31f   :  { %v3939_v40 = vpop.f32.mrf.mxu3 }
 0x320   :  { %v3572_v9 = vpop.f32.mrf.mxu1  ;;  %v3738_v19 = vpop.f32.mrf.mxu0 }
 0x321   :  { %v3573_v23 = vadd.f32 %v3572_v9, %v3559_v11 }
 0x322   :  { %v4120_v1 = vpop.f32.mrf.mxu2 }
 0x323   :  { %v3576_v44 = vrot.slane %v3573_v23, 1 }
 0x325   :  { %v3577_v52 = vsel %vm358_vm0, %v3575_v41, %v3576_v44  ;;  %v3578_v61 = vsel %vm358_vm0, %v3576_v44, %v3575_v41 }
 0x326   :  { %v3709_v42 = vadd.f32 %v3708_v18, %v3577_v52  ;;  %v3711_v43 = vadd.f32 %v3710_v21, %v3578_v61 }
 0x327   :  { %v3941_v3 = vpop.f32.mrf.mxu3 }
 0x328   :  { %v3911_v22 = vpop.f32.mrf.mxu1  ;;  %v3925_v15 = vpop.f32.mrf.mxu0  ;;  %v3723_v63 = vadd.f32 %v3722_v16, %v3709_v42  ;;  %v3725_v46 = vadd.f32 %v3724_v20, %v3711_v43 }
 0x329   :  { %v3926_v55 = vadd.f32 %v3925_v15, %v3911_v22 }
 0x32a   :  { %v4122_v12 = vpop.f32.mrf.mxu2  ;;  %v3739_v49 = vadd.f32 %v3738_v19, %v3725_v46  ;;  %v3737_v57 = vadd.f32 %v3736_v38, %v3723_v63 }
 0x32b   :  { %v3940_v56 = vadd.f32 %v3939_v40, %v3926_v55 }
 0x32d   :  { %v3944_v53 = vrot.slane %v3940_v56, 2 }
 0x32f   :  { %v4148_v62 = vpop.f32.mrf.mxu3 }
 0x330   :  { %v3913_v8 = vpop.f32.mrf.mxu1  ;;  %v3927_v58 = vpop.f32.mrf.mxu0 }
 0x331   :  { %v3928_v28 = vadd.f32 %v3927_v58, %v3913_v8 }
 0x332   :  { %v4358_v32 = vpop.f32.mrf.mxu2 }
 0x333   :  { %v3942_v13 = vadd.f32 %v3941_v3, %v3928_v28 }
 0x335   :  { %v3945_v48 = vrot.slane %v3942_v13, 2 }
 0x337   :  { %v4150_v25 = vpop.f32.mrf.mxu3  ;;  %v3946_v35 = vsel %vm3292_vm2, %v3944_v53, %v3945_v48  ;;  %v3947_v4 = vsel %vm3292_vm2, %v3945_v48, %v3944_v53 }
 0x338   :  { %v4134_v27 = vpop.f32.mrf.mxu1  ;;  %v3948_v24 = vadd.f32 %v3946_v35, %v3737_v57  ;;  %v3949_v18 = vadd.f32 %v3947_v4, %v3739_v49 }
 0x339   :  { %v4330_v54 = vpop.f32.mrf.mxu0  ;;  %v4135_v14 = vadd.f32 %v4134_v27, %v4120_v1 }
 0x33a   :  { %v4360_v6 = vpop.f32.mrf.mxu2 }
 0x33b   :  { %v4149_v51 = vadd.f32 %v4148_v62, %v4135_v14 }
 0x33d   :  { %v4153_v45 = vrot.slane %v4149_v51, 3 }
 0x33f   :  { %v4344_v37 = vpop.f32.mrf.mxu3 }
 0x340   :  { %v4136_v36 = vpop.f32.mrf.mxu1  ;;  %v4345_v5 = vadd.f32 %v4344_v37, %v4330_v54 }
 0x341   :  { %v4137_v33 = vadd.f32 %v4136_v36, %v4122_v12  ;;  %v4332_v17 = vpop.f32.mrf.mxu0 }
 0x342   :  { %v4359_v26 = vadd.f32 %v4358_v32, %v4345_v5 }
 0x343   :  { %v4151_v50 = vadd.f32 %v4150_v25, %v4137_v33 }
 0x344   :  { %v4363_v47 = vrot.slane %v4359_v26, 4 }
 0x345   :  { %v4154_v59 = vrot.slane %v4151_v50, 3 }
 0x347   :  { %v4346_v0 = vpop.f32.mrf.mxu3  ;;  %v4156_v30 = vsel %vm4155_vm4, %v4153_v45, %v4154_v59  ;;  %v4157_v34 = vsel %vm4155_vm4, %v4154_v59, %v4153_v45 }
 0x348   :  { %v4347_v39 = vadd.f32 %v4346_v0, %v4332_v17  ;;  %v4158_v21 = vadd.f32 %v4156_v30, %v3948_v24  ;;  %v4159_v16 = vadd.f32 %v4157_v34, %v3949_v18 }
 0x34a   :  { %v4361_v10 = vadd.f32 %v4360_v6, %v4347_v39 }
 0x34c   :  { %v4364_v29 = vrot.slane %v4361_v10, 4 }
 0x34e   :  { %v4366_v40 = vsel %vm4365_vm5, %v4363_v47, %v4364_v29  ;;  %v4367_v9 = vsel %vm4365_vm5, %v4364_v29, %v4363_v47 }
 0x34f   :  { %v4368_v19 = vadd.f32 %v4366_v40, %v4158_v21  ;;  %v4369_v38 = vadd.f32 %v4367_v9, %v4159_v16 }
 0x351   :  { %v4374_v20 = vadd.f32 %v6974_v31, %v4368_v19  ;;  %v4375_v3 = vadd.f32 %v6974_v31, %v4369_v38 }
 0x353   :  { %v4376_v22 = vmax.f32 %v4374_v20, 0.0  ;;  %v4377_v15 = vmax.f32 %v4375_v3, 0.0 }
 0x355   :  { %4378 = vst.msk [vmem:[%s8261_s7] sm:$0xff] %vm3529_vm3, %v4376_v22 }
 0x356   :  { %4379 = vst.msk [vmem:[%s8261_s7 + $0x8] sm:$0xff] %vm3529_vm3, %v4377_v15 }
 0x357   :  { %4384 = vsyncpa [#allocation3], 1 }
 0x358   :  { %4385 = vsyncpa [#allocation5], 1 }

</bundles_post_ra>
